<compile_context>
chip_gen: v5e
topology: v5e:2x2
jax: 0.10.0
libtpu: 0.0.40
codegen_flags: <defaults>
</compile_context>

<pallas_src>
import jax
import jax.numpy as jnp
from jax.experimental import pallas as pl
from jax.experimental.pallas import tpu as pltpu

# ------------------------------ small synthetic dims ------------------------------
B, T = 2, 20          # fc1 = Linear(21*dim_val, 4*dim_val)  =>  T + 1 == 21  =>  T = 20
D_IN = 16             # input_size
DIM_VAL = 32          # hidden size H (dim_val)
N_LAYERS = 2
# dim_attn / n_heads / dropout ctor args are unused by the torch forward pass.


# ------------------------------------ kernel --------------------------------------
def mylstm_kernel(x_ref,
                  wih0_ref, whh0_ref, b0_ref,
                  wih1_ref, whh1_ref, b1_ref,
                  womega_ref, uomega_ref,
                  fc1w_ref, fc1b_ref, fc2w_ref, fc2b_ref,
                  out_ref):
    Bn, Tn, Dn = x_ref.shape
    H = whh0_ref.shape[0]

    def run_layer(step_in, whh):
        """One LSTM layer. step_in(t) -> (B, 4H) precomputed x_t @ W_ih^T + b.
        Gate column order is (i, f, o, g): one sigmoid over [0:3H), one tanh over [3H:4H)."""
        h = jnp.zeros((Bn, H), jnp.float32)
        c = jnp.zeros((Bn, H), jnp.float32)
        outs = []
        for t in range(Tn):                        # static full unroll — LLO sees whole chain
            gates = step_in(t) + jnp.dot(h, whh, preferred_element_type=jnp.float32)
            sig = jax.nn.sigmoid(gates[:, :3 * H])             # i | f | o (one EUP pass)
            g = jnp.tanh(gates[:, 3 * H:])                     # g
            c = sig[:, H:2 * H] * c + sig[:, :H] * g
            h = sig[:, 2 * H:] * jnp.tanh(c)
            outs.append(h)
        return outs

    # ---- layer 0: input projection hoisted out of the recurrence (1 MXU push) ----
    x_bm = jnp.concatenate([x_ref[b] for b in range(Bn)], axis=0)          # (B*T, D)
    xw0 = jnp.dot(x_bm, wih0_ref[...], preferred_element_type=jnp.float32) + b0_ref[...]
    xw0_b = [xw0[b * Tn:(b + 1) * Tn, :] for b in range(Bn)]               # per-batch (T, 4H)
    outs0 = run_layer(
        lambda t: jnp.concatenate([w[t:t + 1, :] for w in xw0_b], axis=0),
        whh0_ref[...])

    # ---- layer 1: project the whole layer-0 sequence with one batched matmul ----
    seq0_tm = jnp.concatenate(outs0, axis=0)                               # (T*B, H) time-major
    xw1 = jnp.dot(seq0_tm, wih1_ref[...], preferred_element_type=jnp.float32) + b1_ref[...]
    outs1 = run_layer(lambda t: xw1[t * Bn:(t + 1) * Bn, :], whh1_ref[...])

    # ---- attention over the LSTM output sequence (batch-first semantics) ----
    seq1_tm = jnp.concatenate(outs1, axis=0)                               # (T*B, H)
    u = jnp.tanh(jnp.dot(seq1_tm, womega_ref[...], preferred_element_type=jnp.float32))
    uo = uomega_ref[...]                                                   # (1, H)
    scores = [jnp.sum(u[t * Bn:(t + 1) * Bn, :] * uo, axis=1, keepdims=True)
              for t in range(Tn)]                                          # T x (B, 1)
    attn = jnp.concatenate(scores, axis=1)                                 # (B, T)
    m = jnp.max(attn, axis=1, keepdims=True)
    e = jnp.exp(attn - m)
    score = e / jnp.sum(e, axis=1, keepdims=True)                          # softmax over T
    context = jnp.zeros((Bn, H), jnp.float32)
    for t in range(Tn):
        context = context + outs1[t] * score[:, t:t + 1]                   # (B, H)

    # ---- head: cat(context, flatten(lstm_out)) -> fc1 -> ReLU -> fc2 ----
    flat = jnp.concatenate(outs1, axis=1)                                  # (B, T*H) lane concat
    feat = jnp.concatenate([context, flat], axis=1)                        # (B, (T+1)*H)
    z = jnp.dot(feat, fc1w_ref[...], preferred_element_type=jnp.float32) + fc1b_ref[...]
    z = jnp.maximum(z, 0.0)                                                # ReLU
    out = jnp.dot(z, fc2w_ref[...], preferred_element_type=jnp.float32) + fc2b_ref[...]
    out_ref[...] = jnp.broadcast_to(out, out_ref.shape)                    # lane-dense (B, 128)


# ------------------------------------ wrapper --------------------------------------
def mylstm_forward(x, kp):
    Bn = x.shape[0]
    vmem = pl.BlockSpec(memory_space=pltpu.MemorySpace.VMEM)
    out_pad = pl.pallas_call(
        mylstm_kernel,
        out_shape=jax.ShapeDtypeStruct((Bn, 128), jnp.float32),
        in_specs=[vmem] * 13,
        out_specs=vmem,
    )(x,
      kp["wih0_t"], kp["whh0_t"], kp["b0"],
      kp["wih1_t"], kp["whh1_t"], kp["b1"],
      kp["womega"], kp["uomega_row"],
      kp["fc1w_t"], kp["fc1b"], kp["fc2w_t"], kp["fc2b"])
    return out_pad[:, :1]                                                  # (B, 1)


# ------------------------- deterministic PyTorch-layout params ----------------------
def init_params(key, d_in, h, t_seq):
    ks = jax.random.split(key, 14)
    u = lambda k, shape, lo, hi: jax.random.uniform(k, shape, jnp.float32, lo, hi)
    s = 1.0 / (h ** 0.5)
    feat = (t_seq + 1) * h
    s1 = 1.0 / (feat ** 0.5)
    s2 = 1.0 / ((4 * h) ** 0.5)
    return {
        "w_omega": u(ks[0], (h, h), -0.01, 0.01),
        "u_omega": u(ks[1], (h, 1), -0.01, 0.01),
        # nn.LSTM weights, PyTorch gate order (i, f, g, o)
        "w_ih_l0": u(ks[2], (4 * h, d_in), -s, s),
        "w_hh_l0": u(ks[3], (4 * h, h), -s, s),
        "b_ih_l0": u(ks[4], (4 * h,), -s, s),
        "b_hh_l0": u(ks[5], (4 * h,), -s, s),
        "w_ih_l1": u(ks[6], (4 * h, h), -s, s),
        "w_hh_l1": u(ks[7], (4 * h, h), -s, s),
        "b_ih_l1": u(ks[8], (4 * h,), -s, s),
        "b_hh_l1": u(ks[9], (4 * h,), -s, s),
        # fc1 (21H -> 4H), fc2 (4H -> 1)
        "fc1_w": u(ks[10], (4 * h, feat), -s1, s1),
        "fc1_b": u(ks[11], (4 * h,), -s1, s1),
        "fc2_w": u(ks[12], (1, 4 * h), -s2, s2),
        "fc2_b": u(ks[13], (1,), -s2, s2),
    }


def prepare_params(p, h):
    """One-time weight prep for the kernel: transpose, sum biases, permute gate
    columns (i,f,g,o) -> (i,f,o,g), and lay u_omega out as a (1, H) row."""
    def perm(w):                                   # last axis = 4H in PyTorch order
        return jnp.concatenate([w[..., :2 * h], w[..., 3 * h:], w[..., 2 * h:3 * h]], axis=-1)
    return {
        "wih0_t": perm(p["w_ih_l0"].T),
        "whh0_t": perm(p["w_hh_l0"].T),
        "b0": perm(p["b_ih_l0"] + p["b_hh_l0"])[None, :],
        "wih1_t": perm(p["w_ih_l1"].T),
        "whh1_t": perm(p["w_hh_l1"].T),
        "b1": perm(p["b_ih_l1"] + p["b_hh_l1"])[None, :],
        "womega": p["w_omega"],
        "uomega_row": p["u_omega"].T,
        "fc1w_t": p["fc1_w"].T,
        "fc1b": p["fc1_b"][None, :],
        "fc2w_t": p["fc2_w"].T,
        "fc2b": p["fc2_b"][None, :],
    }


# -------------------------------- pure-JAX reference --------------------------------
def reference_forward(x, p):
    Bn, Tn, _ = x.shape
    H = p["w_hh_l0"].shape[1]

    def lstm_layer(seq, w_ih, w_hh, b_ih, b_hh):   # PyTorch gate order (i, f, g, o)
        h = jnp.zeros((Bn, H), jnp.float32)
        c = jnp.zeros((Bn, H), jnp.float32)
        outs = []
        for t in range(Tn):
            g = seq[:, t, :] @ w_ih.T + h @ w_hh.T + b_ih + b_hh
            i = jax.nn.sigmoid(g[:, :H])
            f = jax.nn.sigmoid(g[:, H:2 * H])
            gg = jnp.tanh(g[:, 2 * H:3 * H])
            o = jax.nn.sigmoid(g[:, 3 * H:])
            c = f * c + i * gg
            h = o * jnp.tanh(c)
            outs.append(h)
        return jnp.stack(outs, axis=1)

    seq0 = lstm_layer(x, p["w_ih_l0"], p["w_hh_l0"], p["b_ih_l0"], p["b_hh_l0"])
    seq1 = lstm_layer(seq0, p["w_ih_l1"], p["w_hh_l1"], p["b_ih_l1"], p["b_hh_l1"])

    u = jnp.tanh(jnp.einsum("bth,hk->btk", seq1, p["w_omega"]))
    attn = jnp.einsum("bth,hk->btk", u, p["u_omega"])          # (B, T, 1)
    score = jax.nn.softmax(attn, axis=1)
    context = jnp.sum(seq1 * score, axis=1)                    # (B, H)

    flat = seq1.reshape(Bn, Tn * H)
    feat = jnp.concatenate([context, flat], axis=1)            # (B, 21H)
    z = jnp.maximum(feat @ p["fc1_w"].T + p["fc1_b"], 0.0)
    return z @ p["fc2_w"].T + p["fc2_b"]                       # (B, 1)


# -------------------------------------- main ----------------------------------------
if __name__ == "__main__":
    key = jax.random.PRNGKey(0)
    kx, kp = jax.random.split(key)
    x = jax.random.normal(kx, (B, T, D_IN), jnp.float32)
    params = init_params(kp, D_IN, DIM_VAL, T)
    kparams = prepare_params(params, DIM_VAL)      # one-time weight prep (outside jit)

    out = jax.jit(mylstm_forward)(x, kparams)
    jax.block_until_ready(out)

    with jax.default_matmul_precision("float32"):
        ref = reference_forward(x, params)

    assert out.shape == (B, 1)
    assert jnp.allclose(out, ref, atol=2e-3, rtol=2e-3)
    print("KERNEL_OK")
</pallas_src>

<mosaic_0001>
module attributes {stable_mosaic.version = 11 : i64} {
  func.func @mylstm_kernel(%arg0: memref<2x20x16xf32, #tpu.memory_space<vmem>>, %arg1: memref<16x128xf32, #tpu.memory_space<vmem>>, %arg2: memref<32x128xf32, #tpu.memory_space<vmem>>, %arg3: memref<1x128xf32, #tpu.memory_space<vmem>>, %arg4: memref<32x128xf32, #tpu.memory_space<vmem>>, %arg5: memref<32x128xf32, #tpu.memory_space<vmem>>, %arg6: memref<1x128xf32, #tpu.memory_space<vmem>>, %arg7: memref<32x32xf32, #tpu.memory_space<vmem>>, %arg8: memref<1x32xf32, #tpu.memory_space<vmem>>, %arg9: memref<672x128xf32, #tpu.memory_space<vmem>>, %arg10: memref<1x128xf32, #tpu.memory_space<vmem>>, %arg11: memref<128x1xf32, #tpu.memory_space<vmem>>, %arg12: memref<1x1xf32, #tpu.memory_space<vmem>>, %arg13: memref<2x128xf32, #tpu.memory_space<vmem>>) attributes {dimension_semantics = [], scalar_prefetch = 0 : i64, scratch_operands = 0 : i64, tpu.core_type = #tpu.core_type<tc>} {
    %c0 = arith.constant 0 : index
    %c0_0 = arith.constant 0 : index
    %c0_1 = arith.constant 0 : index
    %0 = vector.load %arg0[%c0, %c0_0, %c0_1] : memref<2x20x16xf32, #tpu.memory_space<vmem>>, vector<1x20x16xf32>
    %1 = vector.shape_cast %0 : vector<1x20x16xf32> to vector<20x16xf32>
    %c1 = arith.constant 1 : index
    %c0_2 = arith.constant 0 : index
    %c0_3 = arith.constant 0 : index
    %2 = vector.load %arg0[%c1, %c0_2, %c0_3] : memref<2x20x16xf32, #tpu.memory_space<vmem>>, vector<1x20x16xf32>
    %3 = vector.shape_cast %2 : vector<1x20x16xf32> to vector<20x16xf32>
    %4 = tpu.concatenate %1, %3 in 0 : vector<20x16xf32>, vector<20x16xf32> -> vector<40x16xf32>
    %c0_4 = arith.constant 0 : index
    %c0_5 = arith.constant 0 : index
    %5 = vector.load %arg1[%c0_4, %c0_5] : memref<16x128xf32, #tpu.memory_space<vmem>>, vector<16x128xf32>
    %cst = arith.constant dense<0.000000e+00> : vector<40x128xf32>
    %6 = tpu.matmul %4, %5, %cst {dimension_numbers = #tpu.dot_dimension_numbers<[1], [0], [0], [1], [0, 0, 1, 1], [], []>} : vector<40x16xf32>, vector<16x128xf32>, vector<40x128xf32> -> vector<40x128xf32>
    %c0_6 = arith.constant 0 : index
    %c0_7 = arith.constant 0 : index
    %7 = vector.load %arg3[%c0_6, %c0_7] : memref<1x128xf32, #tpu.memory_space<vmem>>, vector<1x128xf32>
    %8 = vector.broadcast %7 : vector<1x128xf32> to vector<40x128xf32>
    %9 = arith.addf %6, %8 : vector<40x128xf32>
    %10 = vector.extract_strided_slice %9 {offsets = [0, 0], sizes = [20, 128], strides = [1, 1]} : vector<40x128xf32> to vector<20x128xf32>
    %11 = vector.extract_strided_slice %9 {offsets = [20, 0], sizes = [20, 128], strides = [1, 1]} : vector<40x128xf32> to vector<20x128xf32>
    %c0_8 = arith.constant 0 : index
    %c0_9 = arith.constant 0 : index
    %12 = vector.load %arg2[%c0_8, %c0_9] : memref<32x128xf32, #tpu.memory_space<vmem>>, vector<32x128xf32>
    %cst_10 = arith.constant 0.000000e+00 : f32
    %13 = vector.broadcast %cst_10 : f32 to vector<2x32xf32>
    %cst_11 = arith.constant 0.000000e+00 : f32
    %14 = vector.broadcast %cst_11 : f32 to vector<2x32xf32>
    %15 = vector.extract_strided_slice %10 {offsets = [0, 0], sizes = [1, 128], strides = [1, 1]} : vector<20x128xf32> to vector<1x128xf32>
    %16 = vector.extract_strided_slice %11 {offsets = [0, 0], sizes = [1, 128], strides = [1, 1]} : vector<20x128xf32> to vector<1x128xf32>
    %17 = tpu.concatenate %15, %16 in 0 : vector<1x128xf32>, vector<1x128xf32> -> vector<2x128xf32>
    %cst_12 = arith.constant dense<0.000000e+00> : vector<2x128xf32>
    %18 = tpu.matmul %13, %12, %cst_12 {dimension_numbers = #tpu.dot_dimension_numbers<[1], [0], [0], [1], [0, 0, 1, 1], [], []>} : vector<2x32xf32>, vector<32x128xf32>, vector<2x128xf32> -> vector<2x128xf32>
    %19 = arith.addf %17, %18 : vector<2x128xf32>
    %20 = vector.extract_strided_slice %19 {offsets = [0, 0], sizes = [2, 96], strides = [1, 1]} : vector<2x128xf32> to vector<2x96xf32>
    %21 = arith.negf %20 : vector<2x96xf32>
    %22 = math.exp %21 : vector<2x96xf32>
    %cst_13 = arith.constant 1.000000e+00 : f32
    %23 = vector.broadcast %cst_13 : f32 to vector<2x96xf32>
    %24 = arith.addf %23, %22 : vector<2x96xf32>
    %25 = arith.divf %23, %24 : vector<2x96xf32>
    %26 = vector.extract_strided_slice %19 {offsets = [0, 96], sizes = [2, 32], strides = [1, 1]} : vector<2x128xf32> to vector<2x32xf32>
    %27 = math.tanh %26 : vector<2x32xf32>
    %28 = vector.extract_strided_slice %25 {offsets = [0, 32], sizes = [2, 32], strides = [1, 1]} : vector<2x96xf32> to vector<2x32xf32>
    %29 = arith.mulf %28, %14 : vector<2x32xf32>
    %30 = vector.extract_strided_slice %25 {offsets = [0, 0], sizes = [2, 32], strides = [1, 1]} : vector<2x96xf32> to vector<2x32xf32>
    %31 = arith.mulf %30, %27 : vector<2x32xf32>
    %32 = arith.addf %29, %31 : vector<2x32xf32>
    %33 = vector.extract_strided_slice %25 {offsets = [0, 64], sizes = [2, 32], strides = [1, 1]} : vector<2x96xf32> to vector<2x32xf32>
    %34 = math.tanh %32 : vector<2x32xf32>
    %35 = arith.mulf %33, %34 : vector<2x32xf32>
    %36 = vector.extract_strided_slice %10 {offsets = [1, 0], sizes = [1, 128], strides = [1, 1]} : vector<20x128xf32> to vector<1x128xf32>
    %37 = vector.extract_strided_slice %11 {offsets = [1, 0], sizes = [1, 128], strides = [1, 1]} : vector<20x128xf32> to vector<1x128xf32>
    %38 = tpu.concatenate %36, %37 in 0 : vector<1x128xf32>, vector<1x128xf32> -> vector<2x128xf32>
    %cst_14 = arith.constant dense<0.000000e+00> : vector<2x128xf32>
    %39 = tpu.matmul %35, %12, %cst_14 {dimension_numbers = #tpu.dot_dimension_numbers<[1], [0], [0], [1], [0, 0, 1, 1], [], []>} : vector<2x32xf32>, vector<32x128xf32>, vector<2x128xf32> -> vector<2x128xf32>
    %40 = arith.addf %38, %39 : vector<2x128xf32>
    %41 = vector.extract_strided_slice %40 {offsets = [0, 0], sizes = [2, 96], strides = [1, 1]} : vector<2x128xf32> to vector<2x96xf32>
    %42 = arith.negf %41 : vector<2x96xf32>
    %43 = math.exp %42 : vector<2x96xf32>
    %cst_15 = arith.constant 1.000000e+00 : f32
    %44 = vector.broadcast %cst_15 : f32 to vector<2x96xf32>
    %45 = arith.addf %44, %43 : vector<2x96xf32>
    %46 = arith.divf %44, %45 : vector<2x96xf32>
    %47 = vector.extract_strided_slice %40 {offsets = [0, 96], sizes = [2, 32], strides = [1, 1]} : vector<2x128xf32> to vector<2x32xf32>
    %48 = math.tanh %47 : vector<2x32xf32>
    %49 = vector.extract_strided_slice %46 {offsets = [0, 32], sizes = [2, 32], strides = [1, 1]} : vector<2x96xf32> to vector<2x32xf32>
    %50 = arith.mulf %49, %32 : vector<2x32xf32>
    %51 = vector.extract_strided_slice %46 {offsets = [0, 0], sizes = [2, 32], strides = [1, 1]} : vector<2x96xf32> to vector<2x32xf32>
    %52 = arith.mulf %51, %48 : vector<2x32xf32>
    %53 = arith.addf %50, %52 : vector<2x32xf32>
    %54 = vector.extract_strided_slice %46 {offsets = [0, 64], sizes = [2, 32], strides = [1, 1]} : vector<2x96xf32> to vector<2x32xf32>
    %55 = math.tanh %53 : vector<2x32xf32>
    %56 = arith.mulf %54, %55 : vector<2x32xf32>
    %57 = vector.extract_strided_slice %10 {offsets = [2, 0], sizes = [1, 128], strides = [1, 1]} : vector<20x128xf32> to vector<1x128xf32>
    %58 = vector.extract_strided_slice %11 {offsets = [2, 0], sizes = [1, 128], strides = [1, 1]} : vector<20x128xf32> to vector<1x128xf32>
    %59 = tpu.concatenate %57, %58 in 0 : vector<1x128xf32>, vector<1x128xf32> -> vector<2x128xf32>
    %cst_16 = arith.constant dense<0.000000e+00> : vector<2x128xf32>
    %60 = tpu.matmul %56, %12, %cst_16 {dimension_numbers = #tpu.dot_dimension_numbers<[1], [0], [0], [1], [0, 0, 1, 1], [], []>} : vector<2x32xf32>, vector<32x128xf32>, vector<2x128xf32> -> vector<2x128xf32>
    %61 = arith.addf %59, %60 : vector<2x128xf32>
    %62 = vector.extract_strided_slice %61 {offsets = [0, 0], sizes = [2, 96], strides = [1, 1]} : vector<2x128xf32> to vector<2x96xf32>
    %63 = arith.negf %62 : vector<2x96xf32>
    %64 = math.exp %63 : vector<2x96xf32>
    %cst_17 = arith.constant 1.000000e+00 : f32
    %65 = vector.broadcast %cst_17 : f32 to vector<2x96xf32>
    %66 = arith.addf %65, %64 : vector<2x96xf32>
    %67 = arith.divf %65, %66 : vector<2x96xf32>
    %68 = vector.extract_strided_slice %61 {offsets = [0, 96], sizes = [2, 32], strides = [1, 1]} : vector<2x128xf32> to vector<2x32xf32>
    %69 = math.tanh %68 : vector<2x32xf32>
    %70 = vector.extract_strided_slice %67 {offsets = [0, 32], sizes = [2, 32], strides = [1, 1]} : vector<2x96xf32> to vector<2x32xf32>
    %71 = arith.mulf %70, %53 : vector<2x32xf32>
    %72 = vector.extract_strided_slice %67 {offsets = [0, 0], sizes = [2, 32], strides = [1, 1]} : vector<2x96xf32> to vector<2x32xf32>
    %73 = arith.mulf %72, %69 : vector<2x32xf32>
    %74 = arith.addf %71, %73 : vector<2x32xf32>
    %75 = vector.extract_strided_slice %67 {offsets = [0, 64], sizes = [2, 32], strides = [1, 1]} : vector<2x96xf32> to vector<2x32xf32>
    %76 = math.tanh %74 : vector<2x32xf32>
    %77 = arith.mulf %75, %76 : vector<2x32xf32>
    %78 = vector.extract_strided_slice %10 {offsets = [3, 0], sizes = [1, 128], strides = [1, 1]} : vector<20x128xf32> to vector<1x128xf32>
    %79 = vector.extract_strided_slice %11 {offsets = [3, 0], sizes = [1, 128], strides = [1, 1]} : vector<20x128xf32> to vector<1x128xf32>
    %80 = tpu.concatenate %78, %79 in 0 : vector<1x128xf32>, vector<1x128xf32> -> vector<2x128xf32>
    %cst_18 = arith.constant dense<0.000000e+00> : vector<2x128xf32>
    %81 = tpu.matmul %77, %12, %cst_18 {dimension_numbers = #tpu.dot_dimension_numbers<[1], [0], [0], [1], [0, 0, 1, 1], [], []>} : vector<2x32xf32>, vector<32x128xf32>, vector<2x128xf32> -> vector<2x128xf32>
    %82 = arith.addf %80, %81 : vector<2x128xf32>
    %83 = vector.extract_strided_slice %82 {offsets = [0, 0], sizes = [2, 96], strides = [1, 1]} : vector<2x128xf32> to vector<2x96xf32>
    %84 = arith.negf %83 : vector<2x96xf32>
    %85 = math.exp %84 : vector<2x96xf32>
    %cst_19 = arith.constant 1.000000e+00 : f32
    %86 = vector.broadcast %cst_19 : f32 to vector<2x96xf32>
    %87 = arith.addf %86, %85 : vector<2x96xf32>
    %88 = arith.divf %86, %87 : vector<2x96xf32>
    %89 = vector.extract_strided_slice %82 {offsets = [0, 96], sizes = [2, 32], strides = [1, 1]} : vector<2x128xf32> to vector<2x32xf32>
    %90 = math.tanh %89 : vector<2x32xf32>
    %91 = vector.extract_strided_slice %88 {offsets = [0, 32], sizes = [2, 32], strides = [1, 1]} : vector<2x96xf32> to vector<2x32xf32>
    %92 = arith.mulf %91, %74 : vector<2x32xf32>
    %93 = vector.extract_strided_slice %88 {offsets = [0, 0], sizes = [2, 32], strides = [1, 1]} : vector<2x96xf32> to vector<2x32xf32>
    %94 = arith.mulf %93, %90 : vector<2x32xf32>
    %95 = arith.addf %92, %94 : vector<2x32xf32>
    %96 = vector.extract_strided_slice %88 {offsets = [0, 64], sizes = [2, 32], strides = [1, 1]} : vector<2x96xf32> to vector<2x32xf32>
    %97 = math.tanh %95 : vector<2x32xf32>
    %98 = arith.mulf %96, %97 : vector<2x32xf32>
    %99 = vector.extract_strided_slice %10 {offsets = [4, 0], sizes = [1, 128], strides = [1, 1]} : vector<20x128xf32> to vector<1x128xf32>
    %100 = vector.extract_strided_slice %11 {offsets = [4, 0], sizes = [1, 128], strides = [1, 1]} : vector<20x128xf32> to vector<1x128xf32>
    %101 = tpu.concatenate %99, %100 in 0 : vector<1x128xf32>, vector<1x128xf32> -> vector<2x128xf32>
    %cst_20 = arith.constant dense<0.000000e+00> : vector<2x128xf32>
    %102 = tpu.matmul %98, %12, %cst_20 {dimension_numbers = #tpu.dot_dimension_numbers<[1], [0], [0], [1], [0, 0, 1, 1], [], []>} : vector<2x32xf32>, vector<32x128xf32>, vector<2x128xf32> -> vector<2x128xf32>
    %103 = arith.addf %101, %102 : vector<2x128xf32>
    %104 = vector.extract_strided_slice %103 {offsets = [0, 0], sizes = [2, 96], strides = [1, 1]} : vector<2x128xf32> to vector<2x96xf32>
    %105 = arith.negf %104 : vector<2x96xf32>
    %106 = math.exp %105 : vector<2x96xf32>
    %cst_21 = arith.constant 1.000000e+00 : f32
    %107 = vector.broadcast %cst_21 : f32 to vector<2x96xf32>
    %108 = arith.addf %107, %106 : vector<2x96xf32>
    %109 = arith.divf %107, %108 : vector<2x96xf32>
    %110 = vector.extract_strided_slice %103 {offsets = [0, 96], sizes = [2, 32], strides = [1, 1]} : vector<2x128xf32> to vector<2x32xf32>
    %111 = math.tanh %110 : vector<2x32xf32>
    %112 = vector.extract_strided_slice %109 {offsets = [0, 32], sizes = [2, 32], strides = [1, 1]} : vector<2x96xf32> to vector<2x32xf32>
    %113 = arith.mulf %112, %95 : vector<2x32xf32>
    %114 = vector.extract_strided_slice %109 {offsets = [0, 0], sizes = [2, 32], strides = [1, 1]} : vector<2x96xf32> to vector<2x32xf32>
    %115 = arith.mulf %114, %111 : vector<2x32xf32>
    %116 = arith.addf %113, %115 : vector<2x32xf32>
    %117 = vector.extract_strided_slice %109 {offsets = [0, 64], sizes = [2, 32], strides = [1, 1]} : vector<2x96xf32> to vector<2x32xf32>
    %118 = math.tanh %116 : vector<2x32xf32>
    %119 = arith.mulf %117, %118 : vector<2x32xf32>
    %120 = vector.extract_strided_slice %10 {offsets = [5, 0], sizes = [1, 128], strides = [1, 1]} : vector<20x128xf32> to vector<1x128xf32>
    %121 = vector.extract_strided_slice %11 {offsets = [5, 0], sizes = [1, 128], strides = [1, 1]} : vector<20x128xf32> to vector<1x128xf32>
    %122 = tpu.concatenate %120, %121 in 0 : vector<1x128xf32>, vector<1x128xf32> -> vector<2x128xf32>
    %cst_22 = arith.constant dense<0.000000e+00> : vector<2x128xf32>
    %123 = tpu.matmul %119, %12, %cst_22 {dimension_numbers = #tpu.dot_dimension_numbers<[1], [0], [0], [1], [0, 0, 1, 1], [], []>} : vector<2x32xf32>, vector<32x128xf32>, vector<2x128xf32> -> vector<2x128xf32>
    %124 = arith.addf %122, %123 : vector<2x128xf32>
    %125 = vector.extract_strided_slice %124 {offsets = [0, 0], sizes = [2, 96], strides = [1, 1]} : vector<2x128xf32> to vector<2x96xf32>
    %126 = arith.negf %125 : vector<2x96xf32>
    %127 = math.exp %126 : vector<2x96xf32>
    %cst_23 = arith.constant 1.000000e+00 : f32
    %128 = vector.broadcast %cst_23 : f32 to vector<2x96xf32>
    %129 = arith.addf %128, %127 : vector<2x96xf32>
    %130 = arith.divf %128, %129 : vector<2x96xf32>
    %131 = vector.extract_strided_slice %124 {offsets = [0, 96], sizes = [2, 32], strides = [1, 1]} : vector<2x128xf32> to vector<2x32xf32>
    %132 = math.tanh %131 : vector<2x32xf32>
    %133 = vector.extract_strided_slice %130 {offsets = [0, 32], sizes = [2, 32], strides = [1, 1]} : vector<2x96xf32> to vector<2x32xf32>
    %134 = arith.mulf %133, %116 : vector<2x32xf32>
    %135 = vector.extract_strided_slice %130 {offsets = [0, 0], sizes = [2, 32], strides = [1, 1]} : vector<2x96xf32> to vector<2x32xf32>
    %136 = arith.mulf %135, %132 : vector<2x32xf32>
    %137 = arith.addf %134, %136 : vector<2x32xf32>
    %138 = vector.extract_strided_slice %130 {offsets = [0, 64], sizes = [2, 32], strides = [1, 1]} : vector<2x96xf32> to vector<2x32xf32>
    %139 = math.tanh %137 : vector<2x32xf32>
    %140 = arith.mulf %138, %139 : vector<2x32xf32>
    %141 = vector.extract_strided_slice %10 {offsets = [6, 0], sizes = [1, 128], strides = [1, 1]} : vector<20x128xf32> to vector<1x128xf32>
    %142 = vector.extract_strided_slice %11 {offsets = [6, 0], sizes = [1, 128], strides = [1, 1]} : vector<20x128xf32> to vector<1x128xf32>
    %143 = tpu.concatenate %141, %142 in 0 : vector<1x128xf32>, vector<1x128xf32> -> vector<2x128xf32>
    %cst_24 = arith.constant dense<0.000000e+00> : vector<2x128xf32>
    %144 = tpu.matmul %140, %12, %cst_24 {dimension_numbers = #tpu.dot_dimension_numbers<[1], [0], [0], [1], [0, 0, 1, 1], [], []>} : vector<2x32xf32>, vector<32x128xf32>, vector<2x128xf32> -> vector<2x128xf32>
    %145 = arith.addf %143, %144 : vector<2x128xf32>
    %146 = vector.extract_strided_slice %145 {offsets = [0, 0], sizes = [2, 96], strides = [1, 1]} : vector<2x128xf32> to vector<2x96xf32>
    %147 = arith.negf %146 : vector<2x96xf32>
    %148 = math.exp %147 : vector<2x96xf32>
    %cst_25 = arith.constant 1.000000e+00 : f32
    %149 = vector.broadcast %cst_25 : f32 to vector<2x96xf32>
    %150 = arith.addf %149, %148 : vector<2x96xf32>
    %151 = arith.divf %149, %150 : vector<2x96xf32>
    %152 = vector.extract_strided_slice %145 {offsets = [0, 96], sizes = [2, 32], strides = [1, 1]} : vector<2x128xf32> to vector<2x32xf32>
    %153 = math.tanh %152 : vector<2x32xf32>
    %154 = vector.extract_strided_slice %151 {offsets = [0, 32], sizes = [2, 32], strides = [1, 1]} : vector<2x96xf32> to vector<2x32xf32>
    %155 = arith.mulf %154, %137 : vector<2x32xf32>
    %156 = vector.extract_strided_slice %151 {offsets = [0, 0], sizes = [2, 32], strides = [1, 1]} : vector<2x96xf32> to vector<2x32xf32>
    %157 = arith.mulf %156, %153 : vector<2x32xf32>
    %158 = arith.addf %155, %157 : vector<2x32xf32>
    %159 = vector.extract_strided_slice %151 {offsets = [0, 64], sizes = [2, 32], strides = [1, 1]} : vector<2x96xf32> to vector<2x32xf32>
    %160 = math.tanh %158 : vector<2x32xf32>
    %161 = arith.mulf %159, %160 : vector<2x32xf32>
    %162 = vector.extract_strided_slice %10 {offsets = [7, 0], sizes = [1, 128], strides = [1, 1]} : vector<20x128xf32> to vector<1x128xf32>
    %163 = vector.extract_strided_slice %11 {offsets = [7, 0], sizes = [1, 128], strides = [1, 1]} : vector<20x128xf32> to vector<1x128xf32>
    %164 = tpu.concatenate %162, %163 in 0 : vector<1x128xf32>, vector<1x128xf32> -> vector<2x128xf32>
    %cst_26 = arith.constant dense<0.000000e+00> : vector<2x128xf32>
    %165 = tpu.matmul %161, %12, %cst_26 {dimension_numbers = #tpu.dot_dimension_numbers<[1], [0], [0], [1], [0, 0, 1, 1], [], []>} : vector<2x32xf32>, vector<32x128xf32>, vector<2x128xf32> -> vector<2x128xf32>
    %166 = arith.addf %164, %165 : vector<2x128xf32>
    %167 = vector.extract_strided_slice %166 {offsets = [0, 0], sizes = [2, 96], strides = [1, 1]} : vector<2x128xf32> to vector<2x96xf32>
    %168 = arith.negf %167 : vector<2x96xf32>
    %169 = math.exp %168 : vector<2x96xf32>
    %cst_27 = arith.constant 1.000000e+00 : f32
    %170 = vector.broadcast %cst_27 : f32 to vector<2x96xf32>
    %171 = arith.addf %170, %169 : vector<2x96xf32>
    %172 = arith.divf %170, %171 : vector<2x96xf32>
    %173 = vector.extract_strided_slice %166 {offsets = [0, 96], sizes = [2, 32], strides = [1, 1]} : vector<2x128xf32> to vector<2x32xf32>
    %174 = math.tanh %173 : vector<2x32xf32>
    %175 = vector.extract_strided_slice %172 {offsets = [0, 32], sizes = [2, 32], strides = [1, 1]} : vector<2x96xf32> to vector<2x32xf32>
    %176 = arith.mulf %175, %158 : vector<2x32xf32>
    %177 = vector.extract_strided_slice %172 {offsets = [0, 0], sizes = [2, 32], strides = [1, 1]} : vector<2x96xf32> to vector<2x32xf32>
    %178 = arith.mulf %177, %174 : vector<2x32xf32>
    %179 = arith.addf %176, %178 : vector<2x32xf32>
    %180 = vector.extract_strided_slice %172 {offsets = [0, 64], sizes = [2, 32], strides = [1, 1]} : vector<2x96xf32> to vector<2x32xf32>
    %181 = math.tanh %179 : vector<2x32xf32>
    %182 = arith.mulf %180, %181 : vector<2x32xf32>
    %183 = vector.extract_strided_slice %10 {offsets = [8, 0], sizes = [1, 128], strides = [1, 1]} : vector<20x128xf32> to vector<1x128xf32>
    %184 = vector.extract_strided_slice %11 {offsets = [8, 0], sizes = [1, 128], strides = [1, 1]} : vector<20x128xf32> to vector<1x128xf32>
    %185 = tpu.concatenate %183, %184 in 0 : vector<1x128xf32>, vector<1x128xf32> -> vector<2x128xf32>
    %cst_28 = arith.constant dense<0.000000e+00> : vector<2x128xf32>
    %186 = tpu.matmul %182, %12, %cst_28 {dimension_numbers = #tpu.dot_dimension_numbers<[1], [0], [0], [1], [0, 0, 1, 1], [], []>} : vector<2x32xf32>, vector<32x128xf32>, vector<2x128xf32> -> vector<2x128xf32>
    %187 = arith.addf %185, %186 : vector<2x128xf32>
    %188 = vector.extract_strided_slice %187 {offsets = [0, 0], sizes = [2, 96], strides = [1, 1]} : vector<2x128xf32> to vector<2x96xf32>
    %189 = arith.negf %188 : vector<2x96xf32>
    %190 = math.exp %189 : vector<2x96xf32>
    %cst_29 = arith.constant 1.000000e+00 : f32
    %191 = vector.broadcast %cst_29 : f32 to vector<2x96xf32>
    %192 = arith.addf %191, %190 : vector<2x96xf32>
    %193 = arith.divf %191, %192 : vector<2x96xf32>
    %194 = vector.extract_strided_slice %187 {offsets = [0, 96], sizes = [2, 32], strides = [1, 1]} : vector<2x128xf32> to vector<2x32xf32>
    %195 = math.tanh %194 : vector<2x32xf32>
    %196 = vector.extract_strided_slice %193 {offsets = [0, 32], sizes = [2, 32], strides = [1, 1]} : vector<2x96xf32> to vector<2x32xf32>
    %197 = arith.mulf %196, %179 : vector<2x32xf32>
    %198 = vector.extract_strided_slice %193 {offsets = [0, 0], sizes = [2, 32], strides = [1, 1]} : vector<2x96xf32> to vector<2x32xf32>
    %199 = arith.mulf %198, %195 : vector<2x32xf32>
    %200 = arith.addf %197, %199 : vector<2x32xf32>
    %201 = vector.extract_strided_slice %193 {offsets = [0, 64], sizes = [2, 32], strides = [1, 1]} : vector<2x96xf32> to vector<2x32xf32>
    %202 = math.tanh %200 : vector<2x32xf32>
    %203 = arith.mulf %201, %202 : vector<2x32xf32>
    %204 = vector.extract_strided_slice %10 {offsets = [9, 0], sizes = [1, 128], strides = [1, 1]} : vector<20x128xf32> to vector<1x128xf32>
    %205 = vector.extract_strided_slice %11 {offsets = [9, 0], sizes = [1, 128], strides = [1, 1]} : vector<20x128xf32> to vector<1x128xf32>
    %206 = tpu.concatenate %204, %205 in 0 : vector<1x128xf32>, vector<1x128xf32> -> vector<2x128xf32>
    %cst_30 = arith.constant dense<0.000000e+00> : vector<2x128xf32>
    %207 = tpu.matmul %203, %12, %cst_30 {dimension_numbers = #tpu.dot_dimension_numbers<[1], [0], [0], [1], [0, 0, 1, 1], [], []>} : vector<2x32xf32>, vector<32x128xf32>, vector<2x128xf32> -> vector<2x128xf32>
    %208 = arith.addf %206, %207 : vector<2x128xf32>
    %209 = vector.extract_strided_slice %208 {offsets = [0, 0], sizes = [2, 96], strides = [1, 1]} : vector<2x128xf32> to vector<2x96xf32>
    %210 = arith.negf %209 : vector<2x96xf32>
    %211 = math.exp %210 : vector<2x96xf32>
    %cst_31 = arith.constant 1.000000e+00 : f32
    %212 = vector.broadcast %cst_31 : f32 to vector<2x96xf32>
    %213 = arith.addf %212, %211 : vector<2x96xf32>
    %214 = arith.divf %212, %213 : vector<2x96xf32>
    %215 = vector.extract_strided_slice %208 {offsets = [0, 96], sizes = [2, 32], strides = [1, 1]} : vector<2x128xf32> to vector<2x32xf32>
    %216 = math.tanh %215 : vector<2x32xf32>
    %217 = vector.extract_strided_slice %214 {offsets = [0, 32], sizes = [2, 32], strides = [1, 1]} : vector<2x96xf32> to vector<2x32xf32>
    %218 = arith.mulf %217, %200 : vector<2x32xf32>
    %219 = vector.extract_strided_slice %214 {offsets = [0, 0], sizes = [2, 32], strides = [1, 1]} : vector<2x96xf32> to vector<2x32xf32>
    %220 = arith.mulf %219, %216 : vector<2x32xf32>
    %221 = arith.addf %218, %220 : vector<2x32xf32>
    %222 = vector.extract_strided_slice %214 {offsets = [0, 64], sizes = [2, 32], strides = [1, 1]} : vector<2x96xf32> to vector<2x32xf32>
    %223 = math.tanh %221 : vector<2x32xf32>
    %224 = arith.mulf %222, %223 : vector<2x32xf32>
    %225 = vector.extract_strided_slice %10 {offsets = [10, 0], sizes = [1, 128], strides = [1, 1]} : vector<20x128xf32> to vector<1x128xf32>
    %226 = vector.extract_strided_slice %11 {offsets = [10, 0], sizes = [1, 128], strides = [1, 1]} : vector<20x128xf32> to vector<1x128xf32>
    %227 = tpu.concatenate %225, %226 in 0 : vector<1x128xf32>, vector<1x128xf32> -> vector<2x128xf32>
    %cst_32 = arith.constant dense<0.000000e+00> : vector<2x128xf32>
    %228 = tpu.matmul %224, %12, %cst_32 {dimension_numbers = #tpu.dot_dimension_numbers<[1], [0], [0], [1], [0, 0, 1, 1], [], []>} : vector<2x32xf32>, vector<32x128xf32>, vector<2x128xf32> -> vector<2x128xf32>
    %229 = arith.addf %227, %228 : vector<2x128xf32>
    %230 = vector.extract_strided_slice %229 {offsets = [0, 0], sizes = [2, 96], strides = [1, 1]} : vector<2x128xf32> to vector<2x96xf32>
    %231 = arith.negf %230 : vector<2x96xf32>
    %232 = math.exp %231 : vector<2x96xf32>
    %cst_33 = arith.constant 1.000000e+00 : f32
    %233 = vector.broadcast %cst_33 : f32 to vector<2x96xf32>
    %234 = arith.addf %233, %232 : vector<2x96xf32>
    %235 = arith.divf %233, %234 : vector<2x96xf32>
    %236 = vector.extract_strided_slice %229 {offsets = [0, 96], sizes = [2, 32], strides = [1, 1]} : vector<2x128xf32> to vector<2x32xf32>
    %237 = math.tanh %236 : vector<2x32xf32>
    %238 = vector.extract_strided_slice %235 {offsets = [0, 32], sizes = [2, 32], strides = [1, 1]} : vector<2x96xf32> to vector<2x32xf32>
    %239 = arith.mulf %238, %221 : vector<2x32xf32>
    %240 = vector.extract_strided_slice %235 {offsets = [0, 0], sizes = [2, 32], strides = [1, 1]} : vector<2x96xf32> to vector<2x32xf32>
    %241 = arith.mulf %240, %237 : vector<2x32xf32>
    %242 = arith.addf %239, %241 : vector<2x32xf32>
    %243 = vector.extract_strided_slice %235 {offsets = [0, 64], sizes = [2, 32], strides = [1, 1]} : vector<2x96xf32> to vector<2x32xf32>
    %244 = math.tanh %242 : vector<2x32xf32>
    %245 = arith.mulf %243, %244 : vector<2x32xf32>
    %246 = vector.extract_strided_slice %10 {offsets = [11, 0], sizes = [1, 128], strides = [1, 1]} : vector<20x128xf32> to vector<1x128xf32>
    %247 = vector.extract_strided_slice %11 {offsets = [11, 0], sizes = [1, 128], strides = [1, 1]} : vector<20x128xf32> to vector<1x128xf32>
    %248 = tpu.concatenate %246, %247 in 0 : vector<1x128xf32>, vector<1x128xf32> -> vector<2x128xf32>
    %cst_34 = arith.constant dense<0.000000e+00> : vector<2x128xf32>
    %249 = tpu.matmul %245, %12, %cst_34 {dimension_numbers = #tpu.dot_dimension_numbers<[1], [0], [0], [1], [0, 0, 1, 1], [], []>} : vector<2x32xf32>, vector<32x128xf32>, vector<2x128xf32> -> vector<2x128xf32>
    %250 = arith.addf %248, %249 : vector<2x128xf32>
    %251 = vector.extract_strided_slice %250 {offsets = [0, 0], sizes = [2, 96], strides = [1, 1]} : vector<2x128xf32> to vector<2x96xf32>
    %252 = arith.negf %251 : vector<2x96xf32>
    %253 = math.exp %252 : vector<2x96xf32>
    %cst_35 = arith.constant 1.000000e+00 : f32
    %254 = vector.broadcast %cst_35 : f32 to vector<2x96xf32>
    %255 = arith.addf %254, %253 : vector<2x96xf32>
    %256 = arith.divf %254, %255 : vector<2x96xf32>
    %257 = vector.extract_strided_slice %250 {offsets = [0, 96], sizes = [2, 32], strides = [1, 1]} : vector<2x128xf32> to vector<2x32xf32>
    %258 = math.tanh %257 : vector<2x32xf32>
    %259 = vector.extract_strided_slice %256 {offsets = [0, 32], sizes = [2, 32], strides = [1, 1]} : vector<2x96xf32> to vector<2x32xf32>
    %260 = arith.mulf %259, %242 : vector<2x32xf32>
    %261 = vector.extract_strided_slice %256 {offsets = [0, 0], sizes = [2, 32], strides = [1, 1]} : vector<2x96xf32> to vector<2x32xf32>
    %262 = arith.mulf %261, %258 : vector<2x32xf32>
    %263 = arith.addf %260, %262 : vector<2x32xf32>
    %264 = vector.extract_strided_slice %256 {offsets = [0, 64], sizes = [2, 32], strides = [1, 1]} : vector<2x96xf32> to vector<2x32xf32>
    %265 = math.tanh %263 : vector<2x32xf32>
    %266 = arith.mulf %264, %265 : vector<2x32xf32>
    %267 = vector.extract_strided_slice %10 {offsets = [12, 0], sizes = [1, 128], strides = [1, 1]} : vector<20x128xf32> to vector<1x128xf32>
    %268 = vector.extract_strided_slice %11 {offsets = [12, 0], sizes = [1, 128], strides = [1, 1]} : vector<20x128xf32> to vector<1x128xf32>
    %269 = tpu.concatenate %267, %268 in 0 : vector<1x128xf32>, vector<1x128xf32> -> vector<2x128xf32>
    %cst_36 = arith.constant dense<0.000000e+00> : vector<2x128xf32>
    %270 = tpu.matmul %266, %12, %cst_36 {dimension_numbers = #tpu.dot_dimension_numbers<[1], [0], [0], [1], [0, 0, 1, 1], [], []>} : vector<2x32xf32>, vector<32x128xf32>, vector<2x128xf32> -> vector<2x128xf32>
    %271 = arith.addf %269, %270 : vector<2x128xf32>
    %272 = vector.extract_strided_slice %271 {offsets = [0, 0], sizes = [2, 96], strides = [1, 1]} : vector<2x128xf32> to vector<2x96xf32>
    %273 = arith.negf %272 : vector<2x96xf32>
    %274 = math.exp %273 : vector<2x96xf32>
    %cst_37 = arith.constant 1.000000e+00 : f32
    %275 = vector.broadcast %cst_37 : f32 to vector<2x96xf32>
    %276 = arith.addf %275, %274 : vector<2x96xf32>
    %277 = arith.divf %275, %276 : vector<2x96xf32>
    %278 = vector.extract_strided_slice %271 {offsets = [0, 96], sizes = [2, 32], strides = [1, 1]} : vector<2x128xf32> to vector<2x32xf32>
    %279 = math.tanh %278 : vector<2x32xf32>
    %280 = vector.extract_strided_slice %277 {offsets = [0, 32], sizes = [2, 32], strides = [1, 1]} : vector<2x96xf32> to vector<2x32xf32>
    %281 = arith.mulf %280, %263 : vector<2x32xf32>
    %282 = vector.extract_strided_slice %277 {offsets = [0, 0], sizes = [2, 32], strides = [1, 1]} : vector<2x96xf32> to vector<2x32xf32>
    %283 = arith.mulf %282, %279 : vector<2x32xf32>
    %284 = arith.addf %281, %283 : vector<2x32xf32>
    %285 = vector.extract_strided_slice %277 {offsets = [0, 64], sizes = [2, 32], strides = [1, 1]} : vector<2x96xf32> to vector<2x32xf32>
    %286 = math.tanh %284 : vector<2x32xf32>
    %287 = arith.mulf %285, %286 : vector<2x32xf32>
    %288 = vector.extract_strided_slice %10 {offsets = [13, 0], sizes = [1, 128], strides = [1, 1]} : vector<20x128xf32> to vector<1x128xf32>
    %289 = vector.extract_strided_slice %11 {offsets = [13, 0], sizes = [1, 128], strides = [1, 1]} : vector<20x128xf32> to vector<1x128xf32>
    %290 = tpu.concatenate %288, %289 in 0 : vector<1x128xf32>, vector<1x128xf32> -> vector<2x128xf32>
    %cst_38 = arith.constant dense<0.000000e+00> : vector<2x128xf32>
    %291 = tpu.matmul %287, %12, %cst_38 {dimension_numbers = #tpu.dot_dimension_numbers<[1], [0], [0], [1], [0, 0, 1, 1], [], []>} : vector<2x32xf32>, vector<32x128xf32>, vector<2x128xf32> -> vector<2x128xf32>
    %292 = arith.addf %290, %291 : vector<2x128xf32>
    %293 = vector.extract_strided_slice %292 {offsets = [0, 0], sizes = [2, 96], strides = [1, 1]} : vector<2x128xf32> to vector<2x96xf32>
    %294 = arith.negf %293 : vector<2x96xf32>
    %295 = math.exp %294 : vector<2x96xf32>
    %cst_39 = arith.constant 1.000000e+00 : f32
    %296 = vector.broadcast %cst_39 : f32 to vector<2x96xf32>
    %297 = arith.addf %296, %295 : vector<2x96xf32>
    %298 = arith.divf %296, %297 : vector<2x96xf32>
    %299 = vector.extract_strided_slice %292 {offsets = [0, 96], sizes = [2, 32], strides = [1, 1]} : vector<2x128xf32> to vector<2x32xf32>
    %300 = math.tanh %299 : vector<2x32xf32>
    %301 = vector.extract_strided_slice %298 {offsets = [0, 32], sizes = [2, 32], strides = [1, 1]} : vector<2x96xf32> to vector<2x32xf32>
    %302 = arith.mulf %301, %284 : vector<2x32xf32>
    %303 = vector.extract_strided_slice %298 {offsets = [0, 0], sizes = [2, 32], strides = [1, 1]} : vector<2x96xf32> to vector<2x32xf32>
    %304 = arith.mulf %303, %300 : vector<2x32xf32>
    %305 = arith.addf %302, %304 : vector<2x32xf32>
    %306 = vector.extract_strided_slice %298 {offsets = [0, 64], sizes = [2, 32], strides = [1, 1]} : vector<2x96xf32> to vector<2x32xf32>
    %307 = math.tanh %305 : vector<2x32xf32>
    %308 = arith.mulf %306, %307 : vector<2x32xf32>
    %309 = vector.extract_strided_slice %10 {offsets = [14, 0], sizes = [1, 128], strides = [1, 1]} : vector<20x128xf32> to vector<1x128xf32>
    %310 = vector.extract_strided_slice %11 {offsets = [14, 0], sizes = [1, 128], strides = [1, 1]} : vector<20x128xf32> to vector<1x128xf32>
    %311 = tpu.concatenate %309, %310 in 0 : vector<1x128xf32>, vector<1x128xf32> -> vector<2x128xf32>
    %cst_40 = arith.constant dense<0.000000e+00> : vector<2x128xf32>
    %312 = tpu.matmul %308, %12, %cst_40 {dimension_numbers = #tpu.dot_dimension_numbers<[1], [0], [0], [1], [0, 0, 1, 1], [], []>} : vector<2x32xf32>, vector<32x128xf32>, vector<2x128xf32> -> vector<2x128xf32>
    %313 = arith.addf %311, %312 : vector<2x128xf32>
    %314 = vector.extract_strided_slice %313 {offsets = [0, 0], sizes = [2, 96], strides = [1, 1]} : vector<2x128xf32> to vector<2x96xf32>
    %315 = arith.negf %314 : vector<2x96xf32>
    %316 = math.exp %315 : vector<2x96xf32>
    %cst_41 = arith.constant 1.000000e+00 : f32
    %317 = vector.broadcast %cst_41 : f32 to vector<2x96xf32>
    %318 = arith.addf %317, %316 : vector<2x96xf32>
    %319 = arith.divf %317, %318 : vector<2x96xf32>
    %320 = vector.extract_strided_slice %313 {offsets = [0, 96], sizes = [2, 32], strides = [1, 1]} : vector<2x128xf32> to vector<2x32xf32>
    %321 = math.tanh %320 : vector<2x32xf32>
    %322 = vector.extract_strided_slice %319 {offsets = [0, 32], sizes = [2, 32], strides = [1, 1]} : vector<2x96xf32> to vector<2x32xf32>
    %323 = arith.mulf %322, %305 : vector<2x32xf32>
    %324 = vector.extract_strided_slice %319 {offsets = [0, 0], sizes = [2, 32], strides = [1, 1]} : vector<2x96xf32> to vector<2x32xf32>
    %325 = arith.mulf %324, %321 : vector<2x32xf32>
    %326 = arith.addf %323, %325 : vector<2x32xf32>
    %327 = vector.extract_strided_slice %319 {offsets = [0, 64], sizes = [2, 32], strides = [1, 1]} : vector<2x96xf32> to vector<2x32xf32>
    %328 = math.tanh %326 : vector<2x32xf32>
    %329 = arith.mulf %327, %328 : vector<2x32xf32>
    %330 = vector.extract_strided_slice %10 {offsets = [15, 0], sizes = [1, 128], strides = [1, 1]} : vector<20x128xf32> to vector<1x128xf32>
    %331 = vector.extract_strided_slice %11 {offsets = [15, 0], sizes = [1, 128], strides = [1, 1]} : vector<20x128xf32> to vector<1x128xf32>
    %332 = tpu.concatenate %330, %331 in 0 : vector<1x128xf32>, vector<1x128xf32> -> vector<2x128xf32>
    %cst_42 = arith.constant dense<0.000000e+00> : vector<2x128xf32>
    %333 = tpu.matmul %329, %12, %cst_42 {dimension_numbers = #tpu.dot_dimension_numbers<[1], [0], [0], [1], [0, 0, 1, 1], [], []>} : vector<2x32xf32>, vector<32x128xf32>, vector<2x128xf32> -> vector<2x128xf32>
    %334 = arith.addf %332, %333 : vector<2x128xf32>
    %335 = vector.extract_strided_slice %334 {offsets = [0, 0], sizes = [2, 96], strides = [1, 1]} : vector<2x128xf32> to vector<2x96xf32>
    %336 = arith.negf %335 : vector<2x96xf32>
    %337 = math.exp %336 : vector<2x96xf32>
    %cst_43 = arith.constant 1.000000e+00 : f32
    %338 = vector.broadcast %cst_43 : f32 to vector<2x96xf32>
    %339 = arith.addf %338, %337 : vector<2x96xf32>
    %340 = arith.divf %338, %339 : vector<2x96xf32>
    %341 = vector.extract_strided_slice %334 {offsets = [0, 96], sizes = [2, 32], strides = [1, 1]} : vector<2x128xf32> to vector<2x32xf32>
    %342 = math.tanh %341 : vector<2x32xf32>
    %343 = vector.extract_strided_slice %340 {offsets = [0, 32], sizes = [2, 32], strides = [1, 1]} : vector<2x96xf32> to vector<2x32xf32>
    %344 = arith.mulf %343, %326 : vector<2x32xf32>
    %345 = vector.extract_strided_slice %340 {offsets = [0, 0], sizes = [2, 32], strides = [1, 1]} : vector<2x96xf32> to vector<2x32xf32>
    %346 = arith.mulf %345, %342 : vector<2x32xf32>
    %347 = arith.addf %344, %346 : vector<2x32xf32>
    %348 = vector.extract_strided_slice %340 {offsets = [0, 64], sizes = [2, 32], strides = [1, 1]} : vector<2x96xf32> to vector<2x32xf32>
    %349 = math.tanh %347 : vector<2x32xf32>
    %350 = arith.mulf %348, %349 : vector<2x32xf32>
    %351 = vector.extract_strided_slice %10 {offsets = [16, 0], sizes = [1, 128], strides = [1, 1]} : vector<20x128xf32> to vector<1x128xf32>
    %352 = vector.extract_strided_slice %11 {offsets = [16, 0], sizes = [1, 128], strides = [1, 1]} : vector<20x128xf32> to vector<1x128xf32>
    %353 = tpu.concatenate %351, %352 in 0 : vector<1x128xf32>, vector<1x128xf32> -> vector<2x128xf32>
    %cst_44 = arith.constant dense<0.000000e+00> : vector<2x128xf32>
    %354 = tpu.matmul %350, %12, %cst_44 {dimension_numbers = #tpu.dot_dimension_numbers<[1], [0], [0], [1], [0, 0, 1, 1], [], []>} : vector<2x32xf32>, vector<32x128xf32>, vector<2x128xf32> -> vector<2x128xf32>
    %355 = arith.addf %353, %354 : vector<2x128xf32>
    %356 = vector.extract_strided_slice %355 {offsets = [0, 0], sizes = [2, 96], strides = [1, 1]} : vector<2x128xf32> to vector<2x96xf32>
    %357 = arith.negf %356 : vector<2x96xf32>
    %358 = math.exp %357 : vector<2x96xf32>
    %cst_45 = arith.constant 1.000000e+00 : f32
    %359 = vector.broadcast %cst_45 : f32 to vector<2x96xf32>
    %360 = arith.addf %359, %358 : vector<2x96xf32>
    %361 = arith.divf %359, %360 : vector<2x96xf32>
    %362 = vector.extract_strided_slice %355 {offsets = [0, 96], sizes = [2, 32], strides = [1, 1]} : vector<2x128xf32> to vector<2x32xf32>
    %363 = math.tanh %362 : vector<2x32xf32>
    %364 = vector.extract_strided_slice %361 {offsets = [0, 32], sizes = [2, 32], strides = [1, 1]} : vector<2x96xf32> to vector<2x32xf32>
    %365 = arith.mulf %364, %347 : vector<2x32xf32>
    %366 = vector.extract_strided_slice %361 {offsets = [0, 0], sizes = [2, 32], strides = [1, 1]} : vector<2x96xf32> to vector<2x32xf32>
    %367 = arith.mulf %366, %363 : vector<2x32xf32>
    %368 = arith.addf %365, %367 : vector<2x32xf32>
    %369 = vector.extract_strided_slice %361 {offsets = [0, 64], sizes = [2, 32], strides = [1, 1]} : vector<2x96xf32> to vector<2x32xf32>
    %370 = math.tanh %368 : vector<2x32xf32>
    %371 = arith.mulf %369, %370 : vector<2x32xf32>
    %372 = vector.extract_strided_slice %10 {offsets = [17, 0], sizes = [1, 128], strides = [1, 1]} : vector<20x128xf32> to vector<1x128xf32>
    %373 = vector.extract_strided_slice %11 {offsets = [17, 0], sizes = [1, 128], strides = [1, 1]} : vector<20x128xf32> to vector<1x128xf32>
    %374 = tpu.concatenate %372, %373 in 0 : vector<1x128xf32>, vector<1x128xf32> -> vector<2x128xf32>
    %cst_46 = arith.constant dense<0.000000e+00> : vector<2x128xf32>
    %375 = tpu.matmul %371, %12, %cst_46 {dimension_numbers = #tpu.dot_dimension_numbers<[1], [0], [0], [1], [0, 0, 1, 1], [], []>} : vector<2x32xf32>, vector<32x128xf32>, vector<2x128xf32> -> vector<2x128xf32>
    %376 = arith.addf %374, %375 : vector<2x128xf32>
    %377 = vector.extract_strided_slice %376 {offsets = [0, 0], sizes = [2, 96], strides = [1, 1]} : vector<2x128xf32> to vector<2x96xf32>
    %378 = arith.negf %377 : vector<2x96xf32>
    %379 = math.exp %378 : vector<2x96xf32>
    %cst_47 = arith.constant 1.000000e+00 : f32
    %380 = vector.broadcast %cst_47 : f32 to vector<2x96xf32>
    %381 = arith.addf %380, %379 : vector<2x96xf32>
    %382 = arith.divf %380, %381 : vector<2x96xf32>
    %383 = vector.extract_strided_slice %376 {offsets = [0, 96], sizes = [2, 32], strides = [1, 1]} : vector<2x128xf32> to vector<2x32xf32>
    %384 = math.tanh %383 : vector<2x32xf32>
    %385 = vector.extract_strided_slice %382 {offsets = [0, 32], sizes = [2, 32], strides = [1, 1]} : vector<2x96xf32> to vector<2x32xf32>
    %386 = arith.mulf %385, %368 : vector<2x32xf32>
    %387 = vector.extract_strided_slice %382 {offsets = [0, 0], sizes = [2, 32], strides = [1, 1]} : vector<2x96xf32> to vector<2x32xf32>
    %388 = arith.mulf %387, %384 : vector<2x32xf32>
    %389 = arith.addf %386, %388 : vector<2x32xf32>
    %390 = vector.extract_strided_slice %382 {offsets = [0, 64], sizes = [2, 32], strides = [1, 1]} : vector<2x96xf32> to vector<2x32xf32>
    %391 = math.tanh %389 : vector<2x32xf32>
    %392 = arith.mulf %390, %391 : vector<2x32xf32>
    %393 = vector.extract_strided_slice %10 {offsets = [18, 0], sizes = [1, 128], strides = [1, 1]} : vector<20x128xf32> to vector<1x128xf32>
    %394 = vector.extract_strided_slice %11 {offsets = [18, 0], sizes = [1, 128], strides = [1, 1]} : vector<20x128xf32> to vector<1x128xf32>
    %395 = tpu.concatenate %393, %394 in 0 : vector<1x128xf32>, vector<1x128xf32> -> vector<2x128xf32>
    %cst_48 = arith.constant dense<0.000000e+00> : vector<2x128xf32>
    %396 = tpu.matmul %392, %12, %cst_48 {dimension_numbers = #tpu.dot_dimension_numbers<[1], [0], [0], [1], [0, 0, 1, 1], [], []>} : vector<2x32xf32>, vector<32x128xf32>, vector<2x128xf32> -> vector<2x128xf32>
    %397 = arith.addf %395, %396 : vector<2x128xf32>
    %398 = vector.extract_strided_slice %397 {offsets = [0, 0], sizes = [2, 96], strides = [1, 1]} : vector<2x128xf32> to vector<2x96xf32>
    %399 = arith.negf %398 : vector<2x96xf32>
    %400 = math.exp %399 : vector<2x96xf32>
    %cst_49 = arith.constant 1.000000e+00 : f32
    %401 = vector.broadcast %cst_49 : f32 to vector<2x96xf32>
    %402 = arith.addf %401, %400 : vector<2x96xf32>
    %403 = arith.divf %401, %402 : vector<2x96xf32>
    %404 = vector.extract_strided_slice %397 {offsets = [0, 96], sizes = [2, 32], strides = [1, 1]} : vector<2x128xf32> to vector<2x32xf32>
    %405 = math.tanh %404 : vector<2x32xf32>
    %406 = vector.extract_strided_slice %403 {offsets = [0, 32], sizes = [2, 32], strides = [1, 1]} : vector<2x96xf32> to vector<2x32xf32>
    %407 = arith.mulf %406, %389 : vector<2x32xf32>
    %408 = vector.extract_strided_slice %403 {offsets = [0, 0], sizes = [2, 32], strides = [1, 1]} : vector<2x96xf32> to vector<2x32xf32>
    %409 = arith.mulf %408, %405 : vector<2x32xf32>
    %410 = arith.addf %407, %409 : vector<2x32xf32>
    %411 = vector.extract_strided_slice %403 {offsets = [0, 64], sizes = [2, 32], strides = [1, 1]} : vector<2x96xf32> to vector<2x32xf32>
    %412 = math.tanh %410 : vector<2x32xf32>
    %413 = arith.mulf %411, %412 : vector<2x32xf32>
    %414 = vector.extract_strided_slice %10 {offsets = [19, 0], sizes = [1, 128], strides = [1, 1]} : vector<20x128xf32> to vector<1x128xf32>
    %415 = vector.extract_strided_slice %11 {offsets = [19, 0], sizes = [1, 128], strides = [1, 1]} : vector<20x128xf32> to vector<1x128xf32>
    %416 = tpu.concatenate %414, %415 in 0 : vector<1x128xf32>, vector<1x128xf32> -> vector<2x128xf32>
    %cst_50 = arith.constant dense<0.000000e+00> : vector<2x128xf32>
    %417 = tpu.matmul %413, %12, %cst_50 {dimension_numbers = #tpu.dot_dimension_numbers<[1], [0], [0], [1], [0, 0, 1, 1], [], []>} : vector<2x32xf32>, vector<32x128xf32>, vector<2x128xf32> -> vector<2x128xf32>
    %418 = arith.addf %416, %417 : vector<2x128xf32>
    %419 = vector.extract_strided_slice %418 {offsets = [0, 0], sizes = [2, 96], strides = [1, 1]} : vector<2x128xf32> to vector<2x96xf32>
    %420 = arith.negf %419 : vector<2x96xf32>
    %421 = math.exp %420 : vector<2x96xf32>
    %cst_51 = arith.constant 1.000000e+00 : f32
    %422 = vector.broadcast %cst_51 : f32 to vector<2x96xf32>
    %423 = arith.addf %422, %421 : vector<2x96xf32>
    %424 = arith.divf %422, %423 : vector<2x96xf32>
    %425 = vector.extract_strided_slice %418 {offsets = [0, 96], sizes = [2, 32], strides = [1, 1]} : vector<2x128xf32> to vector<2x32xf32>
    %426 = math.tanh %425 : vector<2x32xf32>
    %427 = vector.extract_strided_slice %424 {offsets = [0, 32], sizes = [2, 32], strides = [1, 1]} : vector<2x96xf32> to vector<2x32xf32>
    %428 = arith.mulf %427, %410 : vector<2x32xf32>
    %429 = vector.extract_strided_slice %424 {offsets = [0, 0], sizes = [2, 32], strides = [1, 1]} : vector<2x96xf32> to vector<2x32xf32>
    %430 = arith.mulf %429, %426 : vector<2x32xf32>
    %431 = arith.addf %428, %430 : vector<2x32xf32>
    %432 = vector.extract_strided_slice %424 {offsets = [0, 64], sizes = [2, 32], strides = [1, 1]} : vector<2x96xf32> to vector<2x32xf32>
    %433 = math.tanh %431 : vector<2x32xf32>
    %434 = arith.mulf %432, %433 : vector<2x32xf32>
    %435 = tpu.concatenate %35, %56, %77, %98, %119, %140, %161, %182, %203, %224, %245, %266, %287, %308, %329, %350 in 0 : vector<2x32xf32>, vector<2x32xf32>, vector<2x32xf32>, vector<2x32xf32>, vector<2x32xf32>, vector<2x32xf32>, vector<2x32xf32>, vector<2x32xf32>, vector<2x32xf32>, vector<2x32xf32>, vector<2x32xf32>, vector<2x32xf32>, vector<2x32xf32>, vector<2x32xf32>, vector<2x32xf32>, vector<2x32xf32> -> vector<32x32xf32>
    %436 = tpu.concatenate %371, %392, %413, %434 in 0 : vector<2x32xf32>, vector<2x32xf32>, vector<2x32xf32>, vector<2x32xf32> -> vector<8x32xf32>
    %437 = tpu.concatenate %435, %436 in 0 : vector<32x32xf32>, vector<8x32xf32> -> vector<40x32xf32>
    %c0_52 = arith.constant 0 : index
    %c0_53 = arith.constant 0 : index
    %438 = vector.load %arg4[%c0_52, %c0_53] : memref<32x128xf32, #tpu.memory_space<vmem>>, vector<32x128xf32>
    %cst_54 = arith.constant dense<0.000000e+00> : vector<40x128xf32>
    %439 = tpu.matmul %437, %438, %cst_54 {dimension_numbers = #tpu.dot_dimension_numbers<[1], [0], [0], [1], [0, 0, 1, 1], [], []>} : vector<40x32xf32>, vector<32x128xf32>, vector<40x128xf32> -> vector<40x128xf32>
    %c0_55 = arith.constant 0 : index
    %c0_56 = arith.constant 0 : index
    %440 = vector.load %arg6[%c0_55, %c0_56] : memref<1x128xf32, #tpu.memory_space<vmem>>, vector<1x128xf32>
    %441 = vector.broadcast %440 : vector<1x128xf32> to vector<40x128xf32>
    %442 = arith.addf %439, %441 : vector<40x128xf32>
    %c0_57 = arith.constant 0 : index
    %c0_58 = arith.constant 0 : index
    %443 = vector.load %arg5[%c0_57, %c0_58] : memref<32x128xf32, #tpu.memory_space<vmem>>, vector<32x128xf32>
    %cst_59 = arith.constant 0.000000e+00 : f32
    %444 = vector.broadcast %cst_59 : f32 to vector<2x32xf32>
    %cst_60 = arith.constant 0.000000e+00 : f32
    %445 = vector.broadcast %cst_60 : f32 to vector<2x32xf32>
    %446 = vector.extract_strided_slice %442 {offsets = [0, 0], sizes = [2, 128], strides = [1, 1]} : vector<40x128xf32> to vector<2x128xf32>
    %cst_61 = arith.constant dense<0.000000e+00> : vector<2x128xf32>
    %447 = tpu.matmul %444, %443, %cst_61 {dimension_numbers = #tpu.dot_dimension_numbers<[1], [0], [0], [1], [0, 0, 1, 1], [], []>} : vector<2x32xf32>, vector<32x128xf32>, vector<2x128xf32> -> vector<2x128xf32>
    %448 = arith.addf %446, %447 : vector<2x128xf32>
    %449 = vector.extract_strided_slice %448 {offsets = [0, 0], sizes = [2, 96], strides = [1, 1]} : vector<2x128xf32> to vector<2x96xf32>
    %450 = arith.negf %449 : vector<2x96xf32>
    %451 = math.exp %450 : vector<2x96xf32>
    %cst_62 = arith.constant 1.000000e+00 : f32
    %452 = vector.broadcast %cst_62 : f32 to vector<2x96xf32>
    %453 = arith.addf %452, %451 : vector<2x96xf32>
    %454 = arith.divf %452, %453 : vector<2x96xf32>
    %455 = vector.extract_strided_slice %448 {offsets = [0, 96], sizes = [2, 32], strides = [1, 1]} : vector<2x128xf32> to vector<2x32xf32>
    %456 = math.tanh %455 : vector<2x32xf32>
    %457 = vector.extract_strided_slice %454 {offsets = [0, 32], sizes = [2, 32], strides = [1, 1]} : vector<2x96xf32> to vector<2x32xf32>
    %458 = arith.mulf %457, %445 : vector<2x32xf32>
    %459 = vector.extract_strided_slice %454 {offsets = [0, 0], sizes = [2, 32], strides = [1, 1]} : vector<2x96xf32> to vector<2x32xf32>
    %460 = arith.mulf %459, %456 : vector<2x32xf32>
    %461 = arith.addf %458, %460 : vector<2x32xf32>
    %462 = vector.extract_strided_slice %454 {offsets = [0, 64], sizes = [2, 32], strides = [1, 1]} : vector<2x96xf32> to vector<2x32xf32>
    %463 = math.tanh %461 : vector<2x32xf32>
    %464 = arith.mulf %462, %463 : vector<2x32xf32>
    %465 = vector.extract_strided_slice %442 {offsets = [2, 0], sizes = [2, 128], strides = [1, 1]} : vector<40x128xf32> to vector<2x128xf32>
    %cst_63 = arith.constant dense<0.000000e+00> : vector<2x128xf32>
    %466 = tpu.matmul %464, %443, %cst_63 {dimension_numbers = #tpu.dot_dimension_numbers<[1], [0], [0], [1], [0, 0, 1, 1], [], []>} : vector<2x32xf32>, vector<32x128xf32>, vector<2x128xf32> -> vector<2x128xf32>
    %467 = arith.addf %465, %466 : vector<2x128xf32>
    %468 = vector.extract_strided_slice %467 {offsets = [0, 0], sizes = [2, 96], strides = [1, 1]} : vector<2x128xf32> to vector<2x96xf32>
    %469 = arith.negf %468 : vector<2x96xf32>
    %470 = math.exp %469 : vector<2x96xf32>
    %cst_64 = arith.constant 1.000000e+00 : f32
    %471 = vector.broadcast %cst_64 : f32 to vector<2x96xf32>
    %472 = arith.addf %471, %470 : vector<2x96xf32>
    %473 = arith.divf %471, %472 : vector<2x96xf32>
    %474 = vector.extract_strided_slice %467 {offsets = [0, 96], sizes = [2, 32], strides = [1, 1]} : vector<2x128xf32> to vector<2x32xf32>
    %475 = math.tanh %474 : vector<2x32xf32>
    %476 = vector.extract_strided_slice %473 {offsets = [0, 32], sizes = [2, 32], strides = [1, 1]} : vector<2x96xf32> to vector<2x32xf32>
    %477 = arith.mulf %476, %461 : vector<2x32xf32>
    %478 = vector.extract_strided_slice %473 {offsets = [0, 0], sizes = [2, 32], strides = [1, 1]} : vector<2x96xf32> to vector<2x32xf32>
    %479 = arith.mulf %478, %475 : vector<2x32xf32>
    %480 = arith.addf %477, %479 : vector<2x32xf32>
    %481 = vector.extract_strided_slice %473 {offsets = [0, 64], sizes = [2, 32], strides = [1, 1]} : vector<2x96xf32> to vector<2x32xf32>
    %482 = math.tanh %480 : vector<2x32xf32>
    %483 = arith.mulf %481, %482 : vector<2x32xf32>
    %484 = vector.extract_strided_slice %442 {offsets = [4, 0], sizes = [2, 128], strides = [1, 1]} : vector<40x128xf32> to vector<2x128xf32>
    %cst_65 = arith.constant dense<0.000000e+00> : vector<2x128xf32>
    %485 = tpu.matmul %483, %443, %cst_65 {dimension_numbers = #tpu.dot_dimension_numbers<[1], [0], [0], [1], [0, 0, 1, 1], [], []>} : vector<2x32xf32>, vector<32x128xf32>, vector<2x128xf32> -> vector<2x128xf32>
    %486 = arith.addf %484, %485 : vector<2x128xf32>
    %487 = vector.extract_strided_slice %486 {offsets = [0, 0], sizes = [2, 96], strides = [1, 1]} : vector<2x128xf32> to vector<2x96xf32>
    %488 = arith.negf %487 : vector<2x96xf32>
    %489 = math.exp %488 : vector<2x96xf32>
    %cst_66 = arith.constant 1.000000e+00 : f32
    %490 = vector.broadcast %cst_66 : f32 to vector<2x96xf32>
    %491 = arith.addf %490, %489 : vector<2x96xf32>
    %492 = arith.divf %490, %491 : vector<2x96xf32>
    %493 = vector.extract_strided_slice %486 {offsets = [0, 96], sizes = [2, 32], strides = [1, 1]} : vector<2x128xf32> to vector<2x32xf32>
    %494 = math.tanh %493 : vector<2x32xf32>
    %495 = vector.extract_strided_slice %492 {offsets = [0, 32], sizes = [2, 32], strides = [1, 1]} : vector<2x96xf32> to vector<2x32xf32>
    %496 = arith.mulf %495, %480 : vector<2x32xf32>
    %497 = vector.extract_strided_slice %492 {offsets = [0, 0], sizes = [2, 32], strides = [1, 1]} : vector<2x96xf32> to vector<2x32xf32>
    %498 = arith.mulf %497, %494 : vector<2x32xf32>
    %499 = arith.addf %496, %498 : vector<2x32xf32>
    %500 = vector.extract_strided_slice %492 {offsets = [0, 64], sizes = [2, 32], strides = [1, 1]} : vector<2x96xf32> to vector<2x32xf32>
    %501 = math.tanh %499 : vector<2x32xf32>
    %502 = arith.mulf %500, %501 : vector<2x32xf32>
    %503 = vector.extract_strided_slice %442 {offsets = [6, 0], sizes = [2, 128], strides = [1, 1]} : vector<40x128xf32> to vector<2x128xf32>
    %cst_67 = arith.constant dense<0.000000e+00> : vector<2x128xf32>
    %504 = tpu.matmul %502, %443, %cst_67 {dimension_numbers = #tpu.dot_dimension_numbers<[1], [0], [0], [1], [0, 0, 1, 1], [], []>} : vector<2x32xf32>, vector<32x128xf32>, vector<2x128xf32> -> vector<2x128xf32>
    %505 = arith.addf %503, %504 : vector<2x128xf32>
    %506 = vector.extract_strided_slice %505 {offsets = [0, 0], sizes = [2, 96], strides = [1, 1]} : vector<2x128xf32> to vector<2x96xf32>
    %507 = arith.negf %506 : vector<2x96xf32>
    %508 = math.exp %507 : vector<2x96xf32>
    %cst_68 = arith.constant 1.000000e+00 : f32
    %509 = vector.broadcast %cst_68 : f32 to vector<2x96xf32>
    %510 = arith.addf %509, %508 : vector<2x96xf32>
    %511 = arith.divf %509, %510 : vector<2x96xf32>
    %512 = vector.extract_strided_slice %505 {offsets = [0, 96], sizes = [2, 32], strides = [1, 1]} : vector<2x128xf32> to vector<2x32xf32>
    %513 = math.tanh %512 : vector<2x32xf32>
    %514 = vector.extract_strided_slice %511 {offsets = [0, 32], sizes = [2, 32], strides = [1, 1]} : vector<2x96xf32> to vector<2x32xf32>
    %515 = arith.mulf %514, %499 : vector<2x32xf32>
    %516 = vector.extract_strided_slice %511 {offsets = [0, 0], sizes = [2, 32], strides = [1, 1]} : vector<2x96xf32> to vector<2x32xf32>
    %517 = arith.mulf %516, %513 : vector<2x32xf32>
    %518 = arith.addf %515, %517 : vector<2x32xf32>
    %519 = vector.extract_strided_slice %511 {offsets = [0, 64], sizes = [2, 32], strides = [1, 1]} : vector<2x96xf32> to vector<2x32xf32>
    %520 = math.tanh %518 : vector<2x32xf32>
    %521 = arith.mulf %519, %520 : vector<2x32xf32>
    %522 = vector.extract_strided_slice %442 {offsets = [8, 0], sizes = [2, 128], strides = [1, 1]} : vector<40x128xf32> to vector<2x128xf32>
    %cst_69 = arith.constant dense<0.000000e+00> : vector<2x128xf32>
    %523 = tpu.matmul %521, %443, %cst_69 {dimension_numbers = #tpu.dot_dimension_numbers<[1], [0], [0], [1], [0, 0, 1, 1], [], []>} : vector<2x32xf32>, vector<32x128xf32>, vector<2x128xf32> -> vector<2x128xf32>
    %524 = arith.addf %522, %523 : vector<2x128xf32>
    %525 = vector.extract_strided_slice %524 {offsets = [0, 0], sizes = [2, 96], strides = [1, 1]} : vector<2x128xf32> to vector<2x96xf32>
    %526 = arith.negf %525 : vector<2x96xf32>
    %527 = math.exp %526 : vector<2x96xf32>
    %cst_70 = arith.constant 1.000000e+00 : f32
    %528 = vector.broadcast %cst_70 : f32 to vector<2x96xf32>
    %529 = arith.addf %528, %527 : vector<2x96xf32>
    %530 = arith.divf %528, %529 : vector<2x96xf32>
    %531 = vector.extract_strided_slice %524 {offsets = [0, 96], sizes = [2, 32], strides = [1, 1]} : vector<2x128xf32> to vector<2x32xf32>
    %532 = math.tanh %531 : vector<2x32xf32>
    %533 = vector.extract_strided_slice %530 {offsets = [0, 32], sizes = [2, 32], strides = [1, 1]} : vector<2x96xf32> to vector<2x32xf32>
    %534 = arith.mulf %533, %518 : vector<2x32xf32>
    %535 = vector.extract_strided_slice %530 {offsets = [0, 0], sizes = [2, 32], strides = [1, 1]} : vector<2x96xf32> to vector<2x32xf32>
    %536 = arith.mulf %535, %532 : vector<2x32xf32>
    %537 = arith.addf %534, %536 : vector<2x32xf32>
    %538 = vector.extract_strided_slice %530 {offsets = [0, 64], sizes = [2, 32], strides = [1, 1]} : vector<2x96xf32> to vector<2x32xf32>
    %539 = math.tanh %537 : vector<2x32xf32>
    %540 = arith.mulf %538, %539 : vector<2x32xf32>
    %541 = vector.extract_strided_slice %442 {offsets = [10, 0], sizes = [2, 128], strides = [1, 1]} : vector<40x128xf32> to vector<2x128xf32>
    %cst_71 = arith.constant dense<0.000000e+00> : vector<2x128xf32>
    %542 = tpu.matmul %540, %443, %cst_71 {dimension_numbers = #tpu.dot_dimension_numbers<[1], [0], [0], [1], [0, 0, 1, 1], [], []>} : vector<2x32xf32>, vector<32x128xf32>, vector<2x128xf32> -> vector<2x128xf32>
    %543 = arith.addf %541, %542 : vector<2x128xf32>
    %544 = vector.extract_strided_slice %543 {offsets = [0, 0], sizes = [2, 96], strides = [1, 1]} : vector<2x128xf32> to vector<2x96xf32>
    %545 = arith.negf %544 : vector<2x96xf32>
    %546 = math.exp %545 : vector<2x96xf32>
    %cst_72 = arith.constant 1.000000e+00 : f32
    %547 = vector.broadcast %cst_72 : f32 to vector<2x96xf32>
    %548 = arith.addf %547, %546 : vector<2x96xf32>
    %549 = arith.divf %547, %548 : vector<2x96xf32>
    %550 = vector.extract_strided_slice %543 {offsets = [0, 96], sizes = [2, 32], strides = [1, 1]} : vector<2x128xf32> to vector<2x32xf32>
    %551 = math.tanh %550 : vector<2x32xf32>
    %552 = vector.extract_strided_slice %549 {offsets = [0, 32], sizes = [2, 32], strides = [1, 1]} : vector<2x96xf32> to vector<2x32xf32>
    %553 = arith.mulf %552, %537 : vector<2x32xf32>
    %554 = vector.extract_strided_slice %549 {offsets = [0, 0], sizes = [2, 32], strides = [1, 1]} : vector<2x96xf32> to vector<2x32xf32>
    %555 = arith.mulf %554, %551 : vector<2x32xf32>
    %556 = arith.addf %553, %555 : vector<2x32xf32>
    %557 = vector.extract_strided_slice %549 {offsets = [0, 64], sizes = [2, 32], strides = [1, 1]} : vector<2x96xf32> to vector<2x32xf32>
    %558 = math.tanh %556 : vector<2x32xf32>
    %559 = arith.mulf %557, %558 : vector<2x32xf32>
    %560 = vector.extract_strided_slice %442 {offsets = [12, 0], sizes = [2, 128], strides = [1, 1]} : vector<40x128xf32> to vector<2x128xf32>
    %cst_73 = arith.constant dense<0.000000e+00> : vector<2x128xf32>
    %561 = tpu.matmul %559, %443, %cst_73 {dimension_numbers = #tpu.dot_dimension_numbers<[1], [0], [0], [1], [0, 0, 1, 1], [], []>} : vector<2x32xf32>, vector<32x128xf32>, vector<2x128xf32> -> vector<2x128xf32>
    %562 = arith.addf %560, %561 : vector<2x128xf32>
    %563 = vector.extract_strided_slice %562 {offsets = [0, 0], sizes = [2, 96], strides = [1, 1]} : vector<2x128xf32> to vector<2x96xf32>
    %564 = arith.negf %563 : vector<2x96xf32>
    %565 = math.exp %564 : vector<2x96xf32>
    %cst_74 = arith.constant 1.000000e+00 : f32
    %566 = vector.broadcast %cst_74 : f32 to vector<2x96xf32>
    %567 = arith.addf %566, %565 : vector<2x96xf32>
    %568 = arith.divf %566, %567 : vector<2x96xf32>
    %569 = vector.extract_strided_slice %562 {offsets = [0, 96], sizes = [2, 32], strides = [1, 1]} : vector<2x128xf32> to vector<2x32xf32>
    %570 = math.tanh %569 : vector<2x32xf32>
    %571 = vector.extract_strided_slice %568 {offsets = [0, 32], sizes = [2, 32], strides = [1, 1]} : vector<2x96xf32> to vector<2x32xf32>
    %572 = arith.mulf %571, %556 : vector<2x32xf32>
    %573 = vector.extract_strided_slice %568 {offsets = [0, 0], sizes = [2, 32], strides = [1, 1]} : vector<2x96xf32> to vector<2x32xf32>
    %574 = arith.mulf %573, %570 : vector<2x32xf32>
    %575 = arith.addf %572, %574 : vector<2x32xf32>
    %576 = vector.extract_strided_slice %568 {offsets = [0, 64], sizes = [2, 32], strides = [1, 1]} : vector<2x96xf32> to vector<2x32xf32>
    %577 = math.tanh %575 : vector<2x32xf32>
    %578 = arith.mulf %576, %577 : vector<2x32xf32>
    %579 = vector.extract_strided_slice %442 {offsets = [14, 0], sizes = [2, 128], strides = [1, 1]} : vector<40x128xf32> to vector<2x128xf32>
    %cst_75 = arith.constant dense<0.000000e+00> : vector<2x128xf32>
    %580 = tpu.matmul %578, %443, %cst_75 {dimension_numbers = #tpu.dot_dimension_numbers<[1], [0], [0], [1], [0, 0, 1, 1], [], []>} : vector<2x32xf32>, vector<32x128xf32>, vector<2x128xf32> -> vector<2x128xf32>
    %581 = arith.addf %579, %580 : vector<2x128xf32>
    %582 = vector.extract_strided_slice %581 {offsets = [0, 0], sizes = [2, 96], strides = [1, 1]} : vector<2x128xf32> to vector<2x96xf32>
    %583 = arith.negf %582 : vector<2x96xf32>
    %584 = math.exp %583 : vector<2x96xf32>
    %cst_76 = arith.constant 1.000000e+00 : f32
    %585 = vector.broadcast %cst_76 : f32 to vector<2x96xf32>
    %586 = arith.addf %585, %584 : vector<2x96xf32>
    %587 = arith.divf %585, %586 : vector<2x96xf32>
    %588 = vector.extract_strided_slice %581 {offsets = [0, 96], sizes = [2, 32], strides = [1, 1]} : vector<2x128xf32> to vector<2x32xf32>
    %589 = math.tanh %588 : vector<2x32xf32>
    %590 = vector.extract_strided_slice %587 {offsets = [0, 32], sizes = [2, 32], strides = [1, 1]} : vector<2x96xf32> to vector<2x32xf32>
    %591 = arith.mulf %590, %575 : vector<2x32xf32>
    %592 = vector.extract_strided_slice %587 {offsets = [0, 0], sizes = [2, 32], strides = [1, 1]} : vector<2x96xf32> to vector<2x32xf32>
    %593 = arith.mulf %592, %589 : vector<2x32xf32>
    %594 = arith.addf %591, %593 : vector<2x32xf32>
    %595 = vector.extract_strided_slice %587 {offsets = [0, 64], sizes = [2, 32], strides = [1, 1]} : vector<2x96xf32> to vector<2x32xf32>
    %596 = math.tanh %594 : vector<2x32xf32>
    %597 = arith.mulf %595, %596 : vector<2x32xf32>
    %598 = vector.extract_strided_slice %442 {offsets = [16, 0], sizes = [2, 128], strides = [1, 1]} : vector<40x128xf32> to vector<2x128xf32>
    %cst_77 = arith.constant dense<0.000000e+00> : vector<2x128xf32>
    %599 = tpu.matmul %597, %443, %cst_77 {dimension_numbers = #tpu.dot_dimension_numbers<[1], [0], [0], [1], [0, 0, 1, 1], [], []>} : vector<2x32xf32>, vector<32x128xf32>, vector<2x128xf32> -> vector<2x128xf32>
    %600 = arith.addf %598, %599 : vector<2x128xf32>
    %601 = vector.extract_strided_slice %600 {offsets = [0, 0], sizes = [2, 96], strides = [1, 1]} : vector<2x128xf32> to vector<2x96xf32>
    %602 = arith.negf %601 : vector<2x96xf32>
    %603 = math.exp %602 : vector<2x96xf32>
    %cst_78 = arith.constant 1.000000e+00 : f32
    %604 = vector.broadcast %cst_78 : f32 to vector<2x96xf32>
    %605 = arith.addf %604, %603 : vector<2x96xf32>
    %606 = arith.divf %604, %605 : vector<2x96xf32>
    %607 = vector.extract_strided_slice %600 {offsets = [0, 96], sizes = [2, 32], strides = [1, 1]} : vector<2x128xf32> to vector<2x32xf32>
    %608 = math.tanh %607 : vector<2x32xf32>
    %609 = vector.extract_strided_slice %606 {offsets = [0, 32], sizes = [2, 32], strides = [1, 1]} : vector<2x96xf32> to vector<2x32xf32>
    %610 = arith.mulf %609, %594 : vector<2x32xf32>
    %611 = vector.extract_strided_slice %606 {offsets = [0, 0], sizes = [2, 32], strides = [1, 1]} : vector<2x96xf32> to vector<2x32xf32>
    %612 = arith.mulf %611, %608 : vector<2x32xf32>
    %613 = arith.addf %610, %612 : vector<2x32xf32>
    %614 = vector.extract_strided_slice %606 {offsets = [0, 64], sizes = [2, 32], strides = [1, 1]} : vector<2x96xf32> to vector<2x32xf32>
    %615 = math.tanh %613 : vector<2x32xf32>
    %616 = arith.mulf %614, %615 : vector<2x32xf32>
    %617 = vector.extract_strided_slice %442 {offsets = [18, 0], sizes = [2, 128], strides = [1, 1]} : vector<40x128xf32> to vector<2x128xf32>
    %cst_79 = arith.constant dense<0.000000e+00> : vector<2x128xf32>
    %618 = tpu.matmul %616, %443, %cst_79 {dimension_numbers = #tpu.dot_dimension_numbers<[1], [0], [0], [1], [0, 0, 1, 1], [], []>} : vector<2x32xf32>, vector<32x128xf32>, vector<2x128xf32> -> vector<2x128xf32>
    %619 = arith.addf %617, %618 : vector<2x128xf32>
    %620 = vector.extract_strided_slice %619 {offsets = [0, 0], sizes = [2, 96], strides = [1, 1]} : vector<2x128xf32> to vector<2x96xf32>
    %621 = arith.negf %620 : vector<2x96xf32>
    %622 = math.exp %621 : vector<2x96xf32>
    %cst_80 = arith.constant 1.000000e+00 : f32
    %623 = vector.broadcast %cst_80 : f32 to vector<2x96xf32>
    %624 = arith.addf %623, %622 : vector<2x96xf32>
    %625 = arith.divf %623, %624 : vector<2x96xf32>
    %626 = vector.extract_strided_slice %619 {offsets = [0, 96], sizes = [2, 32], strides = [1, 1]} : vector<2x128xf32> to vector<2x32xf32>
    %627 = math.tanh %626 : vector<2x32xf32>
    %628 = vector.extract_strided_slice %625 {offsets = [0, 32], sizes = [2, 32], strides = [1, 1]} : vector<2x96xf32> to vector<2x32xf32>
    %629 = arith.mulf %628, %613 : vector<2x32xf32>
    %630 = vector.extract_strided_slice %625 {offsets = [0, 0], sizes = [2, 32], strides = [1, 1]} : vector<2x96xf32> to vector<2x32xf32>
    %631 = arith.mulf %630, %627 : vector<2x32xf32>
    %632 = arith.addf %629, %631 : vector<2x32xf32>
    %633 = vector.extract_strided_slice %625 {offsets = [0, 64], sizes = [2, 32], strides = [1, 1]} : vector<2x96xf32> to vector<2x32xf32>
    %634 = math.tanh %632 : vector<2x32xf32>
    %635 = arith.mulf %633, %634 : vector<2x32xf32>
    %636 = vector.extract_strided_slice %442 {offsets = [20, 0], sizes = [2, 128], strides = [1, 1]} : vector<40x128xf32> to vector<2x128xf32>
    %cst_81 = arith.constant dense<0.000000e+00> : vector<2x128xf32>
    %637 = tpu.matmul %635, %443, %cst_81 {dimension_numbers = #tpu.dot_dimension_numbers<[1], [0], [0], [1], [0, 0, 1, 1], [], []>} : vector<2x32xf32>, vector<32x128xf32>, vector<2x128xf32> -> vector<2x128xf32>
    %638 = arith.addf %636, %637 : vector<2x128xf32>
    %639 = vector.extract_strided_slice %638 {offsets = [0, 0], sizes = [2, 96], strides = [1, 1]} : vector<2x128xf32> to vector<2x96xf32>
    %640 = arith.negf %639 : vector<2x96xf32>
    %641 = math.exp %640 : vector<2x96xf32>
    %cst_82 = arith.constant 1.000000e+00 : f32
    %642 = vector.broadcast %cst_82 : f32 to vector<2x96xf32>
    %643 = arith.addf %642, %641 : vector<2x96xf32>
    %644 = arith.divf %642, %643 : vector<2x96xf32>
    %645 = vector.extract_strided_slice %638 {offsets = [0, 96], sizes = [2, 32], strides = [1, 1]} : vector<2x128xf32> to vector<2x32xf32>
    %646 = math.tanh %645 : vector<2x32xf32>
    %647 = vector.extract_strided_slice %644 {offsets = [0, 32], sizes = [2, 32], strides = [1, 1]} : vector<2x96xf32> to vector<2x32xf32>
    %648 = arith.mulf %647, %632 : vector<2x32xf32>
    %649 = vector.extract_strided_slice %644 {offsets = [0, 0], sizes = [2, 32], strides = [1, 1]} : vector<2x96xf32> to vector<2x32xf32>
    %650 = arith.mulf %649, %646 : vector<2x32xf32>
    %651 = arith.addf %648, %650 : vector<2x32xf32>
    %652 = vector.extract_strided_slice %644 {offsets = [0, 64], sizes = [2, 32], strides = [1, 1]} : vector<2x96xf32> to vector<2x32xf32>
    %653 = math.tanh %651 : vector<2x32xf32>
    %654 = arith.mulf %652, %653 : vector<2x32xf32>
    %655 = vector.extract_strided_slice %442 {offsets = [22, 0], sizes = [2, 128], strides = [1, 1]} : vector<40x128xf32> to vector<2x128xf32>
    %cst_83 = arith.constant dense<0.000000e+00> : vector<2x128xf32>
    %656 = tpu.matmul %654, %443, %cst_83 {dimension_numbers = #tpu.dot_dimension_numbers<[1], [0], [0], [1], [0, 0, 1, 1], [], []>} : vector<2x32xf32>, vector<32x128xf32>, vector<2x128xf32> -> vector<2x128xf32>
    %657 = arith.addf %655, %656 : vector<2x128xf32>
    %658 = vector.extract_strided_slice %657 {offsets = [0, 0], sizes = [2, 96], strides = [1, 1]} : vector<2x128xf32> to vector<2x96xf32>
    %659 = arith.negf %658 : vector<2x96xf32>
    %660 = math.exp %659 : vector<2x96xf32>
    %cst_84 = arith.constant 1.000000e+00 : f32
    %661 = vector.broadcast %cst_84 : f32 to vector<2x96xf32>
    %662 = arith.addf %661, %660 : vector<2x96xf32>
    %663 = arith.divf %661, %662 : vector<2x96xf32>
    %664 = vector.extract_strided_slice %657 {offsets = [0, 96], sizes = [2, 32], strides = [1, 1]} : vector<2x128xf32> to vector<2x32xf32>
    %665 = math.tanh %664 : vector<2x32xf32>
    %666 = vector.extract_strided_slice %663 {offsets = [0, 32], sizes = [2, 32], strides = [1, 1]} : vector<2x96xf32> to vector<2x32xf32>
    %667 = arith.mulf %666, %651 : vector<2x32xf32>
    %668 = vector.extract_strided_slice %663 {offsets = [0, 0], sizes = [2, 32], strides = [1, 1]} : vector<2x96xf32> to vector<2x32xf32>
    %669 = arith.mulf %668, %665 : vector<2x32xf32>
    %670 = arith.addf %667, %669 : vector<2x32xf32>
    %671 = vector.extract_strided_slice %663 {offsets = [0, 64], sizes = [2, 32], strides = [1, 1]} : vector<2x96xf32> to vector<2x32xf32>
    %672 = math.tanh %670 : vector<2x32xf32>
    %673 = arith.mulf %671, %672 : vector<2x32xf32>
    %674 = vector.extract_strided_slice %442 {offsets = [24, 0], sizes = [2, 128], strides = [1, 1]} : vector<40x128xf32> to vector<2x128xf32>
    %cst_85 = arith.constant dense<0.000000e+00> : vector<2x128xf32>
    %675 = tpu.matmul %673, %443, %cst_85 {dimension_numbers = #tpu.dot_dimension_numbers<[1], [0], [0], [1], [0, 0, 1, 1], [], []>} : vector<2x32xf32>, vector<32x128xf32>, vector<2x128xf32> -> vector<2x128xf32>
    %676 = arith.addf %674, %675 : vector<2x128xf32>
    %677 = vector.extract_strided_slice %676 {offsets = [0, 0], sizes = [2, 96], strides = [1, 1]} : vector<2x128xf32> to vector<2x96xf32>
    %678 = arith.negf %677 : vector<2x96xf32>
    %679 = math.exp %678 : vector<2x96xf32>
    %cst_86 = arith.constant 1.000000e+00 : f32
    %680 = vector.broadcast %cst_86 : f32 to vector<2x96xf32>
    %681 = arith.addf %680, %679 : vector<2x96xf32>
    %682 = arith.divf %680, %681 : vector<2x96xf32>
    %683 = vector.extract_strided_slice %676 {offsets = [0, 96], sizes = [2, 32], strides = [1, 1]} : vector<2x128xf32> to vector<2x32xf32>
    %684 = math.tanh %683 : vector<2x32xf32>
    %685 = vector.extract_strided_slice %682 {offsets = [0, 32], sizes = [2, 32], strides = [1, 1]} : vector<2x96xf32> to vector<2x32xf32>
    %686 = arith.mulf %685, %670 : vector<2x32xf32>
    %687 = vector.extract_strided_slice %682 {offsets = [0, 0], sizes = [2, 32], strides = [1, 1]} : vector<2x96xf32> to vector<2x32xf32>
    %688 = arith.mulf %687, %684 : vector<2x32xf32>
    %689 = arith.addf %686, %688 : vector<2x32xf32>
    %690 = vector.extract_strided_slice %682 {offsets = [0, 64], sizes = [2, 32], strides = [1, 1]} : vector<2x96xf32> to vector<2x32xf32>
    %691 = math.tanh %689 : vector<2x32xf32>
    %692 = arith.mulf %690, %691 : vector<2x32xf32>
    %693 = vector.extract_strided_slice %442 {offsets = [26, 0], sizes = [2, 128], strides = [1, 1]} : vector<40x128xf32> to vector<2x128xf32>
    %cst_87 = arith.constant dense<0.000000e+00> : vector<2x128xf32>
    %694 = tpu.matmul %692, %443, %cst_87 {dimension_numbers = #tpu.dot_dimension_numbers<[1], [0], [0], [1], [0, 0, 1, 1], [], []>} : vector<2x32xf32>, vector<32x128xf32>, vector<2x128xf32> -> vector<2x128xf32>
    %695 = arith.addf %693, %694 : vector<2x128xf32>
    %696 = vector.extract_strided_slice %695 {offsets = [0, 0], sizes = [2, 96], strides = [1, 1]} : vector<2x128xf32> to vector<2x96xf32>
    %697 = arith.negf %696 : vector<2x96xf32>
    %698 = math.exp %697 : vector<2x96xf32>
    %cst_88 = arith.constant 1.000000e+00 : f32
    %699 = vector.broadcast %cst_88 : f32 to vector<2x96xf32>
    %700 = arith.addf %699, %698 : vector<2x96xf32>
    %701 = arith.divf %699, %700 : vector<2x96xf32>
    %702 = vector.extract_strided_slice %695 {offsets = [0, 96], sizes = [2, 32], strides = [1, 1]} : vector<2x128xf32> to vector<2x32xf32>
    %703 = math.tanh %702 : vector<2x32xf32>
    %704 = vector.extract_strided_slice %701 {offsets = [0, 32], sizes = [2, 32], strides = [1, 1]} : vector<2x96xf32> to vector<2x32xf32>
    %705 = arith.mulf %704, %689 : vector<2x32xf32>
    %706 = vector.extract_strided_slice %701 {offsets = [0, 0], sizes = [2, 32], strides = [1, 1]} : vector<2x96xf32> to vector<2x32xf32>
    %707 = arith.mulf %706, %703 : vector<2x32xf32>
    %708 = arith.addf %705, %707 : vector<2x32xf32>
    %709 = vector.extract_strided_slice %701 {offsets = [0, 64], sizes = [2, 32], strides = [1, 1]} : vector<2x96xf32> to vector<2x32xf32>
    %710 = math.tanh %708 : vector<2x32xf32>
    %711 = arith.mulf %709, %710 : vector<2x32xf32>
    %712 = vector.extract_strided_slice %442 {offsets = [28, 0], sizes = [2, 128], strides = [1, 1]} : vector<40x128xf32> to vector<2x128xf32>
    %cst_89 = arith.constant dense<0.000000e+00> : vector<2x128xf32>
    %713 = tpu.matmul %711, %443, %cst_89 {dimension_numbers = #tpu.dot_dimension_numbers<[1], [0], [0], [1], [0, 0, 1, 1], [], []>} : vector<2x32xf32>, vector<32x128xf32>, vector<2x128xf32> -> vector<2x128xf32>
    %714 = arith.addf %712, %713 : vector<2x128xf32>
    %715 = vector.extract_strided_slice %714 {offsets = [0, 0], sizes = [2, 96], strides = [1, 1]} : vector<2x128xf32> to vector<2x96xf32>
    %716 = arith.negf %715 : vector<2x96xf32>
    %717 = math.exp %716 : vector<2x96xf32>
    %cst_90 = arith.constant 1.000000e+00 : f32
    %718 = vector.broadcast %cst_90 : f32 to vector<2x96xf32>
    %719 = arith.addf %718, %717 : vector<2x96xf32>
    %720 = arith.divf %718, %719 : vector<2x96xf32>
    %721 = vector.extract_strided_slice %714 {offsets = [0, 96], sizes = [2, 32], strides = [1, 1]} : vector<2x128xf32> to vector<2x32xf32>
    %722 = math.tanh %721 : vector<2x32xf32>
    %723 = vector.extract_strided_slice %720 {offsets = [0, 32], sizes = [2, 32], strides = [1, 1]} : vector<2x96xf32> to vector<2x32xf32>
    %724 = arith.mulf %723, %708 : vector<2x32xf32>
    %725 = vector.extract_strided_slice %720 {offsets = [0, 0], sizes = [2, 32], strides = [1, 1]} : vector<2x96xf32> to vector<2x32xf32>
    %726 = arith.mulf %725, %722 : vector<2x32xf32>
    %727 = arith.addf %724, %726 : vector<2x32xf32>
    %728 = vector.extract_strided_slice %720 {offsets = [0, 64], sizes = [2, 32], strides = [1, 1]} : vector<2x96xf32> to vector<2x32xf32>
    %729 = math.tanh %727 : vector<2x32xf32>
    %730 = arith.mulf %728, %729 : vector<2x32xf32>
    %731 = vector.extract_strided_slice %442 {offsets = [30, 0], sizes = [2, 128], strides = [1, 1]} : vector<40x128xf32> to vector<2x128xf32>
    %cst_91 = arith.constant dense<0.000000e+00> : vector<2x128xf32>
    %732 = tpu.matmul %730, %443, %cst_91 {dimension_numbers = #tpu.dot_dimension_numbers<[1], [0], [0], [1], [0, 0, 1, 1], [], []>} : vector<2x32xf32>, vector<32x128xf32>, vector<2x128xf32> -> vector<2x128xf32>
    %733 = arith.addf %731, %732 : vector<2x128xf32>
    %734 = vector.extract_strided_slice %733 {offsets = [0, 0], sizes = [2, 96], strides = [1, 1]} : vector<2x128xf32> to vector<2x96xf32>
    %735 = arith.negf %734 : vector<2x96xf32>
    %736 = math.exp %735 : vector<2x96xf32>
    %cst_92 = arith.constant 1.000000e+00 : f32
    %737 = vector.broadcast %cst_92 : f32 to vector<2x96xf32>
    %738 = arith.addf %737, %736 : vector<2x96xf32>
    %739 = arith.divf %737, %738 : vector<2x96xf32>
    %740 = vector.extract_strided_slice %733 {offsets = [0, 96], sizes = [2, 32], strides = [1, 1]} : vector<2x128xf32> to vector<2x32xf32>
    %741 = math.tanh %740 : vector<2x32xf32>
    %742 = vector.extract_strided_slice %739 {offsets = [0, 32], sizes = [2, 32], strides = [1, 1]} : vector<2x96xf32> to vector<2x32xf32>
    %743 = arith.mulf %742, %727 : vector<2x32xf32>
    %744 = vector.extract_strided_slice %739 {offsets = [0, 0], sizes = [2, 32], strides = [1, 1]} : vector<2x96xf32> to vector<2x32xf32>
    %745 = arith.mulf %744, %741 : vector<2x32xf32>
    %746 = arith.addf %743, %745 : vector<2x32xf32>
    %747 = vector.extract_strided_slice %739 {offsets = [0, 64], sizes = [2, 32], strides = [1, 1]} : vector<2x96xf32> to vector<2x32xf32>
    %748 = math.tanh %746 : vector<2x32xf32>
    %749 = arith.mulf %747, %748 : vector<2x32xf32>
    %750 = vector.extract_strided_slice %442 {offsets = [32, 0], sizes = [2, 128], strides = [1, 1]} : vector<40x128xf32> to vector<2x128xf32>
    %cst_93 = arith.constant dense<0.000000e+00> : vector<2x128xf32>
    %751 = tpu.matmul %749, %443, %cst_93 {dimension_numbers = #tpu.dot_dimension_numbers<[1], [0], [0], [1], [0, 0, 1, 1], [], []>} : vector<2x32xf32>, vector<32x128xf32>, vector<2x128xf32> -> vector<2x128xf32>
    %752 = arith.addf %750, %751 : vector<2x128xf32>
    %753 = vector.extract_strided_slice %752 {offsets = [0, 0], sizes = [2, 96], strides = [1, 1]} : vector<2x128xf32> to vector<2x96xf32>
    %754 = arith.negf %753 : vector<2x96xf32>
    %755 = math.exp %754 : vector<2x96xf32>
    %cst_94 = arith.constant 1.000000e+00 : f32
    %756 = vector.broadcast %cst_94 : f32 to vector<2x96xf32>
    %757 = arith.addf %756, %755 : vector<2x96xf32>
    %758 = arith.divf %756, %757 : vector<2x96xf32>
    %759 = vector.extract_strided_slice %752 {offsets = [0, 96], sizes = [2, 32], strides = [1, 1]} : vector<2x128xf32> to vector<2x32xf32>
    %760 = math.tanh %759 : vector<2x32xf32>
    %761 = vector.extract_strided_slice %758 {offsets = [0, 32], sizes = [2, 32], strides = [1, 1]} : vector<2x96xf32> to vector<2x32xf32>
    %762 = arith.mulf %761, %746 : vector<2x32xf32>
    %763 = vector.extract_strided_slice %758 {offsets = [0, 0], sizes = [2, 32], strides = [1, 1]} : vector<2x96xf32> to vector<2x32xf32>
    %764 = arith.mulf %763, %760 : vector<2x32xf32>
    %765 = arith.addf %762, %764 : vector<2x32xf32>
    %766 = vector.extract_strided_slice %758 {offsets = [0, 64], sizes = [2, 32], strides = [1, 1]} : vector<2x96xf32> to vector<2x32xf32>
    %767 = math.tanh %765 : vector<2x32xf32>
    %768 = arith.mulf %766, %767 : vector<2x32xf32>
    %769 = vector.extract_strided_slice %442 {offsets = [34, 0], sizes = [2, 128], strides = [1, 1]} : vector<40x128xf32> to vector<2x128xf32>
    %cst_95 = arith.constant dense<0.000000e+00> : vector<2x128xf32>
    %770 = tpu.matmul %768, %443, %cst_95 {dimension_numbers = #tpu.dot_dimension_numbers<[1], [0], [0], [1], [0, 0, 1, 1], [], []>} : vector<2x32xf32>, vector<32x128xf32>, vector<2x128xf32> -> vector<2x128xf32>
    %771 = arith.addf %769, %770 : vector<2x128xf32>
    %772 = vector.extract_strided_slice %771 {offsets = [0, 0], sizes = [2, 96], strides = [1, 1]} : vector<2x128xf32> to vector<2x96xf32>
    %773 = arith.negf %772 : vector<2x96xf32>
    %774 = math.exp %773 : vector<2x96xf32>
    %cst_96 = arith.constant 1.000000e+00 : f32
    %775 = vector.broadcast %cst_96 : f32 to vector<2x96xf32>
    %776 = arith.addf %775, %774 : vector<2x96xf32>
    %777 = arith.divf %775, %776 : vector<2x96xf32>
    %778 = vector.extract_strided_slice %771 {offsets = [0, 96], sizes = [2, 32], strides = [1, 1]} : vector<2x128xf32> to vector<2x32xf32>
    %779 = math.tanh %778 : vector<2x32xf32>
    %780 = vector.extract_strided_slice %777 {offsets = [0, 32], sizes = [2, 32], strides = [1, 1]} : vector<2x96xf32> to vector<2x32xf32>
    %781 = arith.mulf %780, %765 : vector<2x32xf32>
    %782 = vector.extract_strided_slice %777 {offsets = [0, 0], sizes = [2, 32], strides = [1, 1]} : vector<2x96xf32> to vector<2x32xf32>
    %783 = arith.mulf %782, %779 : vector<2x32xf32>
    %784 = arith.addf %781, %783 : vector<2x32xf32>
    %785 = vector.extract_strided_slice %777 {offsets = [0, 64], sizes = [2, 32], strides = [1, 1]} : vector<2x96xf32> to vector<2x32xf32>
    %786 = math.tanh %784 : vector<2x32xf32>
    %787 = arith.mulf %785, %786 : vector<2x32xf32>
    %788 = vector.extract_strided_slice %442 {offsets = [36, 0], sizes = [2, 128], strides = [1, 1]} : vector<40x128xf32> to vector<2x128xf32>
    %cst_97 = arith.constant dense<0.000000e+00> : vector<2x128xf32>
    %789 = tpu.matmul %787, %443, %cst_97 {dimension_numbers = #tpu.dot_dimension_numbers<[1], [0], [0], [1], [0, 0, 1, 1], [], []>} : vector<2x32xf32>, vector<32x128xf32>, vector<2x128xf32> -> vector<2x128xf32>
    %790 = arith.addf %788, %789 : vector<2x128xf32>
    %791 = vector.extract_strided_slice %790 {offsets = [0, 0], sizes = [2, 96], strides = [1, 1]} : vector<2x128xf32> to vector<2x96xf32>
    %792 = arith.negf %791 : vector<2x96xf32>
    %793 = math.exp %792 : vector<2x96xf32>
    %cst_98 = arith.constant 1.000000e+00 : f32
    %794 = vector.broadcast %cst_98 : f32 to vector<2x96xf32>
    %795 = arith.addf %794, %793 : vector<2x96xf32>
    %796 = arith.divf %794, %795 : vector<2x96xf32>
    %797 = vector.extract_strided_slice %790 {offsets = [0, 96], sizes = [2, 32], strides = [1, 1]} : vector<2x128xf32> to vector<2x32xf32>
    %798 = math.tanh %797 : vector<2x32xf32>
    %799 = vector.extract_strided_slice %796 {offsets = [0, 32], sizes = [2, 32], strides = [1, 1]} : vector<2x96xf32> to vector<2x32xf32>
    %800 = arith.mulf %799, %784 : vector<2x32xf32>
    %801 = vector.extract_strided_slice %796 {offsets = [0, 0], sizes = [2, 32], strides = [1, 1]} : vector<2x96xf32> to vector<2x32xf32>
    %802 = arith.mulf %801, %798 : vector<2x32xf32>
    %803 = arith.addf %800, %802 : vector<2x32xf32>
    %804 = vector.extract_strided_slice %796 {offsets = [0, 64], sizes = [2, 32], strides = [1, 1]} : vector<2x96xf32> to vector<2x32xf32>
    %805 = math.tanh %803 : vector<2x32xf32>
    %806 = arith.mulf %804, %805 : vector<2x32xf32>
    %807 = vector.extract_strided_slice %442 {offsets = [38, 0], sizes = [2, 128], strides = [1, 1]} : vector<40x128xf32> to vector<2x128xf32>
    %cst_99 = arith.constant dense<0.000000e+00> : vector<2x128xf32>
    %808 = tpu.matmul %806, %443, %cst_99 {dimension_numbers = #tpu.dot_dimension_numbers<[1], [0], [0], [1], [0, 0, 1, 1], [], []>} : vector<2x32xf32>, vector<32x128xf32>, vector<2x128xf32> -> vector<2x128xf32>
    %809 = arith.addf %807, %808 : vector<2x128xf32>
    %810 = vector.extract_strided_slice %809 {offsets = [0, 0], sizes = [2, 96], strides = [1, 1]} : vector<2x128xf32> to vector<2x96xf32>
    %811 = arith.negf %810 : vector<2x96xf32>
    %812 = math.exp %811 : vector<2x96xf32>
    %cst_100 = arith.constant 1.000000e+00 : f32
    %813 = vector.broadcast %cst_100 : f32 to vector<2x96xf32>
    %814 = arith.addf %813, %812 : vector<2x96xf32>
    %815 = arith.divf %813, %814 : vector<2x96xf32>
    %816 = vector.extract_strided_slice %809 {offsets = [0, 96], sizes = [2, 32], strides = [1, 1]} : vector<2x128xf32> to vector<2x32xf32>
    %817 = math.tanh %816 : vector<2x32xf32>
    %818 = vector.extract_strided_slice %815 {offsets = [0, 32], sizes = [2, 32], strides = [1, 1]} : vector<2x96xf32> to vector<2x32xf32>
    %819 = arith.mulf %818, %803 : vector<2x32xf32>
    %820 = vector.extract_strided_slice %815 {offsets = [0, 0], sizes = [2, 32], strides = [1, 1]} : vector<2x96xf32> to vector<2x32xf32>
    %821 = arith.mulf %820, %817 : vector<2x32xf32>
    %822 = arith.addf %819, %821 : vector<2x32xf32>
    %823 = vector.extract_strided_slice %815 {offsets = [0, 64], sizes = [2, 32], strides = [1, 1]} : vector<2x96xf32> to vector<2x32xf32>
    %824 = math.tanh %822 : vector<2x32xf32>
    %825 = arith.mulf %823, %824 : vector<2x32xf32>
    %826 = tpu.concatenate %464, %483, %502, %521, %540, %559, %578, %597, %616, %635, %654, %673, %692, %711, %730, %749 in 0 : vector<2x32xf32>, vector<2x32xf32>, vector<2x32xf32>, vector<2x32xf32>, vector<2x32xf32>, vector<2x32xf32>, vector<2x32xf32>, vector<2x32xf32>, vector<2x32xf32>, vector<2x32xf32>, vector<2x32xf32>, vector<2x32xf32>, vector<2x32xf32>, vector<2x32xf32>, vector<2x32xf32>, vector<2x32xf32> -> vector<32x32xf32>
    %827 = tpu.concatenate %768, %787, %806, %825 in 0 : vector<2x32xf32>, vector<2x32xf32>, vector<2x32xf32>, vector<2x32xf32> -> vector<8x32xf32>
    %828 = tpu.concatenate %826, %827 in 0 : vector<32x32xf32>, vector<8x32xf32> -> vector<40x32xf32>
    %c0_101 = arith.constant 0 : index
    %c0_102 = arith.constant 0 : index
    %829 = vector.load %arg7[%c0_101, %c0_102] : memref<32x32xf32, #tpu.memory_space<vmem>>, vector<32x32xf32>
    %cst_103 = arith.constant dense<0.000000e+00> : vector<40x32xf32>
    %830 = tpu.matmul %828, %829, %cst_103 {dimension_numbers = #tpu.dot_dimension_numbers<[1], [0], [0], [1], [0, 0, 1, 1], [], []>} : vector<40x32xf32>, vector<32x32xf32>, vector<40x32xf32> -> vector<40x32xf32>
    %831 = math.tanh %830 : vector<40x32xf32>
    %c0_104 = arith.constant 0 : index
    %c0_105 = arith.constant 0 : index
    %832 = vector.load %arg8[%c0_104, %c0_105] : memref<1x32xf32, #tpu.memory_space<vmem>>, vector<1x32xf32>
    %833 = vector.extract_strided_slice %831 {offsets = [0, 0], sizes = [2, 32], strides = [1, 1]} : vector<40x32xf32> to vector<2x32xf32>
    %834 = vector.broadcast %832 : vector<1x32xf32> to vector<2x32xf32>
    %835 = arith.mulf %833, %834 : vector<2x32xf32>
    %cst_106 = arith.constant dense<0.000000e+00> : vector<2xf32>
    %836 = vector.multi_reduction <add>, %835, %cst_106 [1] : vector<2x32xf32> to vector<2xf32>
    %837 = vector.shape_cast %836 : vector<2xf32> to vector<2x1xf32>
    %838 = vector.extract_strided_slice %831 {offsets = [2, 0], sizes = [2, 32], strides = [1, 1]} : vector<40x32xf32> to vector<2x32xf32>
    %839 = vector.broadcast %832 : vector<1x32xf32> to vector<2x32xf32>
    %840 = arith.mulf %838, %839 : vector<2x32xf32>
    %cst_107 = arith.constant dense<0.000000e+00> : vector<2xf32>
    %841 = vector.multi_reduction <add>, %840, %cst_107 [1] : vector<2x32xf32> to vector<2xf32>
    %842 = vector.shape_cast %841 : vector<2xf32> to vector<2x1xf32>
    %843 = vector.extract_strided_slice %831 {offsets = [4, 0], sizes = [2, 32], strides = [1, 1]} : vector<40x32xf32> to vector<2x32xf32>
    %844 = vector.broadcast %832 : vector<1x32xf32> to vector<2x32xf32>
    %845 = arith.mulf %843, %844 : vector<2x32xf32>
    %cst_108 = arith.constant dense<0.000000e+00> : vector<2xf32>
    %846 = vector.multi_reduction <add>, %845, %cst_108 [1] : vector<2x32xf32> to vector<2xf32>
    %847 = vector.shape_cast %846 : vector<2xf32> to vector<2x1xf32>
    %848 = vector.extract_strided_slice %831 {offsets = [6, 0], sizes = [2, 32], strides = [1, 1]} : vector<40x32xf32> to vector<2x32xf32>
    %849 = vector.broadcast %832 : vector<1x32xf32> to vector<2x32xf32>
    %850 = arith.mulf %848, %849 : vector<2x32xf32>
    %cst_109 = arith.constant dense<0.000000e+00> : vector<2xf32>
    %851 = vector.multi_reduction <add>, %850, %cst_109 [1] : vector<2x32xf32> to vector<2xf32>
    %852 = vector.shape_cast %851 : vector<2xf32> to vector<2x1xf32>
    %853 = vector.extract_strided_slice %831 {offsets = [8, 0], sizes = [2, 32], strides = [1, 1]} : vector<40x32xf32> to vector<2x32xf32>
    %854 = vector.broadcast %832 : vector<1x32xf32> to vector<2x32xf32>
    %855 = arith.mulf %853, %854 : vector<2x32xf32>
    %cst_110 = arith.constant dense<0.000000e+00> : vector<2xf32>
    %856 = vector.multi_reduction <add>, %855, %cst_110 [1] : vector<2x32xf32> to vector<2xf32>
    %857 = vector.shape_cast %856 : vector<2xf32> to vector<2x1xf32>
    %858 = vector.extract_strided_slice %831 {offsets = [10, 0], sizes = [2, 32], strides = [1, 1]} : vector<40x32xf32> to vector<2x32xf32>
    %859 = vector.broadcast %832 : vector<1x32xf32> to vector<2x32xf32>
    %860 = arith.mulf %858, %859 : vector<2x32xf32>
    %cst_111 = arith.constant dense<0.000000e+00> : vector<2xf32>
    %861 = vector.multi_reduction <add>, %860, %cst_111 [1] : vector<2x32xf32> to vector<2xf32>
    %862 = vector.shape_cast %861 : vector<2xf32> to vector<2x1xf32>
    %863 = vector.extract_strided_slice %831 {offsets = [12, 0], sizes = [2, 32], strides = [1, 1]} : vector<40x32xf32> to vector<2x32xf32>
    %864 = vector.broadcast %832 : vector<1x32xf32> to vector<2x32xf32>
    %865 = arith.mulf %863, %864 : vector<2x32xf32>
    %cst_112 = arith.constant dense<0.000000e+00> : vector<2xf32>
    %866 = vector.multi_reduction <add>, %865, %cst_112 [1] : vector<2x32xf32> to vector<2xf32>
    %867 = vector.shape_cast %866 : vector<2xf32> to vector<2x1xf32>
    %868 = vector.extract_strided_slice %831 {offsets = [14, 0], sizes = [2, 32], strides = [1, 1]} : vector<40x32xf32> to vector<2x32xf32>
    %869 = vector.broadcast %832 : vector<1x32xf32> to vector<2x32xf32>
    %870 = arith.mulf %868, %869 : vector<2x32xf32>
    %cst_113 = arith.constant dense<0.000000e+00> : vector<2xf32>
    %871 = vector.multi_reduction <add>, %870, %cst_113 [1] : vector<2x32xf32> to vector<2xf32>
    %872 = vector.shape_cast %871 : vector<2xf32> to vector<2x1xf32>
    %873 = vector.extract_strided_slice %831 {offsets = [16, 0], sizes = [2, 32], strides = [1, 1]} : vector<40x32xf32> to vector<2x32xf32>
    %874 = vector.broadcast %832 : vector<1x32xf32> to vector<2x32xf32>
    %875 = arith.mulf %873, %874 : vector<2x32xf32>
    %cst_114 = arith.constant dense<0.000000e+00> : vector<2xf32>
    %876 = vector.multi_reduction <add>, %875, %cst_114 [1] : vector<2x32xf32> to vector<2xf32>
    %877 = vector.shape_cast %876 : vector<2xf32> to vector<2x1xf32>
    %878 = vector.extract_strided_slice %831 {offsets = [18, 0], sizes = [2, 32], strides = [1, 1]} : vector<40x32xf32> to vector<2x32xf32>
    %879 = vector.broadcast %832 : vector<1x32xf32> to vector<2x32xf32>
    %880 = arith.mulf %878, %879 : vector<2x32xf32>
    %cst_115 = arith.constant dense<0.000000e+00> : vector<2xf32>
    %881 = vector.multi_reduction <add>, %880, %cst_115 [1] : vector<2x32xf32> to vector<2xf32>
    %882 = vector.shape_cast %881 : vector<2xf32> to vector<2x1xf32>
    %883 = vector.extract_strided_slice %831 {offsets = [20, 0], sizes = [2, 32], strides = [1, 1]} : vector<40x32xf32> to vector<2x32xf32>
    %884 = vector.broadcast %832 : vector<1x32xf32> to vector<2x32xf32>
    %885 = arith.mulf %883, %884 : vector<2x32xf32>
    %cst_116 = arith.constant dense<0.000000e+00> : vector<2xf32>
    %886 = vector.multi_reduction <add>, %885, %cst_116 [1] : vector<2x32xf32> to vector<2xf32>
    %887 = vector.shape_cast %886 : vector<2xf32> to vector<2x1xf32>
    %888 = vector.extract_strided_slice %831 {offsets = [22, 0], sizes = [2, 32], strides = [1, 1]} : vector<40x32xf32> to vector<2x32xf32>
    %889 = vector.broadcast %832 : vector<1x32xf32> to vector<2x32xf32>
    %890 = arith.mulf %888, %889 : vector<2x32xf32>
    %cst_117 = arith.constant dense<0.000000e+00> : vector<2xf32>
    %891 = vector.multi_reduction <add>, %890, %cst_117 [1] : vector<2x32xf32> to vector<2xf32>
    %892 = vector.shape_cast %891 : vector<2xf32> to vector<2x1xf32>
    %893 = vector.extract_strided_slice %831 {offsets = [24, 0], sizes = [2, 32], strides = [1, 1]} : vector<40x32xf32> to vector<2x32xf32>
    %894 = vector.broadcast %832 : vector<1x32xf32> to vector<2x32xf32>
    %895 = arith.mulf %893, %894 : vector<2x32xf32>
    %cst_118 = arith.constant dense<0.000000e+00> : vector<2xf32>
    %896 = vector.multi_reduction <add>, %895, %cst_118 [1] : vector<2x32xf32> to vector<2xf32>
    %897 = vector.shape_cast %896 : vector<2xf32> to vector<2x1xf32>
    %898 = vector.extract_strided_slice %831 {offsets = [26, 0], sizes = [2, 32], strides = [1, 1]} : vector<40x32xf32> to vector<2x32xf32>
    %899 = vector.broadcast %832 : vector<1x32xf32> to vector<2x32xf32>
    %900 = arith.mulf %898, %899 : vector<2x32xf32>
    %cst_119 = arith.constant dense<0.000000e+00> : vector<2xf32>
    %901 = vector.multi_reduction <add>, %900, %cst_119 [1] : vector<2x32xf32> to vector<2xf32>
    %902 = vector.shape_cast %901 : vector<2xf32> to vector<2x1xf32>
    %903 = vector.extract_strided_slice %831 {offsets = [28, 0], sizes = [2, 32], strides = [1, 1]} : vector<40x32xf32> to vector<2x32xf32>
    %904 = vector.broadcast %832 : vector<1x32xf32> to vector<2x32xf32>
    %905 = arith.mulf %903, %904 : vector<2x32xf32>
    %cst_120 = arith.constant dense<0.000000e+00> : vector<2xf32>
    %906 = vector.multi_reduction <add>, %905, %cst_120 [1] : vector<2x32xf32> to vector<2xf32>
    %907 = vector.shape_cast %906 : vector<2xf32> to vector<2x1xf32>
    %908 = vector.extract_strided_slice %831 {offsets = [30, 0], sizes = [2, 32], strides = [1, 1]} : vector<40x32xf32> to vector<2x32xf32>
    %909 = vector.broadcast %832 : vector<1x32xf32> to vector<2x32xf32>
    %910 = arith.mulf %908, %909 : vector<2x32xf32>
    %cst_121 = arith.constant dense<0.000000e+00> : vector<2xf32>
    %911 = vector.multi_reduction <add>, %910, %cst_121 [1] : vector<2x32xf32> to vector<2xf32>
    %912 = vector.shape_cast %911 : vector<2xf32> to vector<2x1xf32>
    %913 = vector.extract_strided_slice %831 {offsets = [32, 0], sizes = [2, 32], strides = [1, 1]} : vector<40x32xf32> to vector<2x32xf32>
    %914 = vector.broadcast %832 : vector<1x32xf32> to vector<2x32xf32>
    %915 = arith.mulf %913, %914 : vector<2x32xf32>
    %cst_122 = arith.constant dense<0.000000e+00> : vector<2xf32>
    %916 = vector.multi_reduction <add>, %915, %cst_122 [1] : vector<2x32xf32> to vector<2xf32>
    %917 = vector.shape_cast %916 : vector<2xf32> to vector<2x1xf32>
    %918 = vector.extract_strided_slice %831 {offsets = [34, 0], sizes = [2, 32], strides = [1, 1]} : vector<40x32xf32> to vector<2x32xf32>
    %919 = vector.broadcast %832 : vector<1x32xf32> to vector<2x32xf32>
    %920 = arith.mulf %918, %919 : vector<2x32xf32>
    %cst_123 = arith.constant dense<0.000000e+00> : vector<2xf32>
    %921 = vector.multi_reduction <add>, %920, %cst_123 [1] : vector<2x32xf32> to vector<2xf32>
    %922 = vector.shape_cast %921 : vector<2xf32> to vector<2x1xf32>
    %923 = vector.extract_strided_slice %831 {offsets = [36, 0], sizes = [2, 32], strides = [1, 1]} : vector<40x32xf32> to vector<2x32xf32>
    %924 = vector.broadcast %832 : vector<1x32xf32> to vector<2x32xf32>
    %925 = arith.mulf %923, %924 : vector<2x32xf32>
    %cst_124 = arith.constant dense<0.000000e+00> : vector<2xf32>
    %926 = vector.multi_reduction <add>, %925, %cst_124 [1] : vector<2x32xf32> to vector<2xf32>
    %927 = vector.shape_cast %926 : vector<2xf32> to vector<2x1xf32>
    %928 = vector.extract_strided_slice %831 {offsets = [38, 0], sizes = [2, 32], strides = [1, 1]} : vector<40x32xf32> to vector<2x32xf32>
    %929 = vector.broadcast %832 : vector<1x32xf32> to vector<2x32xf32>
    %930 = arith.mulf %928, %929 : vector<2x32xf32>
    %cst_125 = arith.constant dense<0.000000e+00> : vector<2xf32>
    %931 = vector.multi_reduction <add>, %930, %cst_125 [1] : vector<2x32xf32> to vector<2xf32>
    %932 = vector.shape_cast %931 : vector<2xf32> to vector<2x1xf32>
    %933 = tpu.concatenate %837, %842, %847, %852, %857, %862, %867, %872, %877, %882, %887, %892, %897, %902, %907, %912 in 1 : vector<2x1xf32>, vector<2x1xf32>, vector<2x1xf32>, vector<2x1xf32>, vector<2x1xf32>, vector<2x1xf32>, vector<2x1xf32>, vector<2x1xf32>, vector<2x1xf32>, vector<2x1xf32>, vector<2x1xf32>, vector<2x1xf32>, vector<2x1xf32>, vector<2x1xf32>, vector<2x1xf32>, vector<2x1xf32> -> vector<2x16xf32>
    %934 = tpu.concatenate %917, %922, %927, %932 in 1 : vector<2x1xf32>, vector<2x1xf32>, vector<2x1xf32>, vector<2x1xf32> -> vector<2x4xf32>
    %935 = tpu.concatenate %933, %934 in 1 : vector<2x16xf32>, vector<2x4xf32> -> vector<2x20xf32>
    %cst_126 = arith.constant dense<0xFF800000> : vector<2xf32>
    %936 = vector.multi_reduction <maximumf>, %935, %cst_126 [1] : vector<2x20xf32> to vector<2xf32>
    %937 = vector.shape_cast %936 : vector<2xf32> to vector<2x1xf32>
    %938 = vector.broadcast %937 : vector<2x1xf32> to vector<2x20xf32>
    %939 = arith.subf %935, %938 : vector<2x20xf32>
    %940 = math.exp %939 : vector<2x20xf32>
    %cst_127 = arith.constant dense<0.000000e+00> : vector<2xf32>
    %941 = vector.multi_reduction <add>, %940, %cst_127 [1] : vector<2x20xf32> to vector<2xf32>
    %942 = vector.shape_cast %941 : vector<2xf32> to vector<2x1xf32>
    %943 = vector.broadcast %942 : vector<2x1xf32> to vector<2x20xf32>
    %944 = arith.divf %940, %943 : vector<2x20xf32>
    %cst_128 = arith.constant 0.000000e+00 : f32
    %945 = vector.broadcast %cst_128 : f32 to vector<2x32xf32>
    %946 = vector.extract_strided_slice %944 {offsets = [0, 0], sizes = [2, 1], strides = [1, 1]} : vector<2x20xf32> to vector<2x1xf32>
    %947 = vector.broadcast %946 : vector<2x1xf32> to vector<2x32xf32>
    %948 = arith.mulf %464, %947 : vector<2x32xf32>
    %949 = arith.addf %945, %948 : vector<2x32xf32>
    %950 = vector.extract_strided_slice %944 {offsets = [0, 1], sizes = [2, 1], strides = [1, 1]} : vector<2x20xf32> to vector<2x1xf32>
    %951 = vector.broadcast %950 : vector<2x1xf32> to vector<2x32xf32>
    %952 = arith.mulf %483, %951 : vector<2x32xf32>
    %953 = arith.addf %949, %952 : vector<2x32xf32>
    %954 = vector.extract_strided_slice %944 {offsets = [0, 2], sizes = [2, 1], strides = [1, 1]} : vector<2x20xf32> to vector<2x1xf32>
    %955 = vector.broadcast %954 : vector<2x1xf32> to vector<2x32xf32>
    %956 = arith.mulf %502, %955 : vector<2x32xf32>
    %957 = arith.addf %953, %956 : vector<2x32xf32>
    %958 = vector.extract_strided_slice %944 {offsets = [0, 3], sizes = [2, 1], strides = [1, 1]} : vector<2x20xf32> to vector<2x1xf32>
    %959 = vector.broadcast %958 : vector<2x1xf32> to vector<2x32xf32>
    %960 = arith.mulf %521, %959 : vector<2x32xf32>
    %961 = arith.addf %957, %960 : vector<2x32xf32>
    %962 = vector.extract_strided_slice %944 {offsets = [0, 4], sizes = [2, 1], strides = [1, 1]} : vector<2x20xf32> to vector<2x1xf32>
    %963 = vector.broadcast %962 : vector<2x1xf32> to vector<2x32xf32>
    %964 = arith.mulf %540, %963 : vector<2x32xf32>
    %965 = arith.addf %961, %964 : vector<2x32xf32>
    %966 = vector.extract_strided_slice %944 {offsets = [0, 5], sizes = [2, 1], strides = [1, 1]} : vector<2x20xf32> to vector<2x1xf32>
    %967 = vector.broadcast %966 : vector<2x1xf32> to vector<2x32xf32>
    %968 = arith.mulf %559, %967 : vector<2x32xf32>
    %969 = arith.addf %965, %968 : vector<2x32xf32>
    %970 = vector.extract_strided_slice %944 {offsets = [0, 6], sizes = [2, 1], strides = [1, 1]} : vector<2x20xf32> to vector<2x1xf32>
    %971 = vector.broadcast %970 : vector<2x1xf32> to vector<2x32xf32>
    %972 = arith.mulf %578, %971 : vector<2x32xf32>
    %973 = arith.addf %969, %972 : vector<2x32xf32>
    %974 = vector.extract_strided_slice %944 {offsets = [0, 7], sizes = [2, 1], strides = [1, 1]} : vector<2x20xf32> to vector<2x1xf32>
    %975 = vector.broadcast %974 : vector<2x1xf32> to vector<2x32xf32>
    %976 = arith.mulf %597, %975 : vector<2x32xf32>
    %977 = arith.addf %973, %976 : vector<2x32xf32>
    %978 = vector.extract_strided_slice %944 {offsets = [0, 8], sizes = [2, 1], strides = [1, 1]} : vector<2x20xf32> to vector<2x1xf32>
    %979 = vector.broadcast %978 : vector<2x1xf32> to vector<2x32xf32>
    %980 = arith.mulf %616, %979 : vector<2x32xf32>
    %981 = arith.addf %977, %980 : vector<2x32xf32>
    %982 = vector.extract_strided_slice %944 {offsets = [0, 9], sizes = [2, 1], strides = [1, 1]} : vector<2x20xf32> to vector<2x1xf32>
    %983 = vector.broadcast %982 : vector<2x1xf32> to vector<2x32xf32>
    %984 = arith.mulf %635, %983 : vector<2x32xf32>
    %985 = arith.addf %981, %984 : vector<2x32xf32>
    %986 = vector.extract_strided_slice %944 {offsets = [0, 10], sizes = [2, 1], strides = [1, 1]} : vector<2x20xf32> to vector<2x1xf32>
    %987 = vector.broadcast %986 : vector<2x1xf32> to vector<2x32xf32>
    %988 = arith.mulf %654, %987 : vector<2x32xf32>
    %989 = arith.addf %985, %988 : vector<2x32xf32>
    %990 = vector.extract_strided_slice %944 {offsets = [0, 11], sizes = [2, 1], strides = [1, 1]} : vector<2x20xf32> to vector<2x1xf32>
    %991 = vector.broadcast %990 : vector<2x1xf32> to vector<2x32xf32>
    %992 = arith.mulf %673, %991 : vector<2x32xf32>
    %993 = arith.addf %989, %992 : vector<2x32xf32>
    %994 = vector.extract_strided_slice %944 {offsets = [0, 12], sizes = [2, 1], strides = [1, 1]} : vector<2x20xf32> to vector<2x1xf32>
    %995 = vector.broadcast %994 : vector<2x1xf32> to vector<2x32xf32>
    %996 = arith.mulf %692, %995 : vector<2x32xf32>
    %997 = arith.addf %993, %996 : vector<2x32xf32>
    %998 = vector.extract_strided_slice %944 {offsets = [0, 13], sizes = [2, 1], strides = [1, 1]} : vector<2x20xf32> to vector<2x1xf32>
    %999 = vector.broadcast %998 : vector<2x1xf32> to vector<2x32xf32>
    %1000 = arith.mulf %711, %999 : vector<2x32xf32>
    %1001 = arith.addf %997, %1000 : vector<2x32xf32>
    %1002 = vector.extract_strided_slice %944 {offsets = [0, 14], sizes = [2, 1], strides = [1, 1]} : vector<2x20xf32> to vector<2x1xf32>
    %1003 = vector.broadcast %1002 : vector<2x1xf32> to vector<2x32xf32>
    %1004 = arith.mulf %730, %1003 : vector<2x32xf32>
    %1005 = arith.addf %1001, %1004 : vector<2x32xf32>
    %1006 = vector.extract_strided_slice %944 {offsets = [0, 15], sizes = [2, 1], strides = [1, 1]} : vector<2x20xf32> to vector<2x1xf32>
    %1007 = vector.broadcast %1006 : vector<2x1xf32> to vector<2x32xf32>
    %1008 = arith.mulf %749, %1007 : vector<2x32xf32>
    %1009 = arith.addf %1005, %1008 : vector<2x32xf32>
    %1010 = vector.extract_strided_slice %944 {offsets = [0, 16], sizes = [2, 1], strides = [1, 1]} : vector<2x20xf32> to vector<2x1xf32>
    %1011 = vector.broadcast %1010 : vector<2x1xf32> to vector<2x32xf32>
    %1012 = arith.mulf %768, %1011 : vector<2x32xf32>
    %1013 = arith.addf %1009, %1012 : vector<2x32xf32>
    %1014 = vector.extract_strided_slice %944 {offsets = [0, 17], sizes = [2, 1], strides = [1, 1]} : vector<2x20xf32> to vector<2x1xf32>
    %1015 = vector.broadcast %1014 : vector<2x1xf32> to vector<2x32xf32>
    %1016 = arith.mulf %787, %1015 : vector<2x32xf32>
    %1017 = arith.addf %1013, %1016 : vector<2x32xf32>
    %1018 = vector.extract_strided_slice %944 {offsets = [0, 18], sizes = [2, 1], strides = [1, 1]} : vector<2x20xf32> to vector<2x1xf32>
    %1019 = vector.broadcast %1018 : vector<2x1xf32> to vector<2x32xf32>
    %1020 = arith.mulf %806, %1019 : vector<2x32xf32>
    %1021 = arith.addf %1017, %1020 : vector<2x32xf32>
    %1022 = vector.extract_strided_slice %944 {offsets = [0, 19], sizes = [2, 1], strides = [1, 1]} : vector<2x20xf32> to vector<2x1xf32>
    %1023 = vector.broadcast %1022 : vector<2x1xf32> to vector<2x32xf32>
    %1024 = arith.mulf %825, %1023 : vector<2x32xf32>
    %1025 = arith.addf %1021, %1024 : vector<2x32xf32>
    %1026 = tpu.concatenate %464, %483, %502, %521, %540, %559, %578, %597, %616, %635, %654, %673, %692, %711, %730, %749 in 1 : vector<2x32xf32>, vector<2x32xf32>, vector<2x32xf32>, vector<2x32xf32>, vector<2x32xf32>, vector<2x32xf32>, vector<2x32xf32>, vector<2x32xf32>, vector<2x32xf32>, vector<2x32xf32>, vector<2x32xf32>, vector<2x32xf32>, vector<2x32xf32>, vector<2x32xf32>, vector<2x32xf32>, vector<2x32xf32> -> vector<2x512xf32>
    %1027 = tpu.concatenate %768, %787, %806, %825 in 1 : vector<2x32xf32>, vector<2x32xf32>, vector<2x32xf32>, vector<2x32xf32> -> vector<2x128xf32>
    %1028 = tpu.concatenate %1026, %1027 in 1 : vector<2x512xf32>, vector<2x128xf32> -> vector<2x640xf32>
    %1029 = tpu.concatenate %1025, %1028 in 1 : vector<2x32xf32>, vector<2x640xf32> -> vector<2x672xf32>
    %c0_129 = arith.constant 0 : index
    %c0_130 = arith.constant 0 : index
    %1030 = vector.load %arg9[%c0_129, %c0_130] : memref<672x128xf32, #tpu.memory_space<vmem>>, vector<672x128xf32>
    %cst_131 = arith.constant dense<0.000000e+00> : vector<2x128xf32>
    %1031 = tpu.matmul %1029, %1030, %cst_131 {dimension_numbers = #tpu.dot_dimension_numbers<[1], [0], [0], [1], [0, 0, 1, 1], [], []>} : vector<2x672xf32>, vector<672x128xf32>, vector<2x128xf32> -> vector<2x128xf32>
    %c0_132 = arith.constant 0 : index
    %c0_133 = arith.constant 0 : index
    %1032 = vector.load %arg10[%c0_132, %c0_133] : memref<1x128xf32, #tpu.memory_space<vmem>>, vector<1x128xf32>
    %1033 = vector.broadcast %1032 : vector<1x128xf32> to vector<2x128xf32>
    %1034 = arith.addf %1031, %1033 : vector<2x128xf32>
    %cst_134 = arith.constant 0.000000e+00 : f32
    %1035 = vector.broadcast %cst_134 : f32 to vector<2x128xf32>
    %1036 = arith.maximumf %1034, %1035 : vector<2x128xf32>
    %c0_135 = arith.constant 0 : index
    %c0_136 = arith.constant 0 : index
    %1037 = vector.load %arg11[%c0_135, %c0_136] : memref<128x1xf32, #tpu.memory_space<vmem>>, vector<128x1xf32>
    %cst_137 = arith.constant dense<0.000000e+00> : vector<2x1xf32>
    %1038 = tpu.matmul %1036, %1037, %cst_137 {dimension_numbers = #tpu.dot_dimension_numbers<[1], [0], [0], [1], [0, 0, 1, 1], [], []>} : vector<2x128xf32>, vector<128x1xf32>, vector<2x1xf32> -> vector<2x1xf32>
    %c0_138 = arith.constant 0 : index
    %c0_139 = arith.constant 0 : index
    %1039 = vector.load %arg12[%c0_138, %c0_139] : memref<1x1xf32, #tpu.memory_space<vmem>>, vector<1x1xf32>
    %1040 = vector.broadcast %1039 : vector<1x1xf32> to vector<2x1xf32>
    %1041 = arith.addf %1038, %1040 : vector<2x1xf32>
    %1042 = vector.shape_cast %1041 : vector<2x1xf32> to vector<2x1xf32>
    %1043 = vector.broadcast %1042 : vector<2x1xf32> to vector<2x128xf32>
    %c0_140 = arith.constant 0 : index
    %c0_141 = arith.constant 0 : index
    %1044 = vector.load %arg13[%c0_140, %c0_141] : memref<2x128xf32, #tpu.memory_space<vmem>>, vector<2x128xf32>
    tpu.vector_store %arg13[%c0_140, %c0_141], %1043 {strides = array<i32>} : memref<2x128xf32, #tpu.memory_space<vmem>>, vector<2x128xf32>,
    return
  }
}

</mosaic_0001>

<bundles_post_ra>
// kernel: mylstm_forward.1
= control target key start
LH: loop header
LB: loop body
LE: loop exit
PB: predicated region body
PF: predicated region fallthrough
CT: control target
= control target key end

     0   :  { %s5441_s0 = inlined_call_operand.vmem [shape: f32[2,20,16], index: 0, kind: input, shape index: {}]   ;;  %s5442_s1 = inlined_call_operand.vmem [shape: f32[16,128], index: 1, kind: input, shape index: {}]   ;;  %s5443_s2 = inlined_call_operand.vmem [shape: f32[32,128], index: 2, kind: input, shape index: {}]   ;;  %s5444_s3 = inlined_call_operand.vmem [shape: f32[1,128], index: 3, kind: input, shape index: {}]   ;;  %s5445_s4 = inlined_call_operand.vmem [shape: f32[32,128], index: 4, kind: input, shape index: {}]   ;;  %s5446_s5 = inlined_call_operand.vmem [shape: f32[32,128], index: 5, kind: input, shape index: {}]   ;;  %s5447_s6 = inlined_call_operand.vmem [shape: f32[1,128], index: 6, kind: input, shape index: {}]   ;;  %s5448_s7 = inlined_call_operand.vmem [shape: f32[32,32], index: 7, kind: input, shape index: {}]   ;;  %s5449_s8 = inlined_call_operand.vmem [shape: f32[1,32], index: 8, kind: input, shape index: {}]   ;;  %s5450_s9 = inlined_call_operand.hbm [shape: f32[672,128], index: 9, kind: input, shape index: {}]   ;;  %s5451_s10 = inlined_call_operand.vmem [shape: f32[1,128], index: 10, kind: input, shape index: {}]   ;;  %s5452_s11 = inlined_call_operand.vmem [shape: f32[128,1], index: 11, kind: input, shape index: {}]   ;;  %s5453_s12 = inlined_call_operand.<no memory space> [shape: f32[1,1], index: 12, kind: input, shape index: {}]   ;;  %s5454_s13 = inlined_call_operand.vmem [shape: f32[2,128], index: 13, kind: output, shape index: {}]  }
   0x1   :  { %v18_v0 = vstv %s5453_s12 }
   0x2   :  { %19 = vst [vmem:[#allocation2] sm:$0x1] %v18_v0 }
   0x3   :  { %20 = vsyncpa [#allocation4], 0  ;;  %s43_s29 = sshll.u32 %s5450_s9, 4  ;;  %s4320_s30 = smov [#allocation3]   ;;  %s44_s29 = int_to_ptr.hbm [resolvable:$true] %s43_s29 }
   0x4   :  { %s45_s14 = sshll.u32 %s4320_s30, 4  ;;  %s4321_s15 = smov 128   ;;  %s46_s14 = int_to_ptr.vmem [resolvable:$true] %s45_s14 }
   0x5   :  { %s4322_s16 = smov 8  }
   0x6   :  { %51 = dma.hbm_to_vmem [thread:$0]  %s44_s29, 10752, %s46_s14, [#allocation4], %s4321_s15, %s4321_s15, %s4322_s16  }
   0x7   :  { %4318 = dma.done.wait [#allocation4], 10752  }
   0x8   :  { %4319 = vsyncadd [#allocation4], 4294956544  ;;  %v81_v1 = vld [vmem:[%s5442_s1 + $0x8] sm:$0xff]  ;;  %v80_v2 = vld [vmem:[%s5442_s1] sm:$0xff]  ;;  %vm86_vm0 = vcmask 130048   ;;  %vm72_vm1 = vcmask 1043456  }
   0x9   :  { %114 = vmatpush.msra.mxu0 %v81_v1  ;;  %v62_v3 = vld [vmem:[%s5441_s0] sm:$0xff]  ;;  %v4436_v4 = vld [vmem:[%s5443_s2 + $0x18] sm:$0xff]  ;;  %v4443_v5 = vld [vmem:[%s5443_s2 + $0x10] sm:$0xff]  ;;  %v4323_v19 = vmov 0.0   ;;  %vm139_vm2 = vcmask 1040384   ;;  %s4325_s9 = smov 64  }
   0xa   :  { %226 = vmatpush.msra.mxu2 %v4436_v4  ;;  %497 = vmatpush.msra.mxu3 %v4436_v4  ;;  %v4450_v6 = vld [vmem:[%s5443_s2 + $0x8] sm:$0xff]  ;;  %v4461_v7 = vld [vmem:[%s5443_s2] sm:$0xff]  ;;  %v3770_v9 = vld [vmem:[%s5441_s0 + $0x18] sm:$0xff]  ;;  %vm141_vm7 = vcmask 261120   ;;  %s4340_s20 = smov 96  }
   0xb   :  { %115 = vmatpush.msra.mxu0 %v80_v2  ;;  %565 = vmatpush.msra.mxu1 %v4436_v4  ;;  %v63_v8 = vld [vmem:[%s5441_s0 + $0x8] sm:$0xff]  ;;  %v73_v10 = vrot.slane %v3770_v9, 4  ;;  %v64_v11 = vld [vmem:[%s5441_s0 + $0x10] sm:$0xf]  ;;  %v3771_v13 = vld [vmem:[%s5441_s0 + $0x20] sm:$0xff] }
   0xc   :  { %3773 = vmatmul.msk.f32.vlgmr.msra.gmra.mxu0 %vm86_vm0, %v62_v3  ;;  %227 = vmatpush.msra.mxu2 %v4443_v5  ;;  %v74_v14 = vrot.slane %v3771_v13, 4  ;;  %v3772_v16 = vld [vmem:[%s5441_s0 + $0x28] sm:$0xf]  ;;  %v3946_v21 = vld [vmem:[%s5444_s3] ss:$0 sm:$0xff]  ;;  %s4324_s3 = smov 32  }
   0xd   :  { %157 = vmatpush.msrb.mxu0 %v4436_v4  ;;  %498 = vmatpush.msra.mxu3 %v4443_v5  ;;  %v79_v12 = vsel %vm72_vm1, %v64_v11, %v73_v10  ;;  %v76_v17 = vrot.slane %v3772_v16, 4 }
   0xe   :  { %228 = vmatpush.msra.mxu2 %v4450_v6  ;;  %566 = vmatpush.msra.mxu1 %v4443_v5  ;;  %v75_v15 = vsel %vm72_vm1, %v73_v10, %v74_v14 }
   0xf   :  { %158 = vmatpush.msrb.mxu0 %v4443_v5  ;;  %499 = vmatpush.msra.mxu3 %v4450_v6  ;;  %v77_v18 = vsel %vm72_vm1, %v74_v14, %v76_v17 }
  0x10   :  { %229 = vmatpush.msra.mxu2 %v4461_v7  ;;  %567 = vmatpush.msra.mxu1 %v4450_v6 }
  0x11   :  { %159 = vmatpush.msrb.mxu0 %v4450_v6  ;;  %500 = vmatpush.msra.mxu3 %v4461_v7 }
  0x12   :  { %362 = vmatpush.msrb.mxu2 %v4436_v4  ;;  %568 = vmatpush.msra.mxu1 %v4461_v7 }
  0x13   :  { %160 = vmatpush.msrb.mxu0 %v4461_v7  ;;  %699 = vmatpush.msrb.mxu3 %v4436_v4 }
  0x14   :  { %363 = vmatpush.msrb.mxu2 %v4443_v5  ;;  %3774 = vmatmul.msk.f32.gmra.mxu0 %vm86_vm0, %v63_v8 }
  0x15   :  { %294 = vmatpush.msra.mxu0 %v4436_v4  ;;  %700 = vmatpush.msrb.mxu3 %v4443_v5 }
  0x16   :  { %364 = vmatpush.msrb.mxu2 %v4450_v6  ;;  %768 = vmatpush.msrb.mxu1 %v4436_v4 }
  0x17   :  { %295 = vmatpush.msra.mxu0 %v4443_v5  ;;  %701 = vmatpush.msrb.mxu3 %v4450_v6 }
  0x18   :  { %365 = vmatpush.msrb.mxu2 %v4461_v7  ;;  %769 = vmatpush.msrb.mxu1 %v4443_v5 }
  0x19   :  { %296 = vmatpush.msra.mxu0 %v4450_v6  ;;  %702 = vmatpush.msrb.mxu3 %v4461_v7 }
  0x1a   :  { %770 = vmatpush.msrb.mxu1 %v4450_v6 }
  0x1b   :  { %297 = vmatpush.msra.mxu0 %v4461_v7 }
  0x1c   :  { %3775 = vmatmul.msk.f32.gmra.mxu0 %vm86_vm0, %v79_v12  ;;  %771 = vmatpush.msrb.mxu1 %v4461_v7 }
  0x24   :  { %3776 = vmatmul.msk.f32.gmra.mxu0 %vm86_vm0, %v75_v15 }
  0x2c   :  { %3777 = vmatmul.msk.f32.gmra.mxu0 %vm86_vm0, %v77_v18 }
  0x34   :  { %161 = vmatmul.f32.vlgmr.msrb.gmra.mxu0 %v4323_v19 }
  0x35   :  { %1175 = vmatpush.msrb.mxu0 %v4436_v4 }
  0x37   :  { %1176 = vmatpush.msrb.mxu0 %v4443_v5 }
  0x39   :  { %1177 = vmatpush.msrb.mxu0 %v4450_v6 }
  0x3b   :  { %1178 = vmatpush.msrb.mxu0 %v4461_v7 }
  0x89   :  { %v117_v20 = vpop.f32.mrf.mxu0 }
  0x8a   :  { %v118_v24 = vadd.f32 %v3946_v21, %v117_v20 }
  0x8c   :  { %v204_v27 = vrot.slane %v118_v24, 1  ;;  %v272_v28 = vrot.slane %v118_v24, 2  ;;  %v340_v31 = vrot.slane %v118_v24, 3  ;;  %v408_v38 = vrot.slane %v118_v24, 4 }
  0x8d   :  { %v477_v39 = vrot.slane %v118_v24, 5  ;;  %v543_v40 = vrot.slane %v118_v24, 6  ;;  %v611_v41 = vrot.slane %v118_v24, 7 }
  0x91   :  { %v120_v22 = vpop.f32.mrf.mxu0 }
  0x92   :  { %v121_v23 = vadd.f32 %v3946_v21, %v120_v22 }
  0x94   :  { %v746_v42 = vrot.slane %v121_v23, 1  ;;  %v814_v43 = vrot.slane %v121_v23, 2  ;;  %v882_v44 = vrot.slane %v121_v23, 3  ;;  %v950_v62 = vrot.slane %v121_v23, 4 }
  0x95   :  { %v1019_v63 = vrot.slane %v121_v23, 5  ;;  %v1085_v0 = vrot.slane %v121_v23, 6  ;;  %v1153_v2 = vrot.slane %v121_v23, 7 }
  0x99   :  { %v123_v25 = vpop.f32.mrf.mxu0 }
  0x9a   :  { %v124_v26 = vadd.f32 %v3946_v21, %v123_v25 }
  0x9c   :  { %v206_v29 = vrot.slane %v124_v26, 4  ;;  %v274_v30 = vrot.slane %v124_v26, 5  ;;  %v342_v32 = vrot.slane %v124_v26, 6  ;;  %v137_v1 = vrot.slane %v124_v26, 3 }
  0x9d   :  { %v1287_v3 = vrot.slane %v124_v26, 1  ;;  %v1355_v8 = vrot.slane %v124_v26, 2 }
  0x9e   :  { %v4517_v33 = vsel %vm139_vm2, %v204_v27, %v206_v29  ;;  %v4520_v34 = vsel %vm139_vm2, %v272_v28, %v274_v30  ;;  %v4523_v35 = vsel %vm139_vm2, %v340_v31, %v342_v32  ;;  %v140_v27 = vsel %vm139_vm2, %v118_v24, %v137_v1 }
  0xa1   :  { %v126_v36 = vpop.f32.mrf.mxu0 }
  0xa2   :  { %v127_v37 = vadd.f32 %v3946_v21, %v126_v36 }
  0xa4   :  { %v411_v45 = vrot.slane %v127_v37, 7  ;;  %v4526_v46 = vsel %vm139_vm2, %v477_v39, %v127_v37  ;;  %v545_v47 = vrot.slane %v127_v37, 1  ;;  %v613_v48 = vrot.slane %v127_v37, 2 }
  0xa5   :  { %v679_v49 = vrot.slane %v127_v37, 3  ;;  %v748_v50 = vrot.slane %v127_v37, 4  ;;  %v816_v51 = vrot.slane %v127_v37, 5  ;;  %v884_v52 = vrot.slane %v127_v37, 6 }
  0xa6   :  { %v4529_v53 = vsel %vm139_vm2, %v408_v38, %v411_v45  ;;  %v4532_v54 = vsel %vm139_vm2, %v543_v40, %v545_v47  ;;  %v4535_v55 = vsel %vm139_vm2, %v611_v41, %v613_v48 }
  0xa7   :  { %v4538_v56 = vsel %vm139_vm2, %v121_v23, %v679_v49  ;;  %v4541_v57 = vsel %vm139_vm2, %v746_v42, %v748_v50  ;;  %v4544_v58 = vsel %vm139_vm2, %v814_v43, %v816_v51  ;;  %v4547_v59 = vsel %vm139_vm2, %v882_v44, %v884_v52 }
  0xa9   :  { %v129_v60 = vpop.f32.mrf.mxu0 }
  0xaa   :  { %v130_v61 = vadd.f32 %v3946_v21, %v129_v60 }
  0xac   :  { %v953_v9 = vrot.slane %v130_v61, 7  ;;  %v4550_v10 = vsel %vm139_vm2, %v1019_v63, %v130_v61  ;;  %v1087_v11 = vrot.slane %v130_v61, 1  ;;  %v1155_v12 = vrot.slane %v130_v61, 2 }
  0xad   :  { %v1221_v13 = vrot.slane %v130_v61, 3  ;;  %v1289_v14 = vrot.slane %v130_v61, 4  ;;  %v1357_v15 = vrot.slane %v130_v61, 5  ;;  %v1423_v16 = vrot.slane %v130_v61, 6 }
  0xae   :  { %v4553_v17 = vsel %vm139_vm2, %v950_v62, %v953_v9  ;;  %v4556_v18 = vsel %vm139_vm2, %v1085_v0, %v1087_v11  ;;  %v4559_v20 = vsel %vm139_vm2, %v1153_v2, %v1155_v12 }
  0xaf   :  { %v4562_v21 = vsel %vm139_vm2, %v124_v26, %v1221_v13  ;;  %v4565_v22 = vsel %vm139_vm2, %v1287_v3, %v1289_v14  ;;  %v4568_v23 = vsel %vm139_vm2, %v1355_v8, %v1357_v15  ;;  %v4571_v25 = vsel %vm139_vm2, %v137_v1, %v1423_v16 }
  0xb0   :  { %vm1513_vm2 = vcmask 1041408  }
  0xb1   :  { %v162_v28 = vpop.f32.mrf.mxu0 }
  0xb2   :  { %v165_v29 = vadd.f32 %v162_v28, %v140_v27 }
  0xb4   :  { %3951 = vtanh.f32 %v165_v29  ;;  %v3778_v26 = vmul.f32 -1.442695, %v165_v29 }
  0xb6   :  { %3953 = vpow2.f32 %v3778_v26 }
  0xba   :  { %v3952_v30 = vpop.eup %3951 }
  0xbb   :  { %188 = vrot.lane.b32.xlu0 %v3952_v30, %s4324_s3 }
  0xbc   :  { %v3954_v31 = vpop.eup %3953 }
  0xbd   :  { %v169_v32 = vadd.f32 1.0, %v3954_v31 }
  0xbf   :  { %3955 = vrcp.f32 %v169_v32  ;;  %v181_v41 = vand.u32 2147483648, %v169_v32  ;;  %vm175_vm4 = vweird.f32 %v169_v32  ;;  %v179_v24 = vand.u32 2147483647, %v169_v32 }
  0xc1   :  { %v182_v43 = vor.u32 1.1754944e-38, %v181_v41  ;;  %vm180_vm6 = vcmp.eq.f32.partialorder %v179_v24, 8.507059e+37 }
  0xc5   :  { %v3956_v36 = vpop.eup %3955 }
  0xc6   :  { %v171_v37 = vmul.f32 %v3956_v36, %v169_v32  ;;  %vm176_vm3 = vweird.f32 %v3956_v36 }
  0xc7   :  { %vm177_vm5 = vmor %vm175_vm4, %vm176_vm3 }
  0xc8   :  { %v172_v38 = vsub.f32 1.0, %v171_v37 }
  0xca   :  { %v173_v39 = vmul.f32 %v3956_v36, %v172_v38 }
  0xcc   :  { %v174_v40 = vadd.f32 %v3956_v36, %v173_v39 }
  0xce   :  { %v178_v42 = vsel %vm177_vm5, %v3956_v36, %v174_v40 }
  0xcf   :  { %v183_v45 = vsel %vm180_vm6, %v182_v43, %v178_v42 }
  0xd0   :  { %v186_v48 = vmul.f32 0.0, %v183_v45 }
 0x12d   :  { %v189_v44 = vpop.permute.xlu0 %188 }
 0x12e   :  { %v191_v47 = vmul.f32 %v189_v44, %v183_v45 }
 0x130   :  { %193 = vrot.lane.b32.xlu0 %v191_v47, %s4324_s3 }
 0x1a2   :  { %v194_v49 = vpop.permute.xlu0 %193 }
 0x1a3   :  { %v196_v50 = vadd.f32 %v194_v49, %v186_v48 }
 0x1a5   :  { %3957 = vtanh.f32 %v196_v50 }
 0x1ab   :  { %v3958_v51 = vpop.eup %3957 }
 0x1ac   :  { %199 = vrot.lane.b32.xlu1 %v3958_v51, %s4324_s3 }
 0x21e   :  { %v200_v52 = vpop.permute.xlu1 %199 }
 0x21f   :  { %v4577_v60 = vmul.f32 %v200_v52, %v183_v45 }
 0x221   :  { %210 = vrot.lane.b32.xlu1 %v4577_v60, %s4325_s9 }
 0x293   :  { %v211_v61 = vpop.permute.xlu1 %210 }
 0x294   :  { %3779 = vmatmul.msk.f32.vlgmr.msra.gmra.mxu2 %vm141_vm7, %v211_v61 }
 0x295   :  { %431 = vmatpush.msra.mxu2 %v4436_v4 }
 0x297   :  { %432 = vmatpush.msra.mxu2 %v4443_v5 }
 0x299   :  { %433 = vmatpush.msra.mxu2 %v4450_v6 }
 0x29b   :  { %434 = vmatpush.msra.mxu2 %v4461_v7 }
 0x317   :  { %v231_v62 = vpop.f32.mrf.mxu2 }
 0x318   :  { %v234_v63 = vadd.f32 %v231_v62, %v4517_v33 }
 0x31a   :  { %3959 = vtanh.f32 %v234_v63  ;;  %v3780_v1 = vmul.f32 -1.442695, %v234_v63 }
 0x31c   :  { %3961 = vpow2.f32 %v3780_v1 }
 0x320   :  { %v3960_v0 = vpop.eup %3959 }
 0x321   :  { %257 = vrot.lane.b32.xlu2 %v3960_v0, %s4324_s3 }
 0x322   :  { %v3962_v2 = vpop.eup %3961 }
 0x323   :  { %v238_v3 = vadd.f32 1.0, %v3962_v2 }
 0x325   :  { %3963 = vrcp.f32 %v238_v3  ;;  %v250_v14 = vand.u32 2147483648, %v238_v3  ;;  %vm244_vm9 = vweird.f32 %v238_v3  ;;  %v248_v15 = vand.u32 2147483647, %v238_v3 }
 0x327   :  { %v251_v16 = vor.u32 1.1754944e-38, %v250_v14  ;;  %vm249_vm11 = vcmp.eq.f32.partialorder %v248_v15, 8.507059e+37 }
 0x32b   :  { %v3964_v8 = vpop.eup %3963 }
 0x32c   :  { %v240_v9 = vmul.f32 %v3964_v8, %v238_v3  ;;  %vm245_vm8 = vweird.f32 %v3964_v8 }
 0x32d   :  { %vm246_vm10 = vmor %vm244_vm9, %vm245_vm8  ;;  %vm1516_vm8 = vcmask 1045504  }
 0x32e   :  { %v241_v11 = vsub.f32 1.0, %v240_v9 }
 0x330   :  { %v242_v12 = vmul.f32 %v3964_v8, %v241_v11 }
 0x332   :  { %v243_v13 = vadd.f32 %v3964_v8, %v242_v12 }
 0x334   :  { %v247_v33 = vsel %vm246_vm10, %v3964_v8, %v243_v13 }
 0x335   :  { %v252_v28 = vsel %vm249_vm11, %v251_v16, %v247_v33 }
 0x336   :  { %v255_v30 = vmul.f32 %v252_v28, %v196_v50 }
 0x37b   :  { %v258_v27 = vpop.permute.xlu2 %257 }
 0x37c   :  { %v260_v29 = vmul.f32 %v258_v27, %v252_v28 }
 0x37e   :  { %262 = vrot.lane.b32.xlu2 %v260_v29, %s4324_s3 }
 0x3d8   :  { %v263_v26 = vpop.permute.xlu2 %262 }
 0x3d9   :  { %v265_v31 = vadd.f32 %v263_v26, %v255_v30 }
 0x3db   :  { %3965 = vtanh.f32 %v265_v31 }
 0x3e1   :  { %v3966_v32 = vpop.eup %3965 }
 0x3e2   :  { %268 = vrot.lane.b32.xlu0 %v3966_v32, %s4324_s3 }
 0x454   :  { %v269_v36 = vpop.permute.xlu0 %268 }
 0x455   :  { %v271_v37 = vmul.f32 %v269_v36, %v252_v28 }
 0x457   :  { %278 = vrot.lane.b32.xlu1 %v271_v37, %s4325_s9  ;;  %v1489_v8 = vrot.slane %v271_v37, 6 }
 0x459   :  { %v1514_v13 = vsel %vm1513_vm2, %v4577_v60, %v1489_v8 }
 0x4c9   :  { %v279_v38 = vpop.permute.xlu1 %278 }
 0x4ca   :  { %3781 = vmatmul.msk.f32.vlgmr.msra.gmra.mxu0 %vm141_vm7, %v279_v38 }
 0x4cb   :  { %1443 = vmatpush.msra.mxu0 %v4436_v4 }
 0x4cd   :  { %1444 = vmatpush.msra.mxu0 %v4443_v5 }
 0x4cf   :  { %1445 = vmatpush.msra.mxu0 %v4450_v6 }
 0x4d1   :  { %1446 = vmatpush.msra.mxu0 %v4461_v7 }
 0x547   :  { %v299_v39 = vpop.f32.mrf.mxu0 }
 0x548   :  { %v302_v40 = vadd.f32 %v299_v39, %v4520_v34 }
 0x54a   :  { %3967 = vtanh.f32 %v302_v40  ;;  %v3782_v24 = vmul.f32 -1.442695, %v302_v40 }
 0x54c   :  { %3969 = vpow2.f32 %v3782_v24 }
 0x550   :  { %v3968_v41 = vpop.eup %3967 }
 0x551   :  { %325 = vrot.lane.b32.xlu2 %v3968_v41, %s4324_s3 }
 0x552   :  { %v3970_v42 = vpop.eup %3969 }
 0x553   :  { %v306_v43 = vadd.f32 1.0, %v3970_v42 }
 0x555   :  { %3971 = vrcp.f32 %v306_v43  ;;  %v318_v50 = vand.u32 2147483648, %v306_v43  ;;  %vm312_vm13 = vweird.f32 %v306_v43  ;;  %v316_v51 = vand.u32 2147483647, %v306_v43 }
 0x557   :  { %v319_v52 = vor.u32 1.1754944e-38, %v318_v50  ;;  %vm317_vm15 = vcmp.eq.f32.partialorder %v316_v51, 8.507059e+37 }
 0x55b   :  { %v3972_v44 = vpop.eup %3971 }
 0x55c   :  { %v308_v45 = vmul.f32 %v3972_v44, %v306_v43  ;;  %vm313_vm12 = vweird.f32 %v3972_v44 }
 0x55d   :  { %vm314_vm14 = vmor %vm312_vm13, %vm313_vm12 }
 0x55e   :  { %v309_v47 = vsub.f32 1.0, %v308_v45 }
 0x560   :  { %v310_v48 = vmul.f32 %v3972_v44, %v309_v47 }
 0x562   :  { %v311_v49 = vadd.f32 %v3972_v44, %v310_v48 }
 0x564   :  { %v315_v34 = vsel %vm314_vm14, %v3972_v44, %v311_v49 }
 0x565   :  { %v320_v62 = vsel %vm317_vm15, %v319_v52, %v315_v34 }
 0x566   :  { %v323_v0 = vmul.f32 %v320_v62, %v265_v31 }
 0x5ab   :  { %v326_v61 = vpop.permute.xlu2 %325 }
 0x5ac   :  { %v328_v63 = vmul.f32 %v326_v61, %v320_v62 }
 0x5ae   :  { %330 = vrot.lane.b32.xlu0 %v328_v63, %s4324_s3 }
 0x620   :  { %v331_v1 = vpop.permute.xlu0 %330 }
 0x621   :  { %v333_v2 = vadd.f32 %v331_v1, %v323_v0 }
 0x623   :  { %3973 = vtanh.f32 %v333_v2 }
 0x629   :  { %v3974_v3 = vpop.eup %3973 }
 0x62a   :  { %336 = vrot.lane.b32.xlu1 %v3974_v3, %s4324_s3 }
 0x69c   :  { %v337_v9 = vpop.permute.xlu1 %336 }
 0x69d   :  { %v339_v11 = vmul.f32 %v337_v9, %v320_v62 }
 0x69f   :  { %v1491_v12 = vrot.slane %v339_v11, 4  ;;  %346 = vrot.lane.b32.xlu2 %v339_v11, %s4325_s9 }
 0x6a1   :  { %v1515_v14 = vsel %vm72_vm1, %v1514_v13, %v1491_v12 }
 0x6f9   :  { %v347_v15 = vpop.permute.xlu2 %346 }
 0x6fa   :  { %3783 = vmatmul.msk.f32.vlgmr.msrb.gmra.mxu2 %vm141_vm7, %v347_v15 }
 0x6fb   :  { %633 = vmatpush.msrb.mxu2 %v4436_v4 }
 0x6fd   :  { %634 = vmatpush.msrb.mxu2 %v4443_v5 }
 0x6ff   :  { %635 = vmatpush.msrb.mxu2 %v4450_v6 }
 0x701   :  { %636 = vmatpush.msrb.mxu2 %v4461_v7 }
 0x77d   :  { %v367_v33 = vpop.f32.mrf.mxu2 }
 0x77e   :  { %v370_v16 = vadd.f32 %v367_v33, %v4523_v35 }
 0x780   :  { %3975 = vtanh.f32 %v370_v16  ;;  %v3784_v60 = vmul.f32 -1.442695, %v370_v16 }
 0x782   :  { %3977 = vpow2.f32 %v3784_v60 }
 0x786   :  { %v3976_v27 = vpop.eup %3975 }
 0x787   :  { %393 = vrot.lane.b32.xlu0 %v3976_v27, %s4324_s3 }
 0x788   :  { %v3978_v28 = vpop.eup %3977 }
 0x789   :  { %v374_v29 = vadd.f32 1.0, %v3978_v28 }
 0x78b   :  { %3979 = vrcp.f32 %v374_v29  ;;  %v386_v37 = vand.u32 2147483648, %v374_v29  ;;  %vm380_vm4 = vweird.f32 %v374_v29  ;;  %v384_v38 = vand.u32 2147483647, %v374_v29 }
 0x78d   :  { %v387_v39 = vor.u32 1.1754944e-38, %v386_v37  ;;  %vm385_vm6 = vcmp.eq.f32.partialorder %v384_v38, 8.507059e+37 }
 0x791   :  { %v3980_v30 = vpop.eup %3979 }
 0x792   :  { %v376_v26 = vmul.f32 %v3980_v30, %v374_v29  ;;  %vm381_vm3 = vweird.f32 %v3980_v30 }
 0x793   :  { %vm382_vm5 = vmor %vm380_vm4, %vm381_vm3 }
 0x794   :  { %v377_v31 = vsub.f32 1.0, %v376_v26 }
 0x796   :  { %v378_v32 = vmul.f32 %v3980_v30, %v377_v31 }
 0x798   :  { %v379_v36 = vadd.f32 %v3980_v30, %v378_v32 }
 0x79a   :  { %v383_v35 = vsel %vm382_vm5, %v3980_v30, %v379_v36 }
 0x79b   :  { %v388_v41 = vsel %vm385_vm6, %v387_v39, %v383_v35 }
 0x79c   :  { %v391_v42 = vmul.f32 %v388_v41, %v333_v2 }
 0x7f9   :  { %v394_v40 = vpop.permute.xlu0 %393 }
 0x7fa   :  { %v396_v24 = vmul.f32 %v394_v40, %v388_v41 }
 0x7fc   :  { %398 = vrot.lane.b32.xlu1 %v396_v24, %s4324_s3 }
 0x86e   :  { %v399_v43 = vpop.permute.xlu1 %398 }
 0x86f   :  { %v401_v44 = vadd.f32 %v399_v43, %v391_v42 }
 0x871   :  { %3981 = vtanh.f32 %v401_v44 }
 0x877   :  { %v3982_v45 = vpop.eup %3981 }
 0x878   :  { %404 = vrot.lane.b32.xlu2 %v3982_v45, %s4324_s3 }
 0x8d2   :  { %v405_v47 = vpop.permute.xlu2 %404 }
 0x8d3   :  { %v407_v48 = vmul.f32 %v405_v47, %v388_v41 }
 0x8d5   :  { %v1493_v49 = vrot.slane %v407_v48, 2  ;;  %415 = vrot.lane.b32.xlu0 %v407_v48, %s4325_s9 }
 0x8d7   :  { %v4615_v50 = vsel %vm1516_vm8, %v1515_v14, %v1493_v49 }
 0x947   :  { %v416_v51 = vpop.permute.xlu0 %415 }
 0x948   :  { %3785 = vmatmul.msk.f32.vlgmr.msra.gmra.mxu2 %vm141_vm7, %v416_v51 }
 0x949   :  { %836 = vmatpush.msra.mxu2 %v4436_v4 }
 0x94b   :  { %837 = vmatpush.msra.mxu2 %v4443_v5 }
 0x94d   :  { %838 = vmatpush.msra.mxu2 %v4450_v6 }
 0x94f   :  { %839 = vmatpush.msra.mxu2 %v4461_v7 }
 0x9cb   :  { %v436_v34 = vpop.f32.mrf.mxu2 }
 0x9cc   :  { %v439_v52 = vadd.f32 %v436_v34, %v4529_v53 }
 0x9ce   :  { %3983 = vtanh.f32 %v439_v52  ;;  %v3786_v62 = vmul.f32 -1.442695, %v439_v52 }
 0x9d0   :  { %3985 = vpow2.f32 %v3786_v62 }
 0x9d4   :  { %v3984_v61 = vpop.eup %3983 }
 0x9d5   :  { %462 = vrot.lane.b32.xlu1 %v3984_v61, %s4324_s3 }
 0x9d6   :  { %v3986_v63 = vpop.eup %3985 }
 0x9d7   :  { %v443_v0 = vadd.f32 1.0, %v3986_v63 }
 0x9d9   :  { %3987 = vrcp.f32 %v443_v0  ;;  %v455_v11 = vand.u32 2147483648, %v443_v0  ;;  %vm449_vm10 = vweird.f32 %v443_v0  ;;  %v453_v12 = vand.u32 2147483647, %v443_v0 }
 0x9db   :  { %v456_v13 = vor.u32 1.1754944e-38, %v455_v11  ;;  %vm454_vm12 = vcmp.eq.f32.partialorder %v453_v12, 8.507059e+37 }
 0x9df   :  { %v3988_v1 = vpop.eup %3987 }
 0x9e0   :  { %v445_v2 = vmul.f32 %v3988_v1, %v443_v0  ;;  %vm450_vm9 = vweird.f32 %v3988_v1 }
 0x9e1   :  { %vm451_vm11 = vmor %vm449_vm10, %vm450_vm9 }
 0x9e2   :  { %v446_v3 = vsub.f32 1.0, %v445_v2 }
 0x9e4   :  { %v447_v8 = vmul.f32 %v3988_v1, %v446_v3 }
 0x9e6   :  { %v448_v9 = vadd.f32 %v3988_v1, %v447_v8 }
 0x9e8   :  { %v452_v53 = vsel %vm451_vm11, %v3988_v1, %v448_v9 }
 0x9e9   :  { %v457_v15 = vsel %vm454_vm12, %v456_v13, %v452_v53 }
 0x9ea   :  { %v460_v16 = vmul.f32 %v457_v15, %v401_v44 }
 0xa47   :  { %v463_v14 = vpop.permute.xlu1 %462 }
 0xa48   :  { %v465_v33 = vmul.f32 %v463_v14, %v457_v15 }
 0xa4a   :  { %467 = vrot.lane.b32.xlu2 %v465_v33, %s4324_s3 }
 0xaa4   :  { %v468_v27 = vpop.permute.xlu2 %467 }
 0xaa5   :  { %v470_v60 = vadd.f32 %v468_v27, %v460_v16 }
 0xaa7   :  { %3989 = vtanh.f32 %v470_v60 }
 0xaad   :  { %v3990_v28 = vpop.eup %3989 }
 0xaae   :  { %473 = vrot.lane.b32.xlu0 %v3990_v28, %s4324_s3 }
 0xb20   :  { %v474_v29 = vpop.permute.xlu0 %473 }
 0xb21   :  { %v4626_v30 = vmul.f32 %v474_v29, %v457_v15 }
 0xb23   :  { %481 = vrot.lane.b32.xlu1 %v4626_v30, %s4325_s9 }
 0xb95   :  { %v482_v26 = vpop.permute.xlu1 %481 }
 0xb96   :  { %3787 = vmatmul.msk.f32.vlgmr.msra.gmra.mxu3 %vm141_vm7, %v482_v26 }
 0xb97   :  { %904 = vmatpush.msra.mxu3 %v4436_v4 }
 0xb99   :  { %905 = vmatpush.msra.mxu3 %v4443_v5 }
 0xb9b   :  { %906 = vmatpush.msra.mxu3 %v4450_v6 }
 0xb9d   :  { %907 = vmatpush.msra.mxu3 %v4461_v7 }
 0xc19   :  { %v502_v31 = vpop.f32.mrf.mxu3 }
 0xc1a   :  { %v505_v32 = vadd.f32 %v502_v31, %v4526_v46 }
 0xc1c   :  { %3991 = vtanh.f32 %v505_v32  ;;  %v3788_v37 = vmul.f32 -1.442695, %v505_v32 }
 0xc1e   :  { %3993 = vpow2.f32 %v3788_v37 }
 0xc22   :  { %v3992_v36 = vpop.eup %3991 }
 0xc23   :  { %528 = vrot.lane.b32.xlu2 %v3992_v36, %s4324_s3 }
 0xc24   :  { %v3994_v38 = vpop.eup %3993 }
 0xc25   :  { %v509_v35 = vadd.f32 1.0, %v3994_v38 }
 0xc27   :  { %3995 = vrcp.f32 %v509_v35  ;;  %v521_v43 = vand.u32 2147483648, %v509_v35  ;;  %vm515_vm14 = vweird.f32 %v509_v35  ;;  %v519_v44 = vand.u32 2147483647, %v509_v35 }
 0xc29   :  { %v522_v45 = vor.u32 1.1754944e-38, %v521_v43  ;;  %vm520_vm3 = vcmp.eq.f32.partialorder %v519_v44, 8.507059e+37 }
 0xc2d   :  { %v3996_v39 = vpop.eup %3995 }
 0xc2e   :  { %v511_v40 = vmul.f32 %v3996_v39, %v509_v35  ;;  %vm516_vm13 = vweird.f32 %v3996_v39 }
 0xc2f   :  { %vm517_vm15 = vmor %vm515_vm14, %vm516_vm13 }
 0xc30   :  { %v512_v41 = vsub.f32 1.0, %v511_v40 }
 0xc32   :  { %v513_v24 = vmul.f32 %v3996_v39, %v512_v41 }
 0xc34   :  { %v514_v42 = vadd.f32 %v3996_v39, %v513_v24 }
 0xc36   :  { %v518_v46 = vsel %vm517_vm15, %v3996_v39, %v514_v42 }
 0xc37   :  { %v523_v48 = vsel %vm520_vm3, %v522_v45, %v518_v46 }
 0xc38   :  { %v526_v51 = vmul.f32 %v523_v48, %v470_v60 }
 0xc7d   :  { %v529_v47 = vpop.permute.xlu2 %528 }
 0xc7e   :  { %v531_v49 = vmul.f32 %v529_v47, %v523_v48 }
 0xc80   :  { %533 = vrot.lane.b32.xlu0 %v531_v49, %s4324_s3 }
 0xcf2   :  { %v534_v34 = vpop.permute.xlu0 %533 }
 0xcf3   :  { %v536_v52 = vadd.f32 %v534_v34, %v526_v51 }
 0xcf5   :  { %3997 = vtanh.f32 %v536_v52 }
 0xcfb   :  { %v3998_v61 = vpop.eup %3997 }
 0xcfc   :  { %539 = vrot.lane.b32.xlu1 %v3998_v61, %s4324_s3 }
 0xd6e   :  { %v540_v62 = vpop.permute.xlu1 %539 }
 0xd6f   :  { %v542_v63 = vmul.f32 %v540_v62, %v523_v48 }
 0xd71   :  { %549 = vrot.lane.b32.xlu2 %v542_v63, %s4325_s9  ;;  %v1495_v37 = vrot.slane %v542_v63, 6 }
 0xd73   :  { %v1518_v40 = vsel %vm1513_vm2, %v4626_v30, %v1495_v37 }
 0xdcb   :  { %v550_v0 = vpop.permute.xlu2 %549 }
 0xdcc   :  { %3789 = vmatmul.msk.f32.vlgmr.msra.gmra.mxu1 %vm141_vm7, %v550_v0 }
 0xdcd   :  { %973 = vmatpush.msra.mxu1 %v4436_v4 }
 0xdcf   :  { %974 = vmatpush.msra.mxu1 %v4443_v5 }
 0xdd1   :  { %975 = vmatpush.msra.mxu1 %v4450_v6 }
 0xdd3   :  { %976 = vmatpush.msra.mxu1 %v4461_v7 }
 0xe49   :  { %v570_v1 = vpop.f32.mrf.mxu1 }
 0xe4a   :  { %v573_v2 = vadd.f32 %v570_v1, %v4532_v54 }
 0xe4c   :  { %3999 = vtanh.f32 %v573_v2  ;;  %v3790_v8 = vmul.f32 -1.442695, %v573_v2 }
 0xe4e   :  { %4001 = vpow2.f32 %v3790_v8 }
 0xe52   :  { %v4000_v3 = vpop.eup %3999 }
 0xe53   :  { %596 = vrot.lane.b32.xlu0 %v4000_v3, %s4324_s3 }
 0xe54   :  { %v4002_v9 = vpop.eup %4001 }
 0xe55   :  { %v577_v11 = vadd.f32 1.0, %v4002_v9 }
 0xe57   :  { %4003 = vrcp.f32 %v577_v11  ;;  %v589_v33 = vand.u32 2147483648, %v577_v11  ;;  %vm583_vm5 = vweird.f32 %v577_v11  ;;  %v587_v16 = vand.u32 2147483647, %v577_v11 }
 0xe59   :  { %v590_v27 = vor.u32 1.1754944e-38, %v589_v33  ;;  %vm588_vm9 = vcmp.eq.f32.partialorder %v587_v16, 8.507059e+37 }
 0xe5d   :  { %v4004_v12 = vpop.eup %4003 }
 0xe5e   :  { %v579_v53 = vmul.f32 %v4004_v12, %v577_v11  ;;  %vm584_vm4 = vweird.f32 %v4004_v12 }
 0xe5f   :  { %vm585_vm6 = vmor %vm583_vm5, %vm584_vm4 }
 0xe60   :  { %v580_v13 = vsub.f32 1.0, %v579_v53 }
 0xe62   :  { %v581_v14 = vmul.f32 %v4004_v12, %v580_v13 }
 0xe64   :  { %v582_v15 = vadd.f32 %v4004_v12, %v581_v14 }
 0xe66   :  { %v586_v54 = vsel %vm585_vm6, %v4004_v12, %v582_v15 }
 0xe67   :  { %v591_v28 = vsel %vm588_vm9, %v590_v27, %v586_v54 }
 0xe68   :  { %v594_v26 = vmul.f32 %v591_v28, %v536_v52 }
 0xec5   :  { %v597_v60 = vpop.permute.xlu0 %596 }
 0xec6   :  { %v599_v29 = vmul.f32 %v597_v60, %v591_v28 }
 0xec8   :  { %601 = vrot.lane.b32.xlu1 %v599_v29, %s4324_s3 }
 0xf3a   :  { %v602_v31 = vpop.permute.xlu1 %601 }
 0xf3b   :  { %v604_v32 = vadd.f32 %v602_v31, %v594_v26 }
 0xf3d   :  { %4005 = vtanh.f32 %v604_v32 }
 0xf43   :  { %v4006_v36 = vpop.eup %4005 }
 0xf44   :  { %607 = vrot.lane.b32.xlu2 %v4006_v36, %s4324_s3 }
 0xf9e   :  { %v608_v38 = vpop.permute.xlu2 %607 }
 0xf9f   :  { %v610_v35 = vmul.f32 %v608_v38, %v591_v28 }
 0xfa1   :  { %v1497_v39 = vrot.slane %v610_v35, 4  ;;  %617 = vrot.lane.b32.xlu0 %v610_v35, %s4325_s9 }
 0xfa3   :  { %v1519_v41 = vsel %vm72_vm1, %v1518_v40, %v1497_v39 }
0x1013   :  { %v618_v24 = vpop.permute.xlu0 %617 }
0x1014   :  { %3791 = vmatmul.msk.f32.vlgmr.msrb.gmra.mxu2 %vm141_vm7, %v618_v24 }
0x1015   :  { %1039 = vmatpush.msrb.mxu2 %v4436_v4 }
0x1017   :  { %1040 = vmatpush.msrb.mxu2 %v4443_v5 }
0x1019   :  { %1041 = vmatpush.msrb.mxu2 %v4450_v6 }
0x101b   :  { %1042 = vmatpush.msrb.mxu2 %v4461_v7 }
0x1097   :  { %v638_v42 = vpop.f32.mrf.mxu2 }
0x1098   :  { %v641_v43 = vadd.f32 %v638_v42, %v4535_v55 }
0x109a   :  { %4007 = vtanh.f32 %v641_v43  ;;  %v3792_v30 = vmul.f32 -1.442695, %v641_v43 }
0x109c   :  { %4009 = vpow2.f32 %v3792_v30  ;;  %v4689_v30 = vld [vmem:[%s5443_s2 + $0x10] sm:$0xff] }
0x10a0   :  { %v4008_v44 = vpop.eup %4007 }
0x10a1   :  { %664 = vrot.lane.b32.xlu1 %v4008_v44, %s4324_s3  ;;  %v4683_v44 = vld [vmem:[%s5443_s2 + $0x18] sm:$0xff] }
0x10a2   :  { %v4010_v46 = vpop.eup %4009 }
0x10a3   :  { %v645_v45 = vadd.f32 1.0, %v4010_v46  ;;  %v4695_v46 = vld [vmem:[%s5443_s2 + $0x8] sm:$0xff] }
0x10a5   :  { %4011 = vrcp.f32 %v645_v45  ;;  %v657_v52 = vand.u32 2147483648, %v645_v45  ;;  %vm651_vm11 = vweird.f32 %v645_v45  ;;  %v655_v61 = vand.u32 2147483647, %v645_v45 }
0x10a7   :  { %v658_v62 = vor.u32 1.1754944e-38, %v657_v52  ;;  %vm656_vm13 = vcmp.eq.f32.partialorder %v655_v61, 8.507059e+37 }
0x10ab   :  { %v4012_v47 = vpop.eup %4011 }
0x10ac   :  { %v647_v48 = vmul.f32 %v4012_v47, %v645_v45  ;;  %vm652_vm10 = vweird.f32 %v4012_v47 }
0x10ad   :  { %vm653_vm12 = vmor %vm651_vm11, %vm652_vm10 }
0x10ae   :  { %v648_v49 = vsub.f32 1.0, %v647_v48 }
0x10b0   :  { %v649_v51 = vmul.f32 %v4012_v47, %v648_v49 }
0x10b2   :  { %v650_v34 = vadd.f32 %v4012_v47, %v649_v51 }
0x10b4   :  { %v654_v55 = vsel %vm653_vm12, %v4012_v47, %v650_v34 }
0x10b5   :  { %v659_v0 = vsel %vm656_vm13, %v658_v62, %v654_v55 }
0x10b6   :  { %v662_v2 = vmul.f32 %v659_v0, %v604_v32 }
0x1113   :  { %v665_v63 = vpop.permute.xlu1 %664 }
0x1114   :  { %v667_v1 = vmul.f32 %v665_v63, %v659_v0 }
0x1116   :  { %669 = vrot.lane.b32.xlu2 %v667_v1, %s4324_s3 }
0x1170   :  { %v670_v3 = vpop.permute.xlu2 %669 }
0x1171   :  { %v672_v8 = vadd.f32 %v670_v3, %v662_v2 }
0x1173   :  { %4013 = vtanh.f32 %v672_v8 }
0x1179   :  { %v4014_v9 = vpop.eup %4013 }
0x117a   :  { %675 = vrot.lane.b32.xlu0 %v4014_v9, %s4324_s3 }
0x11ec   :  { %v676_v11 = vpop.permute.xlu0 %675 }
0x11ed   :  { %v678_v12 = vmul.f32 %v676_v11, %v659_v0 }
0x11ef   :  { %v1499_v53 = vrot.slane %v678_v12, 2  ;;  %683 = vrot.lane.b32.xlu1 %v678_v12, %s4325_s9 }
0x11f1   :  { %v4664_v13 = vsel %vm1516_vm8, %v1519_v41, %v1499_v53 }
0x1261   :  { %v684_v14 = vpop.permute.xlu1 %683 }
0x1262   :  { %3793 = vmatmul.msk.f32.vlgmr.msrb.gmra.mxu3 %vm141_vm7, %v684_v14 }
0x1263   :  { %1107 = vmatpush.msrb.mxu3 %v4436_v4 }
0x1265   :  { %1108 = vmatpush.msrb.mxu3 %v4443_v5 }
0x1267   :  { %1109 = vmatpush.msrb.mxu3 %v4450_v6 }
0x1269   :  { %1110 = vmatpush.msrb.mxu3 %v4461_v7 }
0x12e5   :  { %v704_v15 = vpop.f32.mrf.mxu3 }
0x12e6   :  { %v707_v33 = vadd.f32 %v704_v15, %v4538_v56 }
0x12e8   :  { %4015 = vtanh.f32 %v707_v33  ;;  %v3794_v54 = vmul.f32 -1.442695, %v707_v33 }
0x12ea   :  { %4017 = vpow2.f32 %v3794_v54 }
0x12ee   :  { %v4016_v16 = vpop.eup %4015 }
0x12ef   :  { %730 = vrot.lane.b32.xlu2 %v4016_v16, %s4324_s3  ;;  %v4288_v16 = vld [vmem:[%s5443_s2] sm:$0xff] }
0x12f0   :  { %v4018_v27 = vpop.eup %4017 }
0x12f1   :  { %v711_v60 = vadd.f32 1.0, %v4018_v27 }
0x12f3   :  { %4019 = vrcp.f32 %v711_v60  ;;  %v723_v6 = vand.u32 2147483648, %v711_v60  ;;  %vm717_vm15 = vweird.f32 %v711_v60  ;;  %v721_v31 = vand.u32 2147483647, %v711_v60 }
0x12f5   :  { %v724_v32 = vor.u32 1.1754944e-38, %v723_v6  ;;  %vm722_vm4 = vcmp.eq.f32.partialorder %v721_v31, 8.507059e+37 }
0x12f9   :  { %v4020_v28 = vpop.eup %4019 }
0x12fa   :  { %v713_v4 = vmul.f32 %v4020_v28, %v711_v60  ;;  %vm718_vm14 = vweird.f32 %v4020_v28 }
0x12fb   :  { %vm719_vm3 = vmor %vm717_vm15, %vm718_vm14 }
0x12fc   :  { %v714_v29 = vsub.f32 1.0, %v713_v4 }
0x12fe   :  { %v715_v5 = vmul.f32 %v4020_v28, %v714_v29 }
0x1300   :  { %v716_v26 = vadd.f32 %v4020_v28, %v715_v5 }
0x1302   :  { %v720_v56 = vsel %vm719_vm3, %v4020_v28, %v716_v26 }
0x1303   :  { %v725_v37 = vsel %vm722_vm4, %v724_v32, %v720_v56 }
0x1304   :  { %v728_v35 = vmul.f32 %v725_v37, %v672_v8 }
0x1349   :  { %v731_v36 = vpop.permute.xlu2 %730 }
0x134a   :  { %v733_v38 = vmul.f32 %v731_v36, %v725_v37 }
0x134c   :  { %735 = vrot.lane.b32.xlu0 %v733_v38, %s4324_s3 }
0x13be   :  { %v736_v39 = vpop.permute.xlu0 %735 }
0x13bf   :  { %v738_v40 = vadd.f32 %v736_v39, %v728_v35 }
0x13c1   :  { %4021 = vtanh.f32 %v738_v40 }
0x13c7   :  { %v4022_v41 = vpop.eup %4021 }
0x13c8   :  { %741 = vrot.lane.b32.xlu1 %v4022_v41, %s4324_s3 }
0x143a   :  { %v742_v24 = vpop.permute.xlu1 %741 }
0x143b   :  { %v4675_v42 = vmul.f32 %v742_v24, %v725_v37 }
0x143d   :  { %752 = vrot.lane.b32.xlu2 %v4675_v42, %s4325_s9 }
0x1497   :  { %v753_v43 = vpop.permute.xlu2 %752 }
0x1498   :  { %3795 = vmatmul.msk.f32.vlgmr.msrb.gmra.mxu1 %vm141_vm7, %v753_v43 }
0x1499   :  { %1241 = vmatpush.msrb.mxu1 %v4683_v44 }
0x149b   :  { %1242 = vmatpush.msrb.mxu1 %v4689_v30 }
0x149d   :  { %1243 = vmatpush.msrb.mxu1 %v4695_v46 }
0x149f   :  { %1244 = vmatpush.msrb.mxu1 %v4461_v7 }
0x1515   :  { %v773_v45 = vpop.f32.mrf.mxu1 }
0x1516   :  { %v776_v47 = vadd.f32 %v773_v45, %v4541_v57 }
0x1518   :  { %4023 = vtanh.f32 %v776_v47  ;;  %v3796_v49 = vmul.f32 -1.442695, %v776_v47 }
0x151a   :  { %4025 = vpow2.f32 %v3796_v49 }
0x151e   :  { %v4024_v48 = vpop.eup %4023 }
0x151f   :  { %799 = vrot.lane.b32.xlu0 %v4024_v48, %s4324_s3 }
0x1520   :  { %v4026_v51 = vpop.eup %4025 }
0x1521   :  { %v780_v34 = vadd.f32 1.0, %v4026_v51 }
0x1523   :  { %4027 = vrcp.f32 %v780_v34  ;;  %v792_v0 = vand.u32 2147483648, %v780_v34  ;;  %vm786_vm6 = vweird.f32 %v780_v34  ;;  %v790_v7 = vand.u32 2147483647, %v780_v34 }
0x1525   :  { %v793_v1 = vor.u32 1.1754944e-38, %v792_v0  ;;  %vm791_vm10 = vcmp.eq.f32.partialorder %v790_v7, 8.507059e+37 }
0x1529   :  { %v4028_v52 = vpop.eup %4027 }
0x152a   :  { %v782_v61 = vmul.f32 %v4028_v52, %v780_v34  ;;  %vm787_vm5 = vweird.f32 %v4028_v52 }
0x152b   :  { %vm788_vm9 = vmor %vm786_vm6, %vm787_vm5 }
0x152c   :  { %v783_v55 = vsub.f32 1.0, %v782_v61 }
0x152e   :  { %v784_v62 = vmul.f32 %v4028_v52, %v783_v55 }
0x1530   :  { %v785_v63 = vadd.f32 %v4028_v52, %v784_v62 }
0x1532   :  { %v789_v57 = vsel %vm788_vm9, %v4028_v52, %v785_v63 }
0x1533   :  { %v794_v3 = vsel %vm791_vm10, %v793_v1, %v789_v57 }
0x1534   :  { %v797_v9 = vmul.f32 %v794_v3, %v738_v40 }
0x1591   :  { %v800_v2 = vpop.permute.xlu0 %799 }
0x1592   :  { %v802_v8 = vmul.f32 %v800_v2, %v794_v3 }
0x1594   :  { %804 = vrot.lane.b32.xlu1 %v802_v8, %s4324_s3 }
0x1606   :  { %v805_v11 = vpop.permute.xlu1 %804 }
0x1607   :  { %v807_v12 = vadd.f32 %v805_v11, %v797_v9 }
0x1609   :  { %4029 = vtanh.f32 %v807_v12 }
0x160f   :  { %v4030_v53 = vpop.eup %4029 }
0x1610   :  { %810 = vrot.lane.b32.xlu2 %v4030_v53, %s4324_s3 }
0x166a   :  { %v811_v14 = vpop.permute.xlu2 %810 }
0x166b   :  { %v813_v15 = vmul.f32 %v811_v14, %v794_v3 }
0x166d   :  { %820 = vrot.lane.b32.xlu0 %v813_v15, %s4325_s9  ;;  %v1501_v45 = vrot.slane %v813_v15, 6 }
0x166f   :  { %v1521_v51 = vsel %vm1513_vm2, %v4675_v42, %v1501_v45 }
0x16df   :  { %v821_v33 = vpop.permute.xlu0 %820 }
0x16e0   :  { %3797 = vmatmul.msk.f32.vlgmr.msra.gmra.mxu2 %vm141_vm7, %v821_v33 }
0x16e1   :  { %1309 = vmatpush.msra.mxu2 %v4683_v44 }
0x16e3   :  { %1310 = vmatpush.msra.mxu2 %v4689_v30 }
0x16e5   :  { %1311 = vmatpush.msra.mxu2 %v4695_v46 }
0x16e7   :  { %1312 = vmatpush.msra.mxu2 %v4288_v16 }
0x1763   :  { %v841_v54 = vpop.f32.mrf.mxu2 }
0x1764   :  { %v844_v27 = vadd.f32 %v841_v54, %v4544_v58 }
0x1766   :  { %4031 = vtanh.f32 %v844_v27  ;;  %v3798_v28 = vmul.f32 -1.442695, %v844_v27 }
0x1768   :  { %4033 = vpow2.f32 %v3798_v28 }
0x176c   :  { %v4032_v60 = vpop.eup %4031 }
0x176d   :  { %867 = vrot.lane.b32.xlu1 %v4032_v60, %s4324_s3 }
0x176e   :  { %v4034_v4 = vpop.eup %4033 }
0x176f   :  { %v848_v29 = vadd.f32 1.0, %v4034_v4 }
0x1771   :  { %4035 = vrcp.f32 %v848_v29  ;;  %v860_v32 = vand.u32 2147483648, %v848_v29  ;;  %vm854_vm12 = vweird.f32 %v848_v29  ;;  %v858_v36 = vand.u32 2147483647, %v848_v29 }
0x1773   :  { %v861_v37 = vor.u32 1.1754944e-38, %v860_v32  ;;  %vm859_vm14 = vcmp.eq.f32.partialorder %v858_v36, 8.507059e+37 }
0x1777   :  { %v4036_v5 = vpop.eup %4035 }
0x1778   :  { %v850_v26 = vmul.f32 %v4036_v5, %v848_v29  ;;  %vm855_vm11 = vweird.f32 %v4036_v5 }
0x1779   :  { %vm856_vm13 = vmor %vm854_vm12, %vm855_vm11 }
0x177a   :  { %v851_v6 = vsub.f32 1.0, %v850_v26 }
0x177c   :  { %v852_v31 = vmul.f32 %v4036_v5, %v851_v6 }
0x177e   :  { %v853_v56 = vadd.f32 %v4036_v5, %v852_v31 }
0x1780   :  { %v857_v58 = vsel %vm856_vm13, %v4036_v5, %v853_v56 }
0x1781   :  { %v862_v35 = vsel %vm859_vm14, %v861_v37, %v857_v58 }
0x1782   :  { %v865_v40 = vmul.f32 %v862_v35, %v807_v12 }
0x17df   :  { %v868_v38 = vpop.permute.xlu1 %867 }
0x17e0   :  { %v870_v39 = vmul.f32 %v868_v38, %v862_v35 }
0x17e2   :  { %872 = vrot.lane.b32.xlu2 %v870_v39, %s4324_s3 }
0x183c   :  { %v873_v41 = vpop.permute.xlu2 %872 }
0x183d   :  { %v875_v24 = vadd.f32 %v873_v41, %v865_v40 }
0x183f   :  { %4037 = vtanh.f32 %v875_v24 }
0x1845   :  { %v4038_v43 = vpop.eup %4037 }
0x1846   :  { %878 = vrot.lane.b32.xlu0 %v4038_v43, %s4324_s3 }
0x18b8   :  { %v879_v47 = vpop.permute.xlu0 %878 }
0x18b9   :  { %v881_v48 = vmul.f32 %v879_v47, %v862_v35 }
0x18bb   :  { %v1503_v49 = vrot.slane %v881_v48, 4  ;;  %888 = vrot.lane.b32.xlu1 %v881_v48, %s4325_s9 }
0x18bd   :  { %v1522_v34 = vsel %vm72_vm1, %v1521_v51, %v1503_v49 }
0x192d   :  { %v889_v52 = vpop.permute.xlu1 %888 }
0x192e   :  { %3799 = vmatmul.msk.f32.vlgmr.msra.gmra.mxu3 %vm141_vm7, %v889_v52 }
0x192f   :  { %1377 = vmatpush.msra.mxu3 %v4683_v44 }
0x1931   :  { %1378 = vmatpush.msra.mxu3 %v4689_v30 }
0x1933   :  { %1379 = vmatpush.msra.mxu3 %v4695_v46 }
0x1935   :  { %1380 = vmatpush.msra.mxu3 %v4288_v16 }
0x19b1   :  { %v909_v61 = vpop.f32.mrf.mxu3 }
0x19b2   :  { %v912_v55 = vadd.f32 %v909_v61, %v4547_v59 }
0x19b4   :  { %4039 = vtanh.f32 %v912_v55  ;;  %v3800_v42 = vmul.f32 -1.442695, %v912_v55 }
0x19b6   :  { %4041 = vpow2.f32 %v3800_v42 }
0x19ba   :  { %v4040_v62 = vpop.eup %4039 }
0x19bb   :  { %935 = vrot.lane.b32.xlu2 %v4040_v62, %s4324_s3 }
0x19bc   :  { %v4042_v63 = vpop.eup %4041 }
0x19bd   :  { %v916_v0 = vadd.f32 1.0, %v4042_v63 }
0x19bf   :  { %4043 = vrcp.f32 %v916_v0  ;;  %v928_v46 = vand.u32 2147483648, %v916_v0  ;;  %vm922_vm3 = vweird.f32 %v916_v0  ;;  %v926_v2 = vand.u32 2147483647, %v916_v0 }
0x19c1   :  { %v929_v3 = vor.u32 1.1754944e-38, %v928_v46  ;;  %vm927_vm5 = vcmp.eq.f32.partialorder %v926_v2, 8.507059e+37 }
0x19c5   :  { %v4044_v7 = vpop.eup %4043 }
0x19c6   :  { %v918_v57 = vmul.f32 %v4044_v7, %v916_v0  ;;  %vm923_vm15 = vweird.f32 %v4044_v7 }
0x19c7   :  { %vm924_vm4 = vmor %vm922_vm3, %vm923_vm15 }
0x19c8   :  { %v919_v44 = vsub.f32 1.0, %v918_v57 }
0x19ca   :  { %v920_v1 = vmul.f32 %v4044_v7, %v919_v44 }
0x19cc   :  { %v921_v30 = vadd.f32 %v4044_v7, %v920_v1 }
0x19ce   :  { %v925_v59 = vsel %vm924_vm4, %v4044_v7, %v921_v30 }
0x19cf   :  { %v930_v9 = vsel %vm927_vm5, %v929_v3, %v925_v59 }
0x19d0   :  { %v933_v12 = vmul.f32 %v930_v9, %v875_v24 }
0x1a15   :  { %v936_v8 = vpop.permute.xlu2 %935 }
0x1a16   :  { %v938_v11 = vmul.f32 %v936_v8, %v930_v9 }
0x1a18   :  { %940 = vrot.lane.b32.xlu0 %v938_v11, %s4324_s3 }
0x1a8a   :  { %v941_v53 = vpop.permute.xlu0 %940 }
0x1a8b   :  { %v943_v14 = vadd.f32 %v941_v53, %v933_v12 }
0x1a8d   :  { %4045 = vtanh.f32 %v943_v14 }
0x1a93   :  { %v4046_v15 = vpop.eup %4045 }
0x1a94   :  { %946 = vrot.lane.b32.xlu1 %v4046_v15, %s4324_s3 }
0x1b06   :  { %v947_v33 = vpop.permute.xlu1 %946 }
0x1b07   :  { %v949_v16 = vmul.f32 %v947_v33, %v930_v9 }
0x1b09   :  { %v1505_v54 = vrot.slane %v949_v16, 2  ;;  %957 = vrot.lane.b32.xlu2 %v949_v16, %s4325_s9 }
0x1b0b   :  { %v4729_v27 = vsel %vm1516_vm8, %v1522_v34, %v1505_v54 }
0x1b63   :  { %v958_v60 = vpop.permute.xlu2 %957 }
0x1b64   :  { %3801 = vmatmul.msk.f32.vlgmr.msra.gmra.mxu1 %vm141_vm7, %v958_v60 }
0x1be1   :  { %v978_v28 = vpop.f32.mrf.mxu1 }
0x1be2   :  { %v981_v4 = vadd.f32 %v978_v28, %v4553_v17 }
0x1be4   :  { %4047 = vtanh.f32 %v981_v4  ;;  %v3802_v5 = vmul.f32 -1.442695, %v981_v4 }
0x1be6   :  { %4049 = vpow2.f32 %v3802_v5 }
0x1bea   :  { %v4048_v29 = vpop.eup %4047 }
0x1beb   :  { %1004 = vrot.lane.b32.xlu0 %v4048_v29, %s4324_s3 }
0x1bec   :  { %v4050_v26 = vpop.eup %4049 }
0x1bed   :  { %v985_v6 = vadd.f32 1.0, %v4050_v26 }
0x1bef   :  { %4051 = vrcp.f32 %v985_v6  ;;  %v997_v37 = vand.u32 2147483648, %v985_v6  ;;  %vm991_vm9 = vweird.f32 %v985_v6  ;;  %v995_v38 = vand.u32 2147483647, %v985_v6 }
0x1bf1   :  { %v998_v35 = vor.u32 1.1754944e-38, %v997_v37  ;;  %vm996_vm11 = vcmp.eq.f32.partialorder %v995_v38, 8.507059e+37 }
0x1bf5   :  { %v4052_v31 = vpop.eup %4051 }
0x1bf6   :  { %v987_v56 = vmul.f32 %v4052_v31, %v985_v6  ;;  %vm992_vm6 = vweird.f32 %v4052_v31 }
0x1bf7   :  { %vm993_vm10 = vmor %vm991_vm9, %vm992_vm6 }
0x1bf8   :  { %v988_v32 = vsub.f32 1.0, %v987_v56 }
0x1bfa   :  { %v989_v36 = vmul.f32 %v4052_v31, %v988_v32 }
0x1bfc   :  { %v990_v58 = vadd.f32 %v4052_v31, %v989_v36 }
0x1bfe   :  { %v994_v17 = vsel %vm993_vm10, %v4052_v31, %v990_v58 }
0x1bff   :  { %v999_v40 = vsel %vm996_vm11, %v998_v35, %v994_v17 }
0x1c00   :  { %v1002_v24 = vmul.f32 %v999_v40, %v943_v14 }
0x1c5d   :  { %v1005_v39 = vpop.permute.xlu0 %1004 }
0x1c5e   :  { %v1007_v41 = vmul.f32 %v1005_v39, %v999_v40 }
0x1c60   :  { %1009 = vrot.lane.b32.xlu1 %v1007_v41, %s4324_s3 }
0x1cd2   :  { %v1010_v43 = vpop.permute.xlu1 %1009 }
0x1cd3   :  { %v1012_v45 = vadd.f32 %v1010_v43, %v1002_v24 }
0x1cd5   :  { %4053 = vtanh.f32 %v1012_v45 }
0x1cdb   :  { %v4054_v47 = vpop.eup %4053 }
0x1cdc   :  { %1015 = vrot.lane.b32.xlu2 %v4054_v47, %s4324_s3 }
0x1d36   :  { %v1016_v48 = vpop.permute.xlu2 %1015 }
0x1d37   :  { %v4736_v49 = vmul.f32 %v1016_v48, %v999_v40 }
0x1d39   :  { %1023 = vrot.lane.b32.xlu0 %v4736_v49, %s4325_s9 }
0x1dab   :  { %v1024_v51 = vpop.permute.xlu0 %1023 }
0x1dac   :  { %3803 = vmatmul.msk.f32.vlgmr.msrb.gmra.mxu2 %vm141_vm7, %v1024_v51 }
0x1e2f   :  { %v1044_v34 = vpop.f32.mrf.mxu2 }
0x1e30   :  { %v1047_v52 = vadd.f32 %v1044_v34, %v4550_v10 }
0x1e32   :  { %4055 = vtanh.f32 %v1047_v52  ;;  %v3804_v55 = vmul.f32 -1.442695, %v1047_v52 }
0x1e34   :  { %4057 = vpow2.f32 %v3804_v55 }
0x1e38   :  { %v4056_v61 = vpop.eup %4055 }
0x1e39   :  { %1070 = vrot.lane.b32.xlu1 %v4056_v61, %s4324_s3 }
0x1e3a   :  { %v4058_v62 = vpop.eup %4057 }
0x1e3b   :  { %v1051_v42 = vadd.f32 1.0, %v4058_v62 }
0x1e3d   :  { %4059 = vrcp.f32 %v1051_v42  ;;  %v1063_v1 = vand.u32 2147483648, %v1051_v42  ;;  %vm1057_vm13 = vweird.f32 %v1051_v42  ;;  %v1061_v30 = vand.u32 2147483647, %v1051_v42 }
0x1e3f   :  { %v1064_v46 = vor.u32 1.1754944e-38, %v1063_v1  ;;  %vm1062_vm15 = vcmp.eq.f32.partialorder %v1061_v30, 8.507059e+37 }
0x1e43   :  { %v4060_v63 = vpop.eup %4059 }
0x1e44   :  { %v1053_v0 = vmul.f32 %v4060_v63, %v1051_v42  ;;  %vm1058_vm12 = vweird.f32 %v4060_v63 }
0x1e45   :  { %vm1059_vm14 = vmor %vm1057_vm13, %vm1058_vm12 }
0x1e46   :  { %v1054_v7 = vsub.f32 1.0, %v1053_v0 }
0x1e48   :  { %v1055_v57 = vmul.f32 %v4060_v63, %v1054_v7 }
0x1e4a   :  { %v1056_v44 = vadd.f32 %v4060_v63, %v1055_v57 }
0x1e4c   :  { %v1060_v10 = vsel %vm1059_vm14, %v4060_v63, %v1056_v44 }
0x1e4d   :  { %v1065_v59 = vsel %vm1062_vm15, %v1064_v46, %v1060_v10 }
0x1e4e   :  { %v1068_v8 = vmul.f32 %v1065_v59, %v1012_v45 }
0x1eab   :  { %v1071_v2 = vpop.permute.xlu1 %1070 }
0x1eac   :  { %v1073_v3 = vmul.f32 %v1071_v2, %v1065_v59 }
0x1eae   :  { %1075 = vrot.lane.b32.xlu2 %v1073_v3, %s4324_s3 }
0x1f08   :  { %v1076_v9 = vpop.permute.xlu2 %1075 }
0x1f09   :  { %v1078_v11 = vadd.f32 %v1076_v9, %v1068_v8 }
0x1f0b   :  { %4061 = vtanh.f32 %v1078_v11 }
0x1f11   :  { %v4062_v12 = vpop.eup %4061 }
0x1f12   :  { %1081 = vrot.lane.b32.xlu0 %v4062_v12, %s4324_s3 }
0x1f84   :  { %v1082_v53 = vpop.permute.xlu0 %1081 }
0x1f85   :  { %v1084_v14 = vmul.f32 %v1082_v53, %v1065_v59 }
0x1f87   :  { %1091 = vrot.lane.b32.xlu1 %v1084_v14, %s4325_s9  ;;  %v1507_v41 = vrot.slane %v1084_v14, 6 }
0x1f89   :  { %v1524_v47 = vsel %vm1513_vm2, %v4736_v49, %v1507_v41 }
0x1ff9   :  { %v1092_v15 = vpop.permute.xlu1 %1091 }
0x1ffa   :  { %3805 = vmatmul.msk.f32.vlgmr.msrb.gmra.mxu3 %vm141_vm7, %v1092_v15 }
0x207d   :  { %v1112_v33 = vpop.f32.mrf.mxu3 }
0x207e   :  { %v1115_v16 = vadd.f32 %v1112_v33, %v4556_v18 }
0x2080   :  { %4063 = vtanh.f32 %v1115_v16  ;;  %v3806_v60 = vmul.f32 -1.442695, %v1115_v16 }
0x2082   :  { %4065 = vpow2.f32 %v3806_v60 }
0x2086   :  { %v4064_v54 = vpop.eup %4063 }
0x2087   :  { %1138 = vrot.lane.b32.xlu2 %v4064_v54, %s4324_s3 }
0x2088   :  { %v4066_v28 = vpop.eup %4065 }
0x2089   :  { %v1119_v4 = vadd.f32 1.0, %v4066_v28 }
0x208b   :  { %4067 = vrcp.f32 %v1119_v4  ;;  %v1131_v56 = vand.u32 2147483648, %v1119_v4  ;;  %vm1125_vm4 = vweird.f32 %v1119_v4  ;;  %v1129_v32 = vand.u32 2147483647, %v1119_v4 }
0x208d   :  { %v1132_v36 = vor.u32 1.1754944e-38, %v1131_v56  ;;  %vm1130_vm6 = vcmp.eq.f32.partialorder %v1129_v32, 8.507059e+37 }
0x2091   :  { %v4068_v29 = vpop.eup %4067 }
0x2092   :  { %v1121_v5 = vmul.f32 %v4068_v29, %v1119_v4  ;;  %vm1126_vm3 = vweird.f32 %v4068_v29 }
0x2093   :  { %vm1127_vm5 = vmor %vm1125_vm4, %vm1126_vm3 }
0x2094   :  { %v1122_v26 = vsub.f32 1.0, %v1121_v5 }
0x2096   :  { %v1123_v6 = vmul.f32 %v4068_v29, %v1122_v26 }
0x2098   :  { %v1124_v31 = vadd.f32 %v4068_v29, %v1123_v6 }
0x209a   :  { %v1128_v18 = vsel %vm1127_vm5, %v4068_v29, %v1124_v31 }
0x209b   :  { %v1133_v37 = vsel %vm1130_vm6, %v1132_v36, %v1128_v18 }
0x209c   :  { %v1136_v17 = vmul.f32 %v1133_v37, %v1078_v11 }
0x20e1   :  { %v1139_v58 = vpop.permute.xlu2 %1138 }
0x20e2   :  { %v1141_v38 = vmul.f32 %v1139_v58, %v1133_v37 }
0x20e4   :  { %1143 = vrot.lane.b32.xlu0 %v1141_v38, %s4324_s3  ;;  %v1540_v38 = vld [vmem:[%s5445_s4 + $0x18] sm:$0xff] }
0x20e5   :  { %1582 = vmatpush.msra.mxu1 %v1540_v38 }
0x2156   :  { %v1144_v35 = vpop.permute.xlu0 %1143 }
0x2157   :  { %v1146_v39 = vadd.f32 %v1144_v35, %v1136_v17  ;;  %v1539_v17 = vld [vmem:[%s5445_s4 + $0x10] sm:$0xff]  ;;  %v1538_v35 = vld [vmem:[%s5445_s4 + $0x8] sm:$0xff] }
0x2158   :  { %1583 = vmatpush.msra.mxu1 %v1539_v17 }
0x2159   :  { %4069 = vtanh.f32 %v1146_v39 }
0x215a   :  { %1584 = vmatpush.msra.mxu1 %v1538_v35 }
0x215f   :  { %v4070_v40 = vpop.eup %4069 }
0x2160   :  { %1149 = vrot.lane.b32.xlu1 %v4070_v40, %s4324_s3 }
0x21d2   :  { %v1150_v24 = vpop.permute.xlu1 %1149 }
0x21d3   :  { %v1152_v43 = vmul.f32 %v1150_v24, %v1133_v37 }
0x21d5   :  { %v1509_v45 = vrot.slane %v1152_v43, 4  ;;  %1159 = vrot.lane.b32.xlu2 %v1152_v43, %s4325_s9 }
0x21d7   :  { %v1525_v48 = vsel %vm72_vm1, %v1524_v47, %v1509_v45 }
0x222f   :  { %v1160_v51 = vpop.permute.xlu2 %1159 }
0x2230   :  { %3807 = vmatmul.msk.f32.vlgmr.msrb.gmra.mxu0 %vm141_vm7, %v1160_v51  ;;  %v4799_v51 = vld [vmem:[%s5446_s5 + $0x10] sm:$0xff] }
0x22ad   :  { %v1180_v34 = vpop.f32.mrf.mxu0 }
0x22ae   :  { %v1183_v52 = vadd.f32 %v1180_v34, %v4559_v20  ;;  %v4806_v34 = vld [vmem:[%s5446_s5 + $0x8] sm:$0xff] }
0x22b0   :  { %4071 = vtanh.f32 %v1183_v52  ;;  %v3808_v55 = vmul.f32 -1.442695, %v1183_v52  ;;  %v4815_v52 = vld [vmem:[%s5446_s5] sm:$0xff] }
0x22b2   :  { %4073 = vpow2.f32 %v3808_v55 }
0x22b6   :  { %v4072_v61 = vpop.eup %4071 }
0x22b7   :  { %1206 = vrot.lane.b32.xlu0 %v4072_v61, %s4324_s3 }
0x22b8   :  { %v4074_v62 = vpop.eup %4073 }
0x22b9   :  { %v1187_v42 = vadd.f32 1.0, %v4074_v62 }
0x22bb   :  { %4075 = vrcp.f32 %v1187_v42  ;;  %v1199_v44 = vand.u32 2147483648, %v1187_v42  ;;  %vm1193_vm10 = vweird.f32 %v1187_v42  ;;  %v1197_v1 = vand.u32 2147483647, %v1187_v42 }
0x22bd   :  { %v1200_v30 = vor.u32 1.1754944e-38, %v1199_v44  ;;  %vm1198_vm12 = vcmp.eq.f32.partialorder %v1197_v1, 8.507059e+37 }
0x22c1   :  { %v4076_v63 = vpop.eup %4075 }
0x22c2   :  { %v1189_v0 = vmul.f32 %v4076_v63, %v1187_v42  ;;  %vm1194_vm9 = vweird.f32 %v4076_v63  ;;  %v4845_v42 = vld [vmem:[%s5447_s6] ss:$0 sm:$0xff] }
0x22c3   :  { %vm1195_vm11 = vmor %vm1193_vm10, %vm1194_vm9 }
0x22c4   :  { %v1190_v49 = vsub.f32 1.0, %v1189_v0 }
0x22c6   :  { %v1191_v7 = vmul.f32 %v4076_v63, %v1190_v49 }
0x22c8   :  { %v1192_v57 = vadd.f32 %v4076_v63, %v1191_v7 }
0x22ca   :  { %v1196_v20 = vsel %vm1195_vm11, %v4076_v63, %v1192_v57 }
0x22cb   :  { %v1201_v46 = vsel %vm1198_vm12, %v1200_v30, %v1196_v20 }
0x22cc   :  { %v1204_v59 = vmul.f32 %v1201_v46, %v1146_v39  ;;  %v1537_v39 = vld [vmem:[%s5445_s4] sm:$0xff] }
0x22cd   :  { %1585 = vmatpush.msra.mxu1 %v1537_v39 }
0x2329   :  { %v1207_v10 = vpop.permute.xlu0 %1206 }
0x232a   :  { %v1209_v2 = vmul.f32 %v1207_v10, %v1201_v46 }
0x232c   :  { %1211 = vrot.lane.b32.xlu1 %v1209_v2, %s4324_s3 }
0x239e   :  { %v1212_v3 = vpop.permute.xlu1 %1211 }
0x239f   :  { %v1214_v8 = vadd.f32 %v1212_v3, %v1204_v59 }
0x23a1   :  { %4077 = vtanh.f32 %v1214_v8 }
0x23a7   :  { %v4078_v9 = vpop.eup %4077 }
0x23a8   :  { %1217 = vrot.lane.b32.xlu2 %v4078_v9, %s4324_s3 }
0x2402   :  { %v1218_v11 = vpop.permute.xlu2 %1217 }
0x2403   :  { %v1220_v12 = vmul.f32 %v1218_v11, %v1201_v46 }
0x2405   :  { %v1511_v53 = vrot.slane %v1220_v12, 2  ;;  %1225 = vrot.lane.b32.xlu0 %v1220_v12, %s4325_s9 }
0x2407   :  { %v4762_v14 = vsel %vm1516_vm8, %v1525_v48, %v1511_v53  ;;  %v4794_v48 = vld [vmem:[%s5446_s5 + $0x18] sm:$0xff] }
0x2408   :  { %1618 = vmatpush.msrb.mxu2 %v4794_v48  ;;  %1681 = vmatpush.msrb.mxu3 %v4794_v48 }
0x2409   :  { %1751 = vmatpush.msrb.mxu0 %v4794_v48 }
0x240a   :  { %1619 = vmatpush.msrb.mxu2 %v4799_v51  ;;  %1682 = vmatpush.msrb.mxu3 %v4799_v51 }
0x240b   :  { %1752 = vmatpush.msrb.mxu0 %v4799_v51 }
0x240c   :  { %1620 = vmatpush.msrb.mxu2 %v4806_v34  ;;  %1683 = vmatpush.msrb.mxu3 %v4806_v34 }
0x240d   :  { %1753 = vmatpush.msrb.mxu0 %v4806_v34 }
0x240e   :  { %1621 = vmatpush.msrb.mxu2 %v4815_v52  ;;  %1684 = vmatpush.msrb.mxu3 %v4815_v52 }
0x240f   :  { %1754 = vmatpush.msrb.mxu0 %v4815_v52 }
0x2477   :  { %v1226_v15 = vpop.permute.xlu0 %1225 }
0x2478   :  { %3809 = vmatmul.msk.f32.vlgmr.msrb.gmra.mxu1 %vm141_vm7, %v1226_v15 }
0x2479   :  { %2649 = vmatpush.msrb.mxu1 %v4794_v48 }
0x247b   :  { %2650 = vmatpush.msrb.mxu1 %v4799_v51 }
0x247d   :  { %2651 = vmatpush.msrb.mxu1 %v4806_v34 }
0x247f   :  { %2652 = vmatpush.msrb.mxu1 %v4815_v52 }
0x24f5   :  { %v1246_v33 = vpop.f32.mrf.mxu1 }
0x24f6   :  { %v1249_v16 = vadd.f32 %v1246_v33, %v4562_v21 }
0x24f8   :  { %4079 = vtanh.f32 %v1249_v16  ;;  %v3810_v60 = vmul.f32 -1.442695, %v1249_v16 }
0x24fa   :  { %4081 = vpow2.f32 %v3810_v60 }
0x24fe   :  { %v4080_v54 = vpop.eup %4079 }
0x24ff   :  { %1272 = vrot.lane.b32.xlu1 %v4080_v54, %s4324_s3 }
0x2500   :  { %v4082_v28 = vpop.eup %4081 }
0x2501   :  { %v1253_v4 = vadd.f32 1.0, %v4082_v28 }
0x2503   :  { %4083 = vrcp.f32 %v1253_v4  ;;  %v1265_v56 = vand.u32 2147483648, %v1253_v4  ;;  %vm1259_vm14 = vweird.f32 %v1253_v4  ;;  %v1263_v32 = vand.u32 2147483647, %v1253_v4 }
0x2505   :  { %v1266_v18 = vor.u32 1.1754944e-38, %v1265_v56  ;;  %vm1264_vm3 = vcmp.eq.f32.partialorder %v1263_v32, 8.507059e+37 }
0x2509   :  { %v4084_v29 = vpop.eup %4083 }
0x250a   :  { %v1255_v5 = vmul.f32 %v4084_v29, %v1253_v4  ;;  %vm1260_vm13 = vweird.f32 %v4084_v29 }
0x250b   :  { %vm1261_vm15 = vmor %vm1259_vm14, %vm1260_vm13 }
0x250c   :  { %v1256_v26 = vsub.f32 1.0, %v1255_v5 }
0x250e   :  { %v1257_v6 = vmul.f32 %v4084_v29, %v1256_v26 }
0x2510   :  { %v1258_v31 = vadd.f32 %v4084_v29, %v1257_v6 }
0x2512   :  { %v1262_v21 = vsel %vm1261_vm15, %v4084_v29, %v1258_v31 }
0x2513   :  { %v1267_v58 = vsel %vm1264_vm3, %v1266_v18, %v1262_v21 }
0x2571   :  { %v1273_v36 = vpop.permute.xlu1 %1272 }
0x2572   :  { %v1275_v37 = vmul.f32 %v1273_v36, %v1267_v58 }
0x2574   :  { %1277 = vrot.lane.b32.xlu2 %v1275_v37, %s4324_s3 }
0x257c   :  { %1550 = vrot.lane.b32.xlu2 %v4615_v50, %s4325_s9  ;;  %v1270_v50 = vmul.f32 %v1267_v58, %v1214_v8 }
0x25ce   :  { %v1278_v40 = vpop.permute.xlu2 %1277 }
0x25cf   :  { %v4782_v41 = vadd.f32 %v1278_v40, %v1270_v50 }
0x25d1   :  { %4085 = vtanh.f32 %v4782_v41 }
0x25d6   :  { %v1551_v24 = vpop.permute.xlu2 %1550 }
0x25d7   :  { %v4086_v43 = vpop.eup %4085  ;;  %3817 = vmatmul.msk.f32.vlgmr.msra.gmra.mxu1 %vm141_vm7, %v1551_v24 }
0x25d8   :  { %1283 = vrot.lane.b32.xlu0 %v4086_v43, %s4324_s3  ;;  %2925 = vmatpush.msra.mxu1 %v4794_v48 }
0x25da   :  { %2926 = vmatpush.msra.mxu1 %v4799_v51 }
0x25dc   :  { %2927 = vmatpush.msra.mxu1 %v4806_v34 }
0x25de   :  { %2928 = vmatpush.msra.mxu1 %v4815_v52 }
0x264a   :  { %v1284_v45 = vpop.permute.xlu0 %1283 }
0x264b   :  { %v4787_v47 = vmul.f32 %v1284_v45, %v1267_v58 }
0x264d   :  { %1293 = vrot.lane.b32.xlu1 %v4787_v47, %s4325_s9 }
0x2654   :  { %v1587_v63 = vpop.f32.mrf.mxu1 }
0x26bf   :  { %v1294_v61 = vpop.permute.xlu1 %1293 }
0x26c0   :  { %3811 = vmatmul.msk.f32.vlgmr.msra.gmra.mxu2 %vm141_vm7, %v1294_v61 }
0x26c1   :  { %1821 = vmatpush.msra.mxu2 %v4794_v48 }
0x26c3   :  { %1822 = vmatpush.msra.mxu2 %v4799_v51 }
0x26c5   :  { %1823 = vmatpush.msra.mxu2 %v4806_v34 }
0x26c7   :  { %1824 = vmatpush.msra.mxu2 %v4815_v52 }
0x26c8   :  { %1622 = vmatmul.f32.vlgmr.msrb.gmra.mxu2 %v4323_v19  ;;  %v4848_v19 = vadd.f32 %v4845_v42, %v1587_v63 }
0x26c9   :  { %2027 = vmatpush.msrb.mxu2 %v4794_v48 }
0x26cb   :  { %2028 = vmatpush.msrb.mxu2 %v4799_v51 }
0x26cd   :  { %2029 = vmatpush.msrb.mxu2 %v4806_v34 }
0x26cf   :  { %2030 = vmatpush.msrb.mxu2 %v4815_v52 }
0x2743   :  { %v1314_v55 = vpop.f32.mrf.mxu2 }
0x2744   :  { %v1317_v62 = vadd.f32 %v1314_v55, %v4565_v22 }
0x2746   :  { %4087 = vtanh.f32 %v1317_v62  ;;  %v3812_v22 = vmul.f32 -1.442695, %v1317_v62 }
0x274b   :  { %v1623_v0 = vpop.f32.mrf.mxu2 }
0x274c   :  { %v4088_v49 = vpop.eup %4087  ;;  %v1626_v7 = vadd.f32 %v1623_v0, %v4848_v19 }
0x274d   :  { %1340 = vrot.lane.b32.xlu0 %v4088_v49, %s4324_s3 }
0x274e   :  { %4089 = vtanh.f32 %v1626_v7  ;;  %v3822_v44 = vmul.f32 -1.442695, %v1626_v7 }
0x274f   :  { %4091 = vpow2.f32 %v3812_v22 }
0x2750   :  { %4093 = vpow2.f32 %v3822_v44 }
0x2754   :  { %v4090_v57 = vpop.eup %4089 }
0x2755   :  { %1649 = vrot.lane.b32.xlu1 %v4090_v57, %s4324_s3  ;;  %v4092_v1 = vpop.eup %4091 }
0x2756   :  { %v1321_v20 = vadd.f32 1.0, %v4092_v1  ;;  %v4094_v30 = vpop.eup %4093 }
0x2757   :  { %v1630_v10 = vadd.f32 1.0, %v4094_v30 }
0x2758   :  { %4095 = vrcp.f32 %v1321_v20  ;;  %v1333_v53 = vand.u32 2147483648, %v1321_v20  ;;  %vm1327_vm5 = vweird.f32 %v1321_v20  ;;  %v1331_v15 = vand.u32 2147483647, %v1321_v20 }
0x2759   :  { %4097 = vrcp.f32 %v1630_v10  ;;  %v1642_v5 = vand.u32 2147483648, %v1630_v10  ;;  %vm1636_vm11 = vweird.f32 %v1630_v10  ;;  %v1640_v26 = vand.u32 2147483647, %v1630_v10 }
0x275a   :  { %v1334_v54 = vor.u32 1.1754944e-38, %v1333_v53  ;;  %vm1332_vm9 = vcmp.eq.f32.partialorder %v1331_v15, 8.507059e+37 }
0x275b   :  { %v1643_v31 = vor.u32 1.1754944e-38, %v1642_v5  ;;  %vm1641_vm13 = vcmp.eq.f32.partialorder %v1640_v26, 8.507059e+37 }
0x275e   :  { %v4096_v46 = vpop.eup %4095 }
0x275f   :  { %v1323_v2 = vmul.f32 %v4096_v46, %v1321_v20  ;;  %v4098_v3 = vpop.eup %4097  ;;  %vm1328_vm4 = vweird.f32 %v4096_v46 }
0x2760   :  { %v1632_v9 = vmul.f32 %v4098_v3, %v1630_v10  ;;  %vm1329_vm6 = vmor %vm1327_vm5, %vm1328_vm4  ;;  %vm1637_vm10 = vweird.f32 %v4098_v3 }
0x2761   :  { %v1324_v59 = vsub.f32 1.0, %v1323_v2  ;;  %vm1638_vm12 = vmor %vm1636_vm11, %vm1637_vm10 }
0x2762   :  { %v1633_v12 = vsub.f32 1.0, %v1632_v9 }
0x2763   :  { %v1325_v8 = vmul.f32 %v4096_v46, %v1324_v59 }
0x2764   :  { %v1634_v16 = vmul.f32 %v4098_v3, %v1633_v12 }
0x2765   :  { %v1326_v11 = vadd.f32 %v4096_v46, %v1325_v8 }
0x2766   :  { %v1635_v29 = vadd.f32 %v4098_v3, %v1634_v16 }
0x2767   :  { %v1330_v33 = vsel %vm1329_vm6, %v4096_v46, %v1326_v11 }
0x2768   :  { %v1335_v28 = vsel %vm1332_vm9, %v1334_v54, %v1330_v33  ;;  %v1639_v6 = vsel %vm1638_vm12, %v4098_v3, %v1635_v29 }
0x2769   :  { %v1644_v32 = vsel %vm1641_vm13, %v1643_v31, %v1639_v6  ;;  %v1338_v18 = vmul.f32 %v1335_v28, %v4782_v41 }
0x276a   :  { %v1647_v38 = vmul.f32 0.0, %v1644_v32 }
0x27bf   :  { %v1341_v60 = vpop.permute.xlu0 %1340 }
0x27c0   :  { %v1343_v4 = vmul.f32 %v1341_v60, %v1335_v28 }
0x27c2   :  { %1345 = vrot.lane.b32.xlu2 %v1343_v4, %s4324_s3 }
0x27c7   :  { %v1650_v56 = vpop.permute.xlu1 %1649 }
0x27c8   :  { %v1652_v21 = vmul.f32 %v1650_v56, %v1644_v32 }
0x27ca   :  { %1654 = vrot.lane.b32.xlu0 %v1652_v21, %s4324_s3 }
0x281c   :  { %v1346_v36 = vpop.permute.xlu2 %1345 }
0x281d   :  { %v4856_v58 = vadd.f32 %v1346_v36, %v1338_v18 }
0x281f   :  { %4099 = vtanh.f32 %v4856_v58 }
0x2825   :  { %v4100_v37 = vpop.eup %4099 }
0x2826   :  { %1351 = vrot.lane.b32.xlu1 %v4100_v37, %s4324_s3 }
0x283c   :  { %v1655_v17 = vpop.permute.xlu0 %1654 }
0x283d   :  { %v4860_v35 = vadd.f32 %v1655_v17, %v1647_v38 }
0x283f   :  { %4101 = vtanh.f32 %v4860_v35  ;;  %v1714_v36 = vrot.slane %v4860_v35, 6 }
0x2845   :  { %v4102_v39 = vpop.eup %4101 }
0x2846   :  { %1660 = vrot.lane.b32.xlu2 %v4102_v39, %s4324_s3 }
0x2898   :  { %v1352_v50 = vpop.permute.xlu1 %1351 }
0x2899   :  { %v4864_v40 = vmul.f32 %v1352_v50, %v1335_v28 }
0x289b   :  { %1361 = vrot.lane.b32.xlu0 %v4864_v40, %s4325_s9 }
0x28a0   :  { %v1661_v41 = vpop.permute.xlu2 %1660 }
0x28a1   :  { %v4868_v24 = vmul.f32 %v1661_v41, %v1644_v32  ;;  %v1527_v41 = vrot.slane %v4864_v40, 6 }
0x28a3   :  { %1665 = vrot.lane.b32.xlu1 %v4868_v24, %s4325_s9  ;;  %v1534_v35 = vsel %vm1513_vm2, %v4787_v47, %v1527_v41 }
0x290d   :  { %v1362_v43 = vpop.permute.xlu0 %1361 }
0x290e   :  { %3813 = vmatmul.msk.f32.vlgmr.msra.gmra.mxu3 %vm141_vm7, %v1362_v43 }
0x290f   :  { %1891 = vmatpush.msra.mxu3 %v4794_v48 }
0x2911   :  { %1892 = vmatpush.msra.mxu3 %v4799_v51 }
0x2913   :  { %1893 = vmatpush.msra.mxu3 %v4806_v34 }
0x2915   :  { %v4876_v45 = vpop.permute.xlu1 %1665  ;;  %1894 = vmatpush.msra.mxu3 %v4815_v52 }
0x2916   :  { %3823 = vmatmul.msk.f32.vlgmr.msrb.gmra.mxu3 %vm141_vm7, %v4876_v45 }
0x2917   :  { %2097 = vmatpush.msrb.mxu3 %v4794_v48 }
0x2919   :  { %2098 = vmatpush.msrb.mxu3 %v4799_v51 }
0x291b   :  { %2099 = vmatpush.msrb.mxu3 %v4806_v34 }
0x291d   :  { %2100 = vmatpush.msrb.mxu3 %v4815_v52 }
0x2991   :  { %v1382_v61 = vpop.f32.mrf.mxu3 }
0x2992   :  { %v1385_v55 = vadd.f32 %v1382_v61, %v4568_v23 }
0x2994   :  { %4103 = vtanh.f32 %v1385_v55  ;;  %v3814_v57 = vmul.f32 -1.442695, %v1385_v55 }
0x2999   :  { %v1686_v62 = vpop.f32.mrf.mxu3 }
0x299a   :  { %v4104_v63 = vpop.eup %4103  ;;  %v1690_v0 = vrot.slane %v1686_v62, 6 }
0x299b   :  { %1408 = vrot.lane.b32.xlu2 %v4104_v63, %s4324_s3 }
0x299c   :  { %v1692_v49 = vadd.f32 %v1690_v0, %v4848_v19 }
0x299e   :  { %4105 = vtanh.f32 %v1692_v49  ;;  %v3824_v30 = vmul.f32 -1.442695, %v1692_v49 }
0x299f   :  { %4107 = vpow2.f32 %v3814_v57 }
0x29a4   :  { %v4106_v7 = vpop.eup %4105 }
0x29a5   :  { %1718 = vrot.lane.b32.xlu0 %v4106_v7, %s4324_s3  ;;  %v4108_v22 = vpop.eup %4107 }
0x29a6   :  { %v1389_v44 = vadd.f32 1.0, %v4108_v22 }
0x29a8   :  { %4109 = vrcp.f32 %v1389_v44  ;;  %v1401_v2 = vand.u32 2147483648, %v1389_v44  ;;  %vm1395_vm15 = vweird.f32 %v1389_v44  ;;  %v1399_v59 = vand.u32 2147483647, %v1389_v44 }
0x29a9   :  { %4111 = vpow2.f32 %v3824_v30 }
0x29aa   :  { %v1402_v8 = vor.u32 1.1754944e-38, %v1401_v2  ;;  %vm1400_vm4 = vcmp.eq.f32.partialorder %v1399_v59, 8.507059e+37 }
0x29ae   :  { %v4110_v1 = vpop.eup %4109 }
0x29af   :  { %v1391_v20 = vmul.f32 %v4110_v1, %v1389_v44  ;;  %vm1396_vm14 = vweird.f32 %v4110_v1  ;;  %v4112_v9 = vpop.eup %4111 }
0x29b0   :  { %vm1397_vm3 = vmor %vm1395_vm15, %vm1396_vm14  ;;  %v1696_v15 = vadd.f32 1.0, %v4112_v9 }
0x29b1   :  { %v1392_v23 = vsub.f32 1.0, %v1391_v20 }
0x29b2   :  { %4113 = vrcp.f32 %v1696_v15  ;;  %v1708_v4 = vand.u32 2147483648, %v1696_v15  ;;  %vm1702_vm6 = vweird.f32 %v1696_v15  ;;  %v1706_v29 = vand.u32 2147483647, %v1696_v15 }
0x29b3   :  { %v1393_v10 = vmul.f32 %v4110_v1, %v1392_v23 }
0x29b4   :  { %v1709_v26 = vor.u32 1.1754944e-38, %v1708_v4  ;;  %vm1707_vm10 = vcmp.eq.f32.partialorder %v1706_v29, 8.507059e+37 }
0x29b5   :  { %v1394_v46 = vadd.f32 %v4110_v1, %v1393_v10 }
0x29b7   :  { %v1398_v3 = vsel %vm1397_vm3, %v4110_v1, %v1394_v46 }
0x29b8   :  { %v1403_v11 = vsel %vm1400_vm4, %v1402_v8, %v1398_v3  ;;  %v4114_v33 = vpop.eup %4113 }
0x29b9   :  { %v1698_v16 = vmul.f32 %v4114_v33, %v1696_v15  ;;  %vm1703_vm5 = vweird.f32 %v4114_v33  ;;  %v1406_v32 = vmul.f32 %v1403_v11, %v4856_v58 }
0x29ba   :  { %vm1704_vm9 = vmor %vm1702_vm6, %vm1703_vm5 }
0x29bb   :  { %v1699_v54 = vsub.f32 1.0, %v1698_v16 }
0x29bd   :  { %v1700_v60 = vmul.f32 %v4114_v33, %v1699_v54 }
0x29bf   :  { %v1701_v28 = vadd.f32 %v4114_v33, %v1700_v60 }
0x29c1   :  { %v1705_v5 = vsel %vm1704_vm9, %v4114_v33, %v1701_v28 }
0x29c2   :  { %v1710_v31 = vsel %vm1707_vm10, %v1709_v26, %v1705_v5 }
0x29c3   :  { %v1716_v38 = vmul.f32 %v1714_v36, %v1710_v31 }
0x29f5   :  { %v1409_v12 = vpop.permute.xlu2 %1408 }
0x29f6   :  { %v1411_v53 = vmul.f32 %v1409_v12, %v1403_v11 }
0x29f8   :  { %1413 = vrot.lane.b32.xlu1 %v1411_v53, %s4324_s3 }
0x2a17   :  { %v1719_v6 = vpop.permute.xlu0 %1718 }
0x2a18   :  { %v1721_v56 = vmul.f32 %v1719_v6, %v1710_v31 }
0x2a1a   :  { %1723 = vrot.lane.b32.xlu2 %v1721_v56, %s4324_s3 }
0x2a6a   :  { %v1414_v21 = vpop.permute.xlu1 %1413 }
0x2a6b   :  { %v4892_v18 = vadd.f32 %v1414_v21, %v1406_v32 }
0x2a6d   :  { %4115 = vtanh.f32 %v4892_v18 }
0x2a73   :  { %v4116_v37 = vpop.eup %4115 }
0x2a74   :  { %1419 = vrot.lane.b32.xlu0 %v4116_v37, %s4324_s3  ;;  %v1724_v17 = vpop.permute.xlu2 %1723 }
0x2a75   :  { %v1726_v39 = vadd.f32 %v1724_v17, %v1716_v38 }
0x2a77   :  { %4117 = vtanh.f32 %v1726_v39  ;;  %v1784_v33 = vrot.slane %v1726_v39, 6 }
0x2a7d   :  { %v4118_v50 = vpop.eup %4117 }
0x2a7e   :  { %1729 = vrot.lane.b32.xlu1 %v4118_v50, %s4324_s3 }
0x2ae6   :  { %v1420_v58 = vpop.permute.xlu0 %1419 }
0x2ae7   :  { %v1422_v43 = vmul.f32 %v1420_v58, %v1403_v11 }
0x2ae9   :  { %v1529_v61 = vrot.slane %v1422_v43, 4  ;;  %1427 = vrot.lane.b32.xlu2 %v1422_v43, %s4325_s9 }
0x2aeb   :  { %v4903_v55 = vsel %vm72_vm1, %v1534_v35, %v1529_v61 }
0x2af0   :  { %v1730_v62 = vpop.permute.xlu1 %1729 }
0x2af1   :  { %v4905_v63 = vmul.f32 %v1730_v62, %v1710_v31 }
0x2af3   :  { %v1734_v0 = vrot.slane %v4905_v63, 2 }
0x2af5   :  { %1735 = vrot.lane.b32.xlu0 %v1734_v0, %s4325_s9 }
0x2b43   :  { %v1428_v40 = vpop.permute.xlu2 %1427 }
0x2b44   :  { %3815 = vmatmul.msk.f32.vlgmr.msra.gmra.mxu0 %vm141_vm7, %v1428_v40 }
0x2b45   :  { %1957 = vmatpush.msra.mxu0 %v4794_v48 }
0x2b47   :  { %1958 = vmatpush.msra.mxu0 %v4799_v51 }
0x2b49   :  { %1959 = vmatpush.msra.mxu0 %v4806_v34 }
0x2b4b   :  { %1960 = vmatpush.msra.mxu0 %v4815_v52 }
0x2b67   :  { %v1736_v47 = vpop.permute.xlu0 %1735 }
0x2b68   :  { %3825 = vmatmul.msk.f32.vlgmr.msrb.gmra.mxu0 %vm141_vm7, %v1736_v47 }
0x2b69   :  { %2167 = vmatpush.msrb.mxu0 %v4794_v48 }
0x2b6b   :  { %2168 = vmatpush.msrb.mxu0 %v4799_v51 }
0x2b6d   :  { %2169 = vmatpush.msrb.mxu0 %v4806_v34 }
0x2b6f   :  { %2170 = vmatpush.msrb.mxu0 %v4815_v52 }
0x2bc1   :  { %v1448_v49 = vpop.f32.mrf.mxu0 }
0x2bc2   :  { %v4922_v7 = vadd.f32 %v1448_v49, %v4571_v25 }
0x2be5   :  { %v1756_v57 = vpop.f32.mrf.mxu0 }
0x2be6   :  { %v1760_v22 = vrot.slane %v1756_v57, 4 }
0x2be8   :  { %v1762_v44 = vadd.f32 %v1760_v22, %v4848_v19 }
0x2bea   :  { %4119 = vtanh.f32 %v1762_v44  ;;  %v3826_v20 = vmul.f32 -1.442695, %v1762_v44 }
0x2bec   :  { %4121 = vpow2.f32 %v3826_v20 }
0x2bf0   :  { %v4120_v1 = vpop.eup %4119 }
0x2bf1   :  { %1788 = vrot.lane.b32.xlu1 %v4120_v1, %s4324_s3 }
0x2bf2   :  { %v4122_v23 = vpop.eup %4121 }
0x2bf3   :  { %v1766_v30 = vadd.f32 1.0, %v4122_v23 }
0x2bf5   :  { %4123 = vrcp.f32 %v1766_v30  ;;  %v1778_v25 = vand.u32 2147483648, %v1766_v30  ;;  %vm1772_vm12 = vweird.f32 %v1766_v30  ;;  %v1776_v8 = vand.u32 2147483647, %v1766_v30 }
0x2bf7   :  { %v1779_v11 = vor.u32 1.1754944e-38, %v1778_v25  ;;  %vm1777_vm14 = vcmp.eq.f32.partialorder %v1776_v8, 8.507059e+37 }
0x2bfb   :  { %v4124_v10 = vpop.eup %4123 }
0x2bfc   :  { %v1768_v46 = vmul.f32 %v4124_v10, %v1766_v30  ;;  %vm1773_vm11 = vweird.f32 %v4124_v10 }
0x2bfd   :  { %vm1774_vm13 = vmor %vm1772_vm12, %vm1773_vm11 }
0x2bfe   :  { %v1769_v2 = vsub.f32 1.0, %v1768_v46 }
0x2c00   :  { %v1770_v59 = vmul.f32 %v4124_v10, %v1769_v2 }
0x2c02   :  { %v1771_v3 = vadd.f32 %v4124_v10, %v1770_v59 }
0x2c04   :  { %v1775_v9 = vsel %vm1774_vm13, %v4124_v10, %v1771_v3 }
0x2c05   :  { %v1780_v53 = vsel %vm1777_vm14, %v1779_v11, %v1775_v9 }
0x2c06   :  { %v1786_v16 = vmul.f32 %v1784_v33, %v1780_v53 }
0x2c63   :  { %v1789_v12 = vpop.permute.xlu1 %1788 }
0x2c64   :  { %v1791_v15 = vmul.f32 %v1789_v12, %v1780_v53 }
0x2c66   :  { %1793 = vrot.lane.b32.xlu2 %v1791_v15, %s4324_s3 }
0x2cc0   :  { %v1794_v54 = vpop.permute.xlu2 %1793 }
0x2cc1   :  { %v1796_v60 = vadd.f32 %v1794_v54, %v1786_v16 }
0x2cc3   :  { %4125 = vtanh.f32 %v1796_v60  ;;  %v1854_v47 = vrot.slane %v1796_v60, 6 }
0x2cc9   :  { %v4126_v28 = vpop.eup %4125 }
0x2cca   :  { %1799 = vrot.lane.b32.xlu0 %v4126_v28, %s4324_s3 }
0x2d3c   :  { %v1800_v4 = vpop.permute.xlu0 %1799 }
0x2d3d   :  { %v4928_v29 = vmul.f32 %v1800_v4, %v1780_v53 }
0x2d3f   :  { %v1804_v5 = vrot.slane %v4928_v29, 4 }
0x2d41   :  { %1805 = vrot.lane.b32.xlu1 %v1804_v5, %s4325_s9 }
0x2db3   :  { %v1806_v26 = vpop.permute.xlu1 %1805 }
0x2db4   :  { %3827 = vmatmul.msk.f32.vlgmr.msra.gmra.mxu2 %vm141_vm7, %v1806_v26 }
0x2db5   :  { %2233 = vmatpush.msra.mxu2 %v4794_v48 }
0x2db7   :  { %2234 = vmatpush.msra.mxu2 %v4799_v51 }
0x2db9   :  { %2235 = vmatpush.msra.mxu2 %v4806_v34 }
0x2dbb   :  { %2236 = vmatpush.msra.mxu2 %v4815_v52 }
0x2e37   :  { %v1826_v6 = vpop.f32.mrf.mxu2 }
0x2e38   :  { %v1830_v31 = vrot.slane %v1826_v6, 2 }
0x2e3a   :  { %v1832_v56 = vadd.f32 %v1830_v31, %v4848_v19 }
0x2e3c   :  { %4127 = vtanh.f32 %v1832_v56  ;;  %v3828_v21 = vmul.f32 -1.442695, %v1832_v56 }
0x2e3e   :  { %4129 = vpow2.f32 %v3828_v21 }
0x2e42   :  { %v4128_v32 = vpop.eup %4127 }
0x2e43   :  { %1858 = vrot.lane.b32.xlu2 %v4128_v32, %s4324_s3 }
0x2e44   :  { %v4130_v36 = vpop.eup %4129 }
0x2e45   :  { %v1836_v37 = vadd.f32 1.0, %v4130_v36 }
0x2e47   :  { %4131 = vrcp.f32 %v1836_v37  ;;  %v1848_v58 = vand.u32 2147483648, %v1836_v37  ;;  %vm1842_vm3 = vweird.f32 %v1836_v37  ;;  %v1846_v43 = vand.u32 2147483647, %v1836_v37 }
0x2e49   :  { %v1849_v61 = vor.u32 1.1754944e-38, %v1848_v58  ;;  %vm1847_vm5 = vcmp.eq.f32.partialorder %v1846_v43, 8.507059e+37 }
0x2e4d   :  { %v4132_v38 = vpop.eup %4131 }
0x2e4e   :  { %v1838_v17 = vmul.f32 %v4132_v38, %v1836_v37  ;;  %vm1843_vm15 = vweird.f32 %v4132_v38 }
0x2e4f   :  { %vm1844_vm4 = vmor %vm1842_vm3, %vm1843_vm15 }
0x2e50   :  { %v1839_v39 = vsub.f32 1.0, %v1838_v17 }
0x2e52   :  { %v1840_v50 = vmul.f32 %v4132_v38, %v1839_v39 }
0x2e54   :  { %v1841_v41 = vadd.f32 %v4132_v38, %v1840_v50 }
0x2e56   :  { %v1845_v19 = vsel %vm1844_vm4, %v4132_v38, %v1841_v41 }
0x2e57   :  { %v1850_v62 = vsel %vm1847_vm5, %v1849_v61, %v1845_v19 }
0x2e58   :  { %v1856_v49 = vmul.f32 %v1854_v47, %v1850_v62 }
0x2e9d   :  { %v1859_v35 = vpop.permute.xlu2 %1858 }
0x2e9e   :  { %v1861_v40 = vmul.f32 %v1859_v35, %v1850_v62 }
0x2ea0   :  { %1863 = vrot.lane.b32.xlu0 %v1861_v40, %s4324_s3 }
0x2ea8   :  { %1552 = vrot.lane.b32.xlu0 %v4664_v13, %s4325_s9 }
0x2f12   :  { %v1864_v57 = vpop.permute.xlu0 %1863 }
0x2f13   :  { %v1866_v22 = vadd.f32 %v1864_v57, %v1856_v49 }
0x2f15   :  { %4133 = vtanh.f32 %v1866_v22  ;;  %v1921_v31 = vrot.slane %v1866_v22, 6 }
0x2f1a   :  { %v1553_v44 = vpop.permute.xlu0 %1552 }
0x2f1b   :  { %v4134_v1 = vpop.eup %4133  ;;  %3818 = vmatmul.msk.f32.gmra.mxu1 %vm141_vm7, %v1553_v44 }
0x2f1c   :  { %1869 = vrot.lane.b32.xlu1 %v4134_v1, %s4324_s3 }
0x2f8e   :  { %v1870_v20 = vpop.permute.xlu1 %1869 }
0x2f8f   :  { %v4946_v23 = vmul.f32 %v1870_v20, %v1850_v62 }
0x2f91   :  { %v1874_v30 = vrot.slane %v4946_v23, 6 }
0x2f93   :  { %1875 = vrot.lane.b32.xlu2 %v1874_v30, %s4325_s9 }
0x2f98   :  { %v1590_v10 = vpop.f32.mrf.mxu1 }
0x2f99   :  { %v4958_v46 = vadd.f32 %v4845_v42, %v1590_v10 }
0x2fed   :  { %v1876_v13 = vpop.permute.xlu2 %1875 }
0x2fee   :  { %3829 = vmatmul.msk.f32.vlgmr.msra.gmra.mxu3 %vm141_vm7, %v1876_v13 }
0x2fef   :  { %2303 = vmatpush.msra.mxu3 %v4794_v48 }
0x2ff1   :  { %2304 = vmatpush.msra.mxu3 %v4799_v51 }
0x2ff3   :  { %2305 = vmatpush.msra.mxu3 %v4806_v34 }
0x2ff5   :  { %2306 = vmatpush.msra.mxu3 %v4815_v52 }
0x3071   :  { %v1896_v2 = vpop.f32.mrf.mxu3 }
0x3072   :  { %v1899_v59 = vadd.f32 %v1896_v2, %v4958_v46 }
0x3074   :  { %4135 = vtanh.f32 %v1899_v59  ;;  %v3830_v25 = vmul.f32 -1.442695, %v1899_v59 }
0x3076   :  { %4137 = vpow2.f32 %v3830_v25 }
0x307a   :  { %v4136_v3 = vpop.eup %4135 }
0x307b   :  { %1925 = vrot.lane.b32.xlu1 %v4136_v3, %s4324_s3 }
0x307c   :  { %v4138_v8 = vpop.eup %4137 }
0x307d   :  { %v1903_v9 = vadd.f32 1.0, %v4138_v8 }
0x307f   :  { %4139 = vrcp.f32 %v1903_v9  ;;  %v1915_v16 = vand.u32 2147483648, %v1903_v9  ;;  %vm1909_vm9 = vweird.f32 %v1903_v9  ;;  %v1913_v54 = vand.u32 2147483647, %v1903_v9 }
0x3081   :  { %v1916_v28 = vor.u32 1.1754944e-38, %v1915_v16  ;;  %vm1914_vm11 = vcmp.eq.f32.partialorder %v1913_v54, 8.507059e+37 }
0x3085   :  { %v4140_v11 = vpop.eup %4139 }
0x3086   :  { %v1905_v12 = vmul.f32 %v4140_v11, %v1903_v9  ;;  %vm1910_vm6 = vweird.f32 %v4140_v11 }
0x3087   :  { %vm1911_vm10 = vmor %vm1909_vm9, %vm1910_vm6 }
0x3088   :  { %v1906_v53 = vsub.f32 1.0, %v1905_v12 }
0x308a   :  { %v1907_v15 = vmul.f32 %v4140_v11, %v1906_v53 }
0x308c   :  { %v1908_v33 = vadd.f32 %v4140_v11, %v1907_v15 }
0x308e   :  { %v1912_v60 = vsel %vm1911_vm10, %v4140_v11, %v1908_v33 }
0x308f   :  { %v1917_v26 = vsel %vm1914_vm11, %v1916_v28, %v1912_v60 }
0x3090   :  { %v1923_v56 = vmul.f32 %v1921_v31, %v1917_v26 }
0x30ed   :  { %v1926_v4 = vpop.permute.xlu1 %1925 }
0x30ee   :  { %v1928_v6 = vmul.f32 %v1926_v4, %v1917_v26 }
0x30f0   :  { %1930 = vrot.lane.b32.xlu2 %v1928_v6, %s4324_s3 }
0x314a   :  { %v1931_v32 = vpop.permute.xlu2 %1930 }
0x314b   :  { %v1933_v21 = vadd.f32 %v1931_v32, %v1923_v56 }
0x314d   :  { %4141 = vtanh.f32 %v1933_v21  ;;  %v1990_v2 = vrot.slane %v1933_v21, 6 }
0x3153   :  { %v4142_v36 = vpop.eup %4141 }
0x3154   :  { %1936 = vrot.lane.b32.xlu0 %v4142_v36, %s4324_s3 }
0x31c6   :  { %v1937_v37 = vpop.permute.xlu0 %1936 }
0x31c7   :  { %v4964_v38 = vmul.f32 %v1937_v37, %v1917_v26 }
0x31c9   :  { %1941 = vrot.lane.b32.xlu1 %v4964_v38, %s4325_s9 }
0x323b   :  { %v4968_v17 = vpop.permute.xlu1 %1941 }
0x323c   :  { %3831 = vmatmul.msk.f32.vlgmr.msra.gmra.mxu0 %vm141_vm7, %v4968_v17 }
0x323d   :  { %2373 = vmatpush.msra.mxu0 %v4794_v48 }
0x323f   :  { %2374 = vmatpush.msra.mxu0 %v4799_v51 }
0x3241   :  { %2375 = vmatpush.msra.mxu0 %v4806_v34 }
0x3243   :  { %2376 = vmatpush.msra.mxu0 %v4815_v52 }
0x32b9   :  { %v1962_v39 = vpop.f32.mrf.mxu0 }
0x32ba   :  { %v1966_v50 = vrot.slane %v1962_v39, 6 }
0x32bc   :  { %v1968_v41 = vadd.f32 %v1966_v50, %v4958_v46 }
0x32be   :  { %4143 = vtanh.f32 %v1968_v41  ;;  %v3832_v43 = vmul.f32 -1.442695, %v1968_v41 }
0x32c0   :  { %4145 = vpow2.f32 %v3832_v43 }
0x32c4   :  { %v4144_v58 = vpop.eup %4143 }
0x32c5   :  { %1994 = vrot.lane.b32.xlu2 %v4144_v58, %s4324_s3 }
0x32c6   :  { %v4146_v19 = vpop.eup %4145 }
0x32c7   :  { %v1972_v61 = vadd.f32 1.0, %v4146_v19 }
0x32c9   :  { %4147 = vrcp.f32 %v1972_v61  ;;  %v1984_v57 = vand.u32 2147483648, %v1972_v61  ;;  %vm1978_vm13 = vweird.f32 %v1972_v61  ;;  %v1982_v22 = vand.u32 2147483647, %v1972_v61 }
0x32cb   :  { %v1985_v1 = vor.u32 1.1754944e-38, %v1984_v57  ;;  %vm1983_vm15 = vcmp.eq.f32.partialorder %v1982_v22, 8.507059e+37 }
0x32cf   :  { %v4148_v35 = vpop.eup %4147 }
0x32d0   :  { %v1974_v62 = vmul.f32 %v4148_v35, %v1972_v61  ;;  %vm1979_vm12 = vweird.f32 %v4148_v35 }
0x32d1   :  { %vm1980_vm14 = vmor %vm1978_vm13, %vm1979_vm12 }
0x32d2   :  { %v1975_v40 = vsub.f32 1.0, %v1974_v62 }
0x32d4   :  { %v1976_v47 = vmul.f32 %v4148_v35, %v1975_v40 }
0x32d6   :  { %v1977_v49 = vadd.f32 %v4148_v35, %v1976_v47 }
0x32d8   :  { %v1981_v44 = vsel %vm1980_vm14, %v4148_v35, %v1977_v49 }
0x32d9   :  { %v1986_v13 = vsel %vm1983_vm15, %v1985_v1, %v1981_v44 }
0x32da   :  { %v1992_v59 = vmul.f32 %v1990_v2, %v1986_v13 }
0x331f   :  { %v1995_v20 = vpop.permute.xlu2 %1994 }
0x3320   :  { %v1997_v10 = vmul.f32 %v1995_v20, %v1986_v13 }
0x3322   :  { %1999 = vrot.lane.b32.xlu0 %v1997_v10, %s4324_s3 }
0x3394   :  { %v2000_v3 = vpop.permute.xlu0 %1999 }
0x3395   :  { %v2002_v25 = vadd.f32 %v2000_v3, %v1992_v59 }
0x3397   :  { %4149 = vtanh.f32 %v2002_v25  ;;  %v2060_v43 = vrot.slane %v2002_v25, 6 }
0x339d   :  { %v4150_v8 = vpop.eup %4149 }
0x339e   :  { %2005 = vrot.lane.b32.xlu1 %v4150_v8, %s4324_s3 }
0x3410   :  { %v2006_v9 = vpop.permute.xlu1 %2005 }
0x3411   :  { %v4980_v11 = vmul.f32 %v2006_v9, %v1986_v13 }
0x3413   :  { %v2010_v12 = vrot.slane %v4980_v11, 2 }
0x3415   :  { %2011 = vrot.lane.b32.xlu2 %v2010_v12, %s4325_s9 }
0x346f   :  { %v2012_v53 = vpop.permute.xlu2 %2011 }
0x3470   :  { %3833 = vmatmul.msk.f32.vlgmr.msrb.gmra.mxu2 %vm141_vm7, %v2012_v53 }
0x3471   :  { %2443 = vmatpush.msrb.mxu2 %v4794_v48 }
0x3473   :  { %2444 = vmatpush.msrb.mxu2 %v4799_v51 }
0x3475   :  { %2445 = vmatpush.msrb.mxu2 %v4806_v34 }
0x3477   :  { %2446 = vmatpush.msrb.mxu2 %v4815_v52 }
0x34f3   :  { %v2032_v15 = vpop.f32.mrf.mxu2 }
0x34f4   :  { %v2036_v33 = vrot.slane %v2032_v15, 4 }
0x34f6   :  { %v2038_v16 = vadd.f32 %v2036_v33, %v4958_v46 }
0x34f8   :  { %4151 = vtanh.f32 %v2038_v16  ;;  %v3834_v60 = vmul.f32 -1.442695, %v2038_v16 }
0x34fa   :  { %4153 = vpow2.f32 %v3834_v60 }
0x34fe   :  { %v4152_v54 = vpop.eup %4151 }
0x34ff   :  { %2064 = vrot.lane.b32.xlu0 %v4152_v54, %s4324_s3 }
0x3500   :  { %v4154_v28 = vpop.eup %4153 }
0x3501   :  { %v2042_v4 = vadd.f32 1.0, %v4154_v28 }
0x3503   :  { %4155 = vrcp.f32 %v2042_v4  ;;  %v2054_v21 = vand.u32 2147483648, %v2042_v4  ;;  %vm2048_vm4 = vweird.f32 %v2042_v4  ;;  %v2052_v36 = vand.u32 2147483647, %v2042_v4 }
0x3505   :  { %v2055_v39 = vor.u32 1.1754944e-38, %v2054_v21  ;;  %vm2053_vm6 = vcmp.eq.f32.partialorder %v2052_v36, 8.507059e+37 }
0x3509   :  { %v4156_v26 = vpop.eup %4155 }
0x350a   :  { %v2044_v6 = vmul.f32 %v4156_v26, %v2042_v4  ;;  %vm2049_vm3 = vweird.f32 %v4156_v26 }
0x350b   :  { %vm2050_vm5 = vmor %vm2048_vm4, %vm2049_vm3 }
0x350c   :  { %v2045_v31 = vsub.f32 1.0, %v2044_v6 }
0x350e   :  { %v2046_v56 = vmul.f32 %v4156_v26, %v2045_v31 }
0x3510   :  { %v2047_v32 = vadd.f32 %v4156_v26, %v2046_v56 }
0x3512   :  { %v2051_v37 = vsel %vm2050_vm5, %v4156_v26, %v2047_v32 }
0x3513   :  { %v2056_v41 = vsel %vm2053_vm6, %v2055_v39, %v2051_v37 }
0x3514   :  { %v2062_v19 = vmul.f32 %v2060_v43, %v2056_v41 }
0x3571   :  { %v2065_v50 = vpop.permute.xlu0 %2064 }
0x3572   :  { %v2067_v58 = vmul.f32 %v2065_v50, %v2056_v41 }
0x3574   :  { %2069 = vrot.lane.b32.xlu1 %v2067_v58, %s4324_s3 }
0x35e6   :  { %v2070_v61 = vpop.permute.xlu1 %2069 }
0x35e7   :  { %v2072_v35 = vadd.f32 %v2070_v61, %v2062_v19 }
0x35e9   :  { %4157 = vtanh.f32 %v2072_v35  ;;  %v2130_v28 = vrot.slane %v2072_v35, 6 }
0x35ef   :  { %v4158_v62 = vpop.eup %4157 }
0x35f0   :  { %2075 = vrot.lane.b32.xlu2 %v4158_v62, %s4324_s3 }
0x364a   :  { %v2076_v40 = vpop.permute.xlu2 %2075 }
0x364b   :  { %v4995_v47 = vmul.f32 %v2076_v40, %v2056_v41 }
0x364d   :  { %v2080_v49 = vrot.slane %v4995_v47, 4 }
0x364f   :  { %2081 = vrot.lane.b32.xlu0 %v2080_v49, %s4325_s9 }
0x36c1   :  { %v2082_v57 = vpop.permute.xlu0 %2081 }
0x36c2   :  { %3835 = vmatmul.msk.f32.vlgmr.msrb.gmra.mxu3 %vm141_vm7, %v2082_v57 }
0x36c3   :  { %2509 = vmatpush.msrb.mxu3 %v4794_v48 }
0x36c5   :  { %2510 = vmatpush.msrb.mxu3 %v4799_v51 }
0x36c7   :  { %2511 = vmatpush.msrb.mxu3 %v4806_v34 }
0x36c9   :  { %2512 = vmatpush.msrb.mxu3 %v4815_v52 }
0x3745   :  { %v2102_v22 = vpop.f32.mrf.mxu3 }
0x3746   :  { %v2106_v44 = vrot.slane %v2102_v22, 2 }
0x3748   :  { %v2108_v1 = vadd.f32 %v2106_v44, %v4958_v46 }
0x374a   :  { %4159 = vtanh.f32 %v2108_v1  ;;  %v3836_v13 = vmul.f32 -1.442695, %v2108_v1 }
0x374c   :  { %4161 = vpow2.f32 %v3836_v13 }
0x3750   :  { %v4160_v20 = vpop.eup %4159 }
0x3751   :  { %2134 = vrot.lane.b32.xlu1 %v4160_v20, %s4324_s3 }
0x3752   :  { %v4162_v10 = vpop.eup %4161 }
0x3753   :  { %v2112_v2 = vadd.f32 1.0, %v4162_v10 }
0x3755   :  { %4163 = vrcp.f32 %v2112_v2  ;;  %v2124_v53 = vand.u32 2147483648, %v2112_v2  ;;  %vm2118_vm10 = vweird.f32 %v2112_v2  ;;  %v2122_v46 = vand.u32 2147483647, %v2112_v2 }
0x3757   :  { %v2125_v33 = vor.u32 1.1754944e-38, %v2124_v53  ;;  %vm2123_vm12 = vcmp.eq.f32.partialorder %v2122_v46, 8.507059e+37  ;;  %v5048_v53 = vld [vmem:[%s5446_s5 + $0x10] sm:$0xff]  ;;  %v5054_v46 = vld [vmem:[%s5446_s5 + $0x8] sm:$0xff] }
0x3759   :  { %1554 = vrot.lane.b32.xlu1 %v4729_v27, %s4325_s9 }
0x375b   :  { %v4164_v59 = vpop.eup %4163 }
0x375c   :  { %v2114_v3 = vmul.f32 %v4164_v59, %v2112_v2  ;;  %vm2119_vm9 = vweird.f32 %v4164_v59 }
0x375d   :  { %vm2120_vm11 = vmor %vm2118_vm10, %vm2119_vm9 }
0x375e   :  { %v2115_v25 = vsub.f32 1.0, %v2114_v3 }
0x3760   :  { %v2116_v8 = vmul.f32 %v4164_v59, %v2115_v25 }
0x3762   :  { %v2117_v9 = vadd.f32 %v4164_v59, %v2116_v8 }
0x3764   :  { %v2121_v15 = vsel %vm2120_vm11, %v4164_v59, %v2117_v9  ;;  %v5042_v9 = vld [vmem:[%s5446_s5 + $0x18] sm:$0xff] }
0x3765   :  { %v2126_v27 = vsel %vm2123_vm12, %v2125_v33, %v2121_v15  ;;  %v5060_v15 = vld [vmem:[%s5446_s5] sm:$0xff] }
0x3766   :  { %v2132_v4 = vmul.f32 %v2130_v28, %v2126_v27 }
0x37c3   :  { %v2135_v16 = vpop.permute.xlu1 %2134 }
0x37c4   :  { %v2137_v54 = vmul.f32 %v2135_v16, %v2126_v27 }
0x37c6   :  { %2139 = vrot.lane.b32.xlu2 %v2137_v54, %s4324_s3 }
0x37cb   :  { %v1555_v60 = vpop.permute.xlu1 %1554 }
0x37cc   :  { %3819 = vmatmul.msk.f32.gmra.mxu1 %vm141_vm7, %v1555_v60 }
0x3820   :  { %v2140_v26 = vpop.permute.xlu2 %2139 }
0x3821   :  { %v2142_v6 = vadd.f32 %v2140_v26, %v2132_v4 }
0x3823   :  { %4165 = vtanh.f32 %v2142_v6  ;;  %v2197_v20 = vrot.slane %v2142_v6, 6 }
0x3829   :  { %v4166_v31 = vpop.eup %4165 }
0x382a   :  { %2145 = vrot.lane.b32.xlu0 %v4166_v31, %s4324_s3 }
0x3849   :  { %v1593_v37 = vpop.f32.mrf.mxu1 }
0x384a   :  { %v5025_v39 = vadd.f32 %v4845_v42, %v1593_v37 }
0x389c   :  { %v2146_v56 = vpop.permute.xlu0 %2145 }
0x389d   :  { %v5013_v32 = vmul.f32 %v2146_v56, %v2126_v27 }
0x389f   :  { %v2150_v21 = vrot.slane %v5013_v32, 6 }
0x38a1   :  { %2151 = vrot.lane.b32.xlu2 %v2150_v21, %s4325_s9 }
0x38fb   :  { %v2152_v36 = vpop.permute.xlu2 %2151 }
0x38fc   :  { %3837 = vmatmul.msk.f32.vlgmr.msrb.gmra.mxu0 %vm141_vm7, %v2152_v36 }
0x38fd   :  { %2579 = vmatpush.msrb.mxu0 %v4794_v48 }
0x38ff   :  { %2580 = vmatpush.msrb.mxu0 %v4799_v51 }
0x3901   :  { %2581 = vmatpush.msrb.mxu0 %v4806_v34 }
0x3903   :  { %2582 = vmatpush.msrb.mxu0 %v4815_v52 }
0x3979   :  { %v2172_v50 = vpop.f32.mrf.mxu0 }
0x397a   :  { %v2175_v41 = vadd.f32 %v2172_v50, %v5025_v39 }
0x397c   :  { %4167 = vtanh.f32 %v2175_v41  ;;  %v3838_v43 = vmul.f32 -1.442695, %v2175_v41 }
0x397e   :  { %4169 = vpow2.f32 %v3838_v43 }
0x3982   :  { %v4168_v58 = vpop.eup %4167 }
0x3983   :  { %2201 = vrot.lane.b32.xlu0 %v4168_v58, %s4324_s3 }
0x3984   :  { %v4170_v48 = vpop.eup %4169 }
0x3985   :  { %v2179_v19 = vadd.f32 1.0, %v4170_v48 }
0x3987   :  { %4171 = vrcp.f32 %v2179_v19  ;;  %v2191_v42 = vand.u32 2147483648, %v2179_v19  ;;  %vm2185_vm14 = vweird.f32 %v2179_v19  ;;  %v2189_v62 = vand.u32 2147483647, %v2179_v19 }
0x3989   :  { %v2192_v57 = vor.u32 1.1754944e-38, %v2191_v42  ;;  %vm2190_vm3 = vcmp.eq.f32.partialorder %v2189_v62, 8.507059e+37 }
0x398d   :  { %v4172_v51 = vpop.eup %4171 }
0x398e   :  { %v2181_v34 = vmul.f32 %v4172_v51, %v2179_v19  ;;  %vm2186_vm13 = vweird.f32 %v4172_v51 }
0x398f   :  { %vm2187_vm15 = vmor %vm2185_vm14, %vm2186_vm13 }
0x3990   :  { %v2182_v61 = vsub.f32 1.0, %v2181_v34 }
0x3992   :  { %v2183_v52 = vmul.f32 %v4172_v51, %v2182_v61 }
0x3994   :  { %v2184_v35 = vadd.f32 %v4172_v51, %v2183_v52 }
0x3996   :  { %v2188_v40 = vsel %vm2187_vm15, %v4172_v51, %v2184_v35 }
0x3997   :  { %v2193_v44 = vsel %vm2190_vm3, %v2192_v57, %v2188_v40 }
0x3998   :  { %v2199_v13 = vmul.f32 %v2197_v20, %v2193_v44 }
0x39f5   :  { %v2202_v22 = vpop.permute.xlu0 %2201 }
0x39f6   :  { %v2204_v1 = vmul.f32 %v2202_v22, %v2193_v44 }
0x39f8   :  { %2206 = vrot.lane.b32.xlu1 %v2204_v1, %s4324_s3 }
0x3a6a   :  { %v2207_v10 = vpop.permute.xlu1 %2206 }
0x3a6b   :  { %v2209_v2 = vadd.f32 %v2207_v10, %v2199_v13 }
0x3a6d   :  { %4173 = vtanh.f32 %v2209_v2  ;;  %v2266_v51 = vrot.slane %v2209_v2, 6 }
0x3a73   :  { %v4174_v59 = vpop.eup %4173 }
0x3a74   :  { %2212 = vrot.lane.b32.xlu2 %v4174_v59, %s4324_s3 }
0x3ace   :  { %v2213_v3 = vpop.permute.xlu2 %2212 }
0x3acf   :  { %v5031_v25 = vmul.f32 %v2213_v3, %v2193_v44 }
0x3ad1   :  { %2217 = vrot.lane.b32.xlu0 %v5031_v25, %s4325_s9 }
0x3b43   :  { %v5035_v8 = vpop.permute.xlu0 %2217 }
0x3b44   :  { %3839 = vmatmul.msk.f32.vlgmr.msra.gmra.mxu2 %vm141_vm7, %v5035_v8 }
0x3b45   :  { %2719 = vmatpush.msra.mxu2 %v5042_v9 }
0x3b47   :  { %2720 = vmatpush.msra.mxu2 %v5048_v53 }
0x3b49   :  { %2721 = vmatpush.msra.mxu2 %v5054_v46 }
0x3b4b   :  { %2722 = vmatpush.msra.mxu2 %v5060_v15 }
0x3bc7   :  { %v2238_v33 = vpop.f32.mrf.mxu2 }
0x3bc8   :  { %v2242_v16 = vrot.slane %v2238_v33, 6 }
0x3bca   :  { %v2244_v27 = vadd.f32 %v2242_v16, %v5025_v39 }
0x3bcc   :  { %4175 = vtanh.f32 %v2244_v27  ;;  %v3840_v60 = vmul.f32 -1.442695, %v2244_v27 }
0x3bce   :  { %4177 = vpow2.f32 %v3840_v60 }
0x3bd2   :  { %v4176_v54 = vpop.eup %4175 }
0x3bd3   :  { %2270 = vrot.lane.b32.xlu1 %v4176_v54, %s4324_s3 }
0x3bd4   :  { %v4178_v28 = vpop.eup %4177 }
0x3bd5   :  { %v2248_v4 = vadd.f32 1.0, %v4178_v28 }
0x3bd7   :  { %4179 = vrcp.f32 %v2248_v4  ;;  %v2260_v37 = vand.u32 2147483648, %v2248_v4  ;;  %vm2254_vm5 = vweird.f32 %v2248_v4  ;;  %v2258_v50 = vand.u32 2147483647, %v2248_v4 }
0x3bd9   :  { %v2261_v58 = vor.u32 1.1754944e-38, %v2260_v37  ;;  %vm2259_vm9 = vcmp.eq.f32.partialorder %v2258_v50, 8.507059e+37 }
0x3bdd   :  { %v4180_v26 = vpop.eup %4179 }
0x3bde   :  { %v2250_v6 = vmul.f32 %v4180_v26, %v2248_v4  ;;  %vm2255_vm4 = vweird.f32 %v4180_v26 }
0x3bdf   :  { %vm2256_vm6 = vmor %vm2254_vm5, %vm2255_vm4 }
0x3be0   :  { %v2251_v31 = vsub.f32 1.0, %v2250_v6 }
0x3be2   :  { %v2252_v56 = vmul.f32 %v4180_v26, %v2251_v31 }
0x3be4   :  { %v2253_v36 = vadd.f32 %v4180_v26, %v2252_v56 }
0x3be6   :  { %v2257_v41 = vsel %vm2256_vm6, %v4180_v26, %v2253_v36 }
0x3be7   :  { %v2262_v48 = vsel %vm2259_vm9, %v2261_v58, %v2257_v41 }
0x3be8   :  { %v2268_v34 = vmul.f32 %v2266_v51, %v2262_v48 }
0x3c45   :  { %v2271_v43 = vpop.permute.xlu1 %2270 }
0x3c46   :  { %v2273_v19 = vmul.f32 %v2271_v43, %v2262_v48 }
0x3c48   :  { %2275 = vrot.lane.b32.xlu2 %v2273_v19, %s4324_s3 }
0x3ca2   :  { %v2276_v61 = vpop.permute.xlu2 %2275 }
0x3ca3   :  { %v2278_v52 = vadd.f32 %v2276_v61, %v2268_v34 }
0x3ca5   :  { %4181 = vtanh.f32 %v2278_v52  ;;  %v2336_v56 = vrot.slane %v2278_v52, 6 }
0x3cab   :  { %v4182_v35 = vpop.eup %4181 }
0x3cac   :  { %2281 = vrot.lane.b32.xlu0 %v4182_v35, %s4324_s3 }
0x3d1e   :  { %v2282_v42 = vpop.permute.xlu0 %2281 }
0x3d1f   :  { %v5067_v62 = vmul.f32 %v2282_v42, %v2262_v48 }
0x3d21   :  { %v2286_v40 = vrot.slane %v5067_v62, 2 }
0x3d23   :  { %2287 = vrot.lane.b32.xlu1 %v2286_v40, %s4325_s9 }
0x3d95   :  { %v2288_v57 = vpop.permute.xlu1 %2287 }
0x3d96   :  { %3841 = vmatmul.msk.f32.vlgmr.msra.gmra.mxu3 %vm141_vm7, %v2288_v57 }
0x3d97   :  { %2785 = vmatpush.msra.mxu3 %v5042_v9 }
0x3d99   :  { %2786 = vmatpush.msra.mxu3 %v5048_v53 }
0x3d9b   :  { %2787 = vmatpush.msra.mxu3 %v5054_v46 }
0x3d9d   :  { %2788 = vmatpush.msra.mxu3 %v5060_v15 }
0x3e19   :  { %v2308_v22 = vpop.f32.mrf.mxu3 }
0x3e1a   :  { %v2312_v44 = vrot.slane %v2308_v22, 4 }
0x3e1c   :  { %v2314_v1 = vadd.f32 %v2312_v44, %v5025_v39 }
0x3e1e   :  { %4183 = vtanh.f32 %v2314_v1  ;;  %v3842_v13 = vmul.f32 -1.442695, %v2314_v1 }
0x3e20   :  { %4185 = vpow2.f32 %v3842_v13 }
0x3e24   :  { %v4184_v20 = vpop.eup %4183 }
0x3e25   :  { %2340 = vrot.lane.b32.xlu2 %v4184_v20, %s4324_s3 }
0x3e26   :  { %v4186_v10 = vpop.eup %4185 }
0x3e27   :  { %v2318_v2 = vadd.f32 1.0, %v4186_v10 }
0x3e29   :  { %4187 = vrcp.f32 %v2318_v2  ;;  %v2330_v54 = vand.u32 2147483648, %v2318_v2  ;;  %vm2324_vm11 = vweird.f32 %v2318_v2  ;;  %v2328_v60 = vand.u32 2147483647, %v2318_v2 }
0x3e2b   :  { %v2331_v4 = vor.u32 1.1754944e-38, %v2330_v54  ;;  %vm2329_vm13 = vcmp.eq.f32.partialorder %v2328_v60, 8.507059e+37 }
0x3e2f   :  { %v4188_v59 = vpop.eup %4187 }
0x3e30   :  { %v2320_v3 = vmul.f32 %v4188_v59, %v2318_v2  ;;  %vm2325_vm10 = vweird.f32 %v4188_v59 }
0x3e31   :  { %vm2326_vm12 = vmor %vm2324_vm11, %vm2325_vm10 }
0x3e32   :  { %v2321_v33 = vsub.f32 1.0, %v2320_v3 }
0x3e34   :  { %v2322_v16 = vmul.f32 %v4188_v59, %v2321_v33 }
0x3e36   :  { %v2323_v27 = vadd.f32 %v4188_v59, %v2322_v16 }
0x3e38   :  { %v2327_v28 = vsel %vm2326_vm12, %v4188_v59, %v2323_v27 }
0x3e39   :  { %v2332_v6 = vsel %vm2329_vm13, %v2331_v4, %v2327_v28 }
0x3e3a   :  { %v2338_v36 = vmul.f32 %v2336_v56, %v2332_v6 }
0x3e7f   :  { %v2341_v26 = vpop.permute.xlu2 %2340 }
0x3e80   :  { %v2343_v31 = vmul.f32 %v2341_v26, %v2332_v6 }
0x3e82   :  { %2345 = vrot.lane.b32.xlu0 %v2343_v31, %s4324_s3 }
0x3ef4   :  { %v2346_v37 = vpop.permute.xlu0 %2345 }
0x3ef5   :  { %v2348_v50 = vadd.f32 %v2346_v37, %v2338_v36 }
0x3ef7   :  { %4189 = vtanh.f32 %v2348_v50  ;;  %v2406_v59 = vrot.slane %v2348_v50, 6 }
0x3efd   :  { %v4190_v41 = vpop.eup %4189 }
0x3efe   :  { %2351 = vrot.lane.b32.xlu1 %v4190_v41, %s4324_s3 }
0x3f70   :  { %v2352_v58 = vpop.permute.xlu1 %2351 }
0x3f71   :  { %v5082_v43 = vmul.f32 %v2352_v58, %v2332_v6  ;;  %v5110_v6 = vld [vmem:[%s5447_s6] ss:$0 sm:$0xff] }
0x3f73   :  { %v2356_v48 = vrot.slane %v5082_v43, 4 }
0x3f75   :  { %2357 = vrot.lane.b32.xlu2 %v2356_v48, %s4325_s9 }
0x3fcf   :  { %v2358_v19 = vpop.permute.xlu2 %2357 }
0x3fd0   :  { %3843 = vmatmul.msk.f32.vlgmr.msra.gmra.mxu0 %vm141_vm7, %v2358_v19 }
0x3fd1   :  { %2855 = vmatpush.msra.mxu0 %v5042_v9 }
0x3fd3   :  { %2856 = vmatpush.msra.mxu0 %v5048_v53 }
0x3fd5   :  { %2857 = vmatpush.msra.mxu0 %v5054_v46 }
0x3fd7   :  { %2858 = vmatpush.msra.mxu0 %v5060_v15 }
0x404d   :  { %v2378_v51 = vpop.f32.mrf.mxu0 }
0x404e   :  { %v2382_v34 = vrot.slane %v2378_v51, 2 }
0x4050   :  { %v2384_v61 = vadd.f32 %v2382_v34, %v5025_v39 }
0x4052   :  { %4191 = vtanh.f32 %v2384_v61  ;;  %v3844_v35 = vmul.f32 -1.442695, %v2384_v61 }
0x4054   :  { %4193 = vpow2.f32 %v3844_v35 }
0x4058   :  { %v4192_v52 = vpop.eup %4191 }
0x4059   :  { %2410 = vrot.lane.b32.xlu0 %v4192_v52, %s4324_s3 }
0x405a   :  { %v4194_v42 = vpop.eup %4193 }
0x405b   :  { %v2388_v57 = vadd.f32 1.0, %v4194_v42 }
0x405d   :  { %4195 = vrcp.f32 %v2388_v57  ;;  %v2400_v15 = vand.u32 2147483648, %v2388_v57  ;;  %vm2394_vm15 = vweird.f32 %v2388_v57  ;;  %v2398_v1 = vand.u32 2147483647, %v2388_v57 }
0x405f   :  { %v2401_v20 = vor.u32 1.1754944e-38, %v2400_v15  ;;  %vm2399_vm4 = vcmp.eq.f32.partialorder %v2398_v1, 8.507059e+37 }
0x4063   :  { %v4196_v9 = vpop.eup %4195 }
0x4064   :  { %v2390_v22 = vmul.f32 %v4196_v9, %v2388_v57  ;;  %vm2395_vm14 = vweird.f32 %v4196_v9 }
0x4065   :  { %vm2396_vm3 = vmor %vm2394_vm15, %vm2395_vm14 }
0x4066   :  { %v2391_v53 = vsub.f32 1.0, %v2390_v22 }
0x4068   :  { %v2392_v44 = vmul.f32 %v4196_v9, %v2391_v53 }
0x406a   :  { %v2393_v46 = vadd.f32 %v4196_v9, %v2392_v44 }
0x406c   :  { %v2397_v39 = vsel %vm2396_vm3, %v4196_v9, %v2393_v46 }
0x406d   :  { %v2402_v10 = vsel %vm2399_vm4, %v2401_v20, %v2397_v39 }
0x406e   :  { %v2408_v3 = vmul.f32 %v2406_v59, %v2402_v10 }
0x40cb   :  { %v2411_v13 = vpop.permute.xlu0 %2410 }
0x40cc   :  { %v2413_v2 = vmul.f32 %v2411_v13, %v2402_v10 }
0x40ce   :  { %2415 = vrot.lane.b32.xlu1 %v2413_v2, %s4324_s3 }
0x40d6   :  { %1556 = vrot.lane.b32.xlu1 %v4762_v14, %s4325_s9 }
0x4140   :  { %v2416_v33 = vpop.permute.xlu1 %2415 }
0x4141   :  { %v2418_v16 = vadd.f32 %v2416_v33, %v2408_v3 }
0x4143   :  { %4197 = vtanh.f32 %v2418_v16  ;;  %v2473_v46 = vrot.slane %v2418_v16, 6 }
0x4148   :  { %v1557_v27 = vpop.permute.xlu1 %1556 }
0x4149   :  { %v4198_v54 = vpop.eup %4197  ;;  %3820 = vmatmul.msk.f32.gmra.mxu1 %vm141_vm7, %v1557_v27 }
0x414a   :  { %2421 = vrot.lane.b32.xlu2 %v4198_v54, %s4324_s3 }
0x41a4   :  { %v2422_v60 = vpop.permute.xlu2 %2421 }
0x41a5   :  { %v5100_v28 = vmul.f32 %v2422_v60, %v2402_v10 }
0x41a7   :  { %v2426_v4 = vrot.slane %v5100_v28, 6 }
0x41a9   :  { %2427 = vrot.lane.b32.xlu0 %v2426_v4, %s4325_s9 }
0x41c6   :  { %v1596_v26 = vpop.f32.mrf.mxu1 }
0x41c7   :  { %v5113_v31 = vadd.f32 %v5110_v6, %v1596_v26 }
0x421b   :  { %v2428_v14 = vpop.permute.xlu0 %2427 }
0x421c   :  { %3845 = vmatmul.msk.f32.vlgmr.msrb.gmra.mxu2 %vm141_vm7, %v2428_v14 }
0x429f   :  { %v2448_v56 = vpop.f32.mrf.mxu2 }
0x42a0   :  { %v2451_v36 = vadd.f32 %v2448_v56, %v5113_v31 }
0x42a2   :  { %4199 = vtanh.f32 %v2451_v36  ;;  %v3846_v50 = vmul.f32 -1.442695, %v2451_v36 }
0x42a4   :  { %4201 = vpow2.f32 %v3846_v50 }
0x42a8   :  { %v4200_v37 = vpop.eup %4199 }
0x42a9   :  { %2477 = vrot.lane.b32.xlu2 %v4200_v37, %s4324_s3 }
0x42aa   :  { %v4202_v41 = vpop.eup %4201 }
0x42ab   :  { %v2455_v58 = vadd.f32 1.0, %v4202_v41 }
0x42ad   :  { %4203 = vrcp.f32 %v2455_v58  ;;  %v2467_v35 = vand.u32 2147483648, %v2455_v58  ;;  %vm2461_vm6 = vweird.f32 %v2455_v58  ;;  %v2465_v42 = vand.u32 2147483647, %v2455_v58 }
0x42af   :  { %v2468_v9 = vor.u32 1.1754944e-38, %v2467_v35  ;;  %vm2466_vm10 = vcmp.eq.f32.partialorder %v2465_v42, 8.507059e+37 }
0x42b3   :  { %v4204_v19 = vpop.eup %4203 }
0x42b4   :  { %v2457_v51 = vmul.f32 %v4204_v19, %v2455_v58  ;;  %vm2462_vm5 = vweird.f32 %v4204_v19 }
0x42b5   :  { %vm2463_vm9 = vmor %vm2461_vm6, %vm2462_vm5 }
0x42b6   :  { %v2458_v34 = vsub.f32 1.0, %v2457_v51 }
0x42b8   :  { %v2459_v61 = vmul.f32 %v4204_v19, %v2458_v34 }
0x42ba   :  { %v2460_v52 = vadd.f32 %v4204_v19, %v2459_v61 }
0x42bc   :  { %v2464_v57 = vsel %vm2463_vm9, %v4204_v19, %v2460_v52 }
0x42bd   :  { %v2469_v53 = vsel %vm2466_vm10, %v2468_v9, %v2464_v57 }
0x42be   :  { %v2475_v15 = vmul.f32 %v2473_v46, %v2469_v53 }
0x4303   :  { %v2478_v22 = vpop.permute.xlu2 %2477 }
0x4304   :  { %v2480_v44 = vmul.f32 %v2478_v22, %v2469_v53 }
0x4306   :  { %2482 = vrot.lane.b32.xlu0 %v2480_v44, %s4324_s3 }
0x4378   :  { %v2483_v1 = vpop.permute.xlu0 %2482 }
0x4379   :  { %v2485_v39 = vadd.f32 %v2483_v1, %v2475_v15 }
0x437b   :  { %4205 = vtanh.f32 %v2485_v39  ;;  %v2542_v35 = vrot.slane %v2485_v39, 6 }
0x4381   :  { %v4206_v20 = vpop.eup %4205 }
0x4382   :  { %2488 = vrot.lane.b32.xlu1 %v4206_v20, %s4324_s3 }
0x43f4   :  { %v2489_v13 = vpop.permute.xlu1 %2488 }
0x43f5   :  { %v5119_v10 = vmul.f32 %v2489_v13, %v2469_v53  ;;  %v3816_v53 = vmul.f32 -1.442695, %v4922_v7 }
0x43f7   :  { %2493 = vrot.lane.b32.xlu2 %v5119_v10, %s4325_s9 }
0x4451   :  { %v5123_v2 = vpop.permute.xlu2 %2493 }
0x4452   :  { %3847 = vmatmul.msk.f32.vlgmr.msrb.gmra.mxu3 %vm141_vm7, %v5123_v2 }
0x44d5   :  { %v2514_v59 = vpop.f32.mrf.mxu3 }
0x44d6   :  { %v2518_v3 = vrot.slane %v2514_v59, 6 }
0x44d8   :  { %v2520_v33 = vadd.f32 %v2518_v3, %v5113_v31 }
0x44da   :  { %4207 = vtanh.f32 %v2520_v33  ;;  %v3848_v27 = vmul.f32 -1.442695, %v2520_v33 }
0x44dc   :  { %4209 = vpow2.f32 %v3848_v27 }
0x44e0   :  { %v4208_v16 = vpop.eup %4207 }
0x44e1   :  { %2546 = vrot.lane.b32.xlu0 %v4208_v16, %s4324_s3 }
0x44e2   :  { %v4210_v54 = vpop.eup %4209 }
0x44e3   :  { %v2524_v60 = vadd.f32 1.0, %v4210_v54 }
0x44e5   :  { %4211 = vrcp.f32 %v2524_v60  ;;  %v2536_v50 = vand.u32 2147483648, %v2524_v60  ;;  %vm2530_vm12 = vweird.f32 %v2524_v60  ;;  %v2534_v41 = vand.u32 2147483647, %v2524_v60 }
0x44e6   :  { %4213 = vtanh.f32 %v4922_v7 }
0x44e7   :  { %v2537_v19 = vor.u32 1.1754944e-38, %v2536_v50  ;;  %vm2535_vm14 = vcmp.eq.f32.partialorder %v2534_v41, 8.507059e+37 }
0x44eb   :  { %v4212_v14 = vpop.eup %4211 }
0x44ec   :  { %v2526_v26 = vmul.f32 %v4212_v14, %v2524_v60  ;;  %vm2531_vm11 = vweird.f32 %v4212_v14  ;;  %v4214_v52 = vpop.eup %4213 }
0x44ed   :  { %vm2532_vm13 = vmor %vm2530_vm12, %vm2531_vm11 }
0x44ee   :  { %v2527_v56 = vsub.f32 1.0, %v2526_v26 }
0x44f0   :  { %v2528_v36 = vmul.f32 %v4212_v14, %v2527_v56 }
0x44f2   :  { %v2529_v37 = vadd.f32 %v4212_v14, %v2528_v36 }
0x44f4   :  { %v2533_v58 = vsel %vm2532_vm13, %v4212_v14, %v2529_v37 }
0x44f5   :  { %v2538_v34 = vsel %vm2535_vm14, %v2537_v19, %v2533_v58 }
0x44f6   :  { %v2544_v42 = vmul.f32 %v2542_v35, %v2538_v34 }
0x4553   :  { %v2547_v51 = vpop.permute.xlu0 %2546 }
0x4554   :  { %v2549_v61 = vmul.f32 %v2547_v51, %v2538_v34 }
0x4556   :  { %2551 = vrot.lane.b32.xlu1 %v2549_v61, %s4324_s3 }
0x455e   :  { %1474 = vrot.lane.b32.xlu1 %v4214_v52, %s4324_s3 }
0x45c8   :  { %v2552_v57 = vpop.permute.xlu1 %2551 }
0x45c9   :  { %v5132_v9 = vadd.f32 %v2552_v57, %v2544_v42 }
0x45cb   :  { %4215 = vtanh.f32 %v5132_v9 }
0x45cc   :  { %4217 = vpow2.f32 %v3816_v53 }
0x45d0   :  { %v1475_v54 = vpop.permute.xlu1 %1474 }
0x45d1   :  { %v4216_v22 = vpop.eup %4215 }
0x45d2   :  { %2557 = vrot.lane.b32.xlu2 %v4216_v22, %s4324_s3  ;;  %v4218_v44 = vpop.eup %4217 }
0x45d3   :  { %v1455_v46 = vadd.f32 1.0, %v4218_v44 }
0x45d5   :  { %4219 = vrcp.f32 %v1455_v46  ;;  %v1467_v16 = vand.u32 2147483648, %v1455_v46  ;;  %vm1461_vm3 = vweird.f32 %v1455_v46  ;;  %v1465_v27 = vand.u32 2147483647, %v1455_v46 }
0x45d7   :  { %v1468_v60 = vor.u32 1.1754944e-38, %v1467_v16  ;;  %vm1466_vm5 = vcmp.eq.f32.partialorder %v1465_v27, 8.507059e+37 }
0x45db   :  { %v4220_v15 = vpop.eup %4219 }
0x45dc   :  { %v1457_v1 = vmul.f32 %v4220_v15, %v1455_v46  ;;  %vm1462_vm15 = vweird.f32 %v4220_v15 }
0x45dd   :  { %vm1463_vm4 = vmor %vm1461_vm3, %vm1462_vm15 }
0x45de   :  { %v1458_v20 = vsub.f32 1.0, %v1457_v1 }
0x45e0   :  { %v1459_v13 = vmul.f32 %v4220_v15, %v1458_v20 }
0x45e2   :  { %v1460_v3 = vadd.f32 %v4220_v15, %v1459_v13 }
0x45e4   :  { %v1464_v7 = vsel %vm1463_vm4, %v4220_v15, %v1460_v3 }
0x45e5   :  { %v1469_v14 = vsel %vm1466_vm5, %v1468_v60, %v1464_v7 }
0x45e6   :  { %v1477_v26 = vmul.f32 %v1475_v54, %v1469_v14  ;;  %v1472_v58 = vmul.f32 %v1469_v14, %v4892_v18  ;;  %v2612_v54 = vrot.slane %v5132_v9, 6 }
0x462c   :  { %v2558_v39 = vpop.permute.xlu2 %2557 }
0x462d   :  { %v5137_v59 = vmul.f32 %v2558_v39, %v2538_v34 }
0x462f   :  { %v2562_v33 = vrot.slane %v5137_v59, 2 }
0x4631   :  { %2563 = vrot.lane.b32.xlu0 %v2562_v33, %s4325_s9 }
0x4639   :  { %1479 = vrot.lane.b32.xlu0 %v1477_v26, %s4324_s3 }
0x46a3   :  { %v2564_v56 = vpop.permute.xlu0 %2563 }
0x46a4   :  { %3849 = vmatmul.msk.f32.vlgmr.msrb.gmra.mxu0 %vm141_vm7, %v2564_v56 }
0x46ab   :  { %v1480_v41 = vpop.permute.xlu0 %1479 }
0x46ac   :  { %v1482_v19 = vadd.f32 %v1480_v41, %v1472_v58 }
0x4721   :  { %v2584_v36 = vpop.f32.mrf.mxu0 }
0x4722   :  { %v2588_v37 = vrot.slane %v2584_v36, 4 }
0x4724   :  { %v2590_v50 = vadd.f32 %v2588_v37, %v5113_v31 }
0x4726   :  { %4221 = vtanh.f32 %v2590_v50  ;;  %v3850_v61 = vmul.f32 -1.442695, %v2590_v50 }
0x4727   :  { %4223 = vtanh.f32 %v1482_v19 }
0x4728   :  { %4225 = vpow2.f32 %v3850_v61 }
0x472c   :  { %v4222_v51 = vpop.eup %4221 }
0x472d   :  { %2616 = vrot.lane.b32.xlu2 %v4222_v51, %s4324_s3  ;;  %v4224_v34 = vpop.eup %4223 }
0x472e   :  { %v4226_v52 = vpop.eup %4225 }
0x472f   :  { %v2594_v35 = vadd.f32 1.0, %v4226_v52 }
0x4731   :  { %4227 = vrcp.f32 %v2594_v35  ;;  %v2606_v18 = vand.u32 2147483648, %v2594_v35  ;;  %vm2600_vm9 = vweird.f32 %v2594_v35  ;;  %v2604_v46 = vand.u32 2147483647, %v2594_v35 }
0x4733   :  { %v2607_v1 = vor.u32 1.1754944e-38, %v2606_v18  ;;  %vm2605_vm11 = vcmp.eq.f32.partialorder %v2604_v46, 8.507059e+37 }
0x4735   :  { %1485 = vrot.lane.b32.xlu2 %v4224_v34, %s4324_s3 }
0x4737   :  { %v4228_v42 = vpop.eup %4227 }
0x4738   :  { %v2596_v57 = vmul.f32 %v4228_v42, %v2594_v35  ;;  %vm2601_vm6 = vweird.f32 %v4228_v42 }
0x4739   :  { %vm2602_vm10 = vmor %vm2600_vm9, %vm2601_vm6 }
0x473a   :  { %v2597_v22 = vsub.f32 1.0, %v2596_v57 }
0x473c   :  { %v2598_v53 = vmul.f32 %v4228_v42, %v2597_v22 }
0x473e   :  { %v2599_v44 = vadd.f32 %v4228_v42, %v2598_v53 }
0x4740   :  { %v2603_v15 = vsel %vm2602_vm10, %v4228_v42, %v2599_v44 }
0x4741   :  { %v2608_v13 = vsel %vm2605_vm11, %v2607_v1, %v2603_v15 }
0x4742   :  { %v2614_v60 = vmul.f32 %v2612_v54, %v2608_v13 }
0x4787   :  { %v2617_v20 = vpop.permute.xlu2 %2616 }
0x4788   :  { %v2619_v39 = vmul.f32 %v2617_v20, %v2608_v13 }
0x478a   :  { %2621 = vrot.lane.b32.xlu1 %v2619_v39, %s4324_s3 }
0x478f   :  { %v1486_v3 = vpop.permute.xlu2 %1485 }
0x4790   :  { %v1488_v16 = vmul.f32 %v1486_v3, %v1469_v14 }
0x4792   :  { %v1532_v27 = vrot.slane %v1488_v16, 2 }
0x4794   :  { %v1536_v7 = vsel %vm1516_vm8, %v4903_v55, %v1532_v27 }
0x4795   :  { %1558 = vrot.lane.b32.xlu1 %v1536_v7, %s4325_s9 }
0x47fc   :  { %v2622_v26 = vpop.permute.xlu1 %2621 }
0x47fd   :  { %v2624_v56 = vadd.f32 %v2622_v26, %v2614_v60 }
0x47ff   :  { %4229 = vtanh.f32 %v2624_v56  ;;  %v2682_v39 = vrot.slane %v2624_v56, 6 }
0x4805   :  { %v4230_v36 = vpop.eup %4229 }
0x4806   :  { %2627 = vrot.lane.b32.xlu0 %v4230_v36, %s4324_s3 }
0x4807   :  { %v1559_v37 = vpop.permute.xlu1 %1558 }
0x4808   :  { %3821 = vmatmul.msk.f32.gmra.mxu1 %vm141_vm7, %v1559_v37 }
0x4878   :  { %v2628_v50 = vpop.permute.xlu0 %2627 }
0x4879   :  { %v5156_v14 = vmul.f32 %v2628_v50, %v2608_v13 }
0x487b   :  { %v2632_v41 = vrot.slane %v5156_v14, 4 }
0x487d   :  { %2633 = vrot.lane.b32.xlu2 %v2632_v41, %s4325_s9 }
0x4885   :  { %v1599_v9 = vpop.f32.mrf.mxu1 }
0x4886   :  { %v5175_v56 = vadd.f32 %v5110_v6, %v1599_v9 }
0x48d7   :  { %v2634_v55 = vpop.permute.xlu2 %2633 }
0x48d8   :  { %3851 = vmatmul.msk.f32.vlgmr.msrb.gmra.mxu1 %vm141_vm7, %v2634_v55 }
0x4955   :  { %v2654_v58 = vpop.f32.mrf.mxu1 }
0x4956   :  { %v2658_v19 = vrot.slane %v2654_v58, 2 }
0x4958   :  { %v2660_v51 = vadd.f32 %v2658_v19, %v5113_v31 }
0x495a   :  { %4231 = vtanh.f32 %v2660_v51  ;;  %v3852_v61 = vmul.f32 -1.442695, %v2660_v51 }
0x495c   :  { %4233 = vpow2.f32 %v3852_v61 }
0x4960   :  { %v4232_v34 = vpop.eup %4231 }
0x4961   :  { %2686 = vrot.lane.b32.xlu0 %v4232_v34, %s4324_s3 }
0x4962   :  { %v4234_v52 = vpop.eup %4233 }
0x4963   :  { %v2664_v35 = vadd.f32 1.0, %v4234_v52 }
0x4965   :  { %4235 = vrcp.f32 %v2664_v35  ;;  %v2676_v18 = vand.u32 2147483648, %v2664_v35  ;;  %vm2670_vm13 = vweird.f32 %v2664_v35  ;;  %v2674_v46 = vand.u32 2147483647, %v2664_v35 }
0x4967   :  { %v2677_v15 = vor.u32 1.1754944e-38, %v2676_v18  ;;  %vm2675_vm15 = vcmp.eq.f32.partialorder %v2674_v46, 8.507059e+37 }
0x496b   :  { %v4236_v42 = vpop.eup %4235 }
0x496c   :  { %v2666_v57 = vmul.f32 %v4236_v42, %v2664_v35  ;;  %vm2671_vm12 = vweird.f32 %v4236_v42 }
0x496d   :  { %vm2672_vm14 = vmor %vm2670_vm13, %vm2671_vm12 }
0x496e   :  { %v2667_v22 = vsub.f32 1.0, %v2666_v57 }
0x4970   :  { %v2668_v53 = vmul.f32 %v4236_v42, %v2667_v22 }
0x4972   :  { %v2669_v44 = vadd.f32 %v4236_v42, %v2668_v53 }
0x4974   :  { %v2673_v31 = vsel %vm2672_vm14, %v4236_v42, %v2669_v44 }
0x4975   :  { %v2678_v20 = vsel %vm2675_vm15, %v2677_v15, %v2673_v31 }
0x4976   :  { %v2684_v3 = vmul.f32 %v2682_v39, %v2678_v20 }
0x49d3   :  { %v2687_v1 = vpop.permute.xlu0 %2686 }
0x49d4   :  { %v2689_v13 = vmul.f32 %v2687_v1, %v2678_v20 }
0x49d6   :  { %2691 = vrot.lane.b32.xlu1 %v2689_v13, %s4324_s3 }
0x4a48   :  { %v2692_v16 = vpop.permute.xlu1 %2691 }
0x4a49   :  { %v2694_v27 = vadd.f32 %v2692_v16, %v2684_v3 }
0x4a4b   :  { %4237 = vtanh.f32 %v2694_v27  ;;  %v2749_v46 = vrot.slane %v2694_v27, 6 }
0x4a51   :  { %v4238_v7 = vpop.eup %4237 }
0x4a52   :  { %2697 = vrot.lane.b32.xlu2 %v4238_v7, %s4324_s3 }
0x4aac   :  { %v2698_v54 = vpop.permute.xlu2 %2697 }
0x4aad   :  { %v5167_v60 = vmul.f32 %v2698_v54, %v2678_v20 }
0x4aaf   :  { %v2702_v26 = vrot.slane %v5167_v60, 6 }
0x4ab1   :  { %2703 = vrot.lane.b32.xlu0 %v2702_v26, %s4325_s9 }
0x4b23   :  { %v2704_v36 = vpop.permute.xlu0 %2703 }
0x4b24   :  { %3853 = vmatmul.msk.f32.vlgmr.msra.gmra.mxu2 %vm141_vm7, %v2704_v36 }
0x4ba7   :  { %v2724_v37 = vpop.f32.mrf.mxu2 }
0x4ba8   :  { %v2727_v50 = vadd.f32 %v2724_v37, %v5175_v56 }
0x4baa   :  { %4239 = vtanh.f32 %v2727_v50  ;;  %v3854_v58 = vmul.f32 -1.442695, %v2727_v50 }
0x4bac   :  { %4241 = vpow2.f32 %v3854_v58 }
0x4bb0   :  { %v4240_v55 = vpop.eup %4239 }
0x4bb1   :  { %2753 = vrot.lane.b32.xlu1 %v4240_v55, %s4324_s3 }
0x4bb2   :  { %v4242_v19 = vpop.eup %4241 }
0x4bb3   :  { %v2731_v51 = vadd.f32 1.0, %v4242_v19 }
0x4bb5   :  { %4243 = vrcp.f32 %v2731_v51  ;;  %v2743_v6 = vand.u32 2147483648, %v2731_v51  ;;  %vm2737_vm4 = vweird.f32 %v2731_v51  ;;  %v2741_v9 = vand.u32 2147483647, %v2731_v51 }
0x4bb7   :  { %v2744_v22 = vor.u32 1.1754944e-38, %v2743_v6  ;;  %vm2742_vm6 = vcmp.eq.f32.partialorder %v2741_v9, 8.507059e+37 }
0x4bbb   :  { %v4244_v34 = vpop.eup %4243 }
0x4bbc   :  { %v2733_v61 = vmul.f32 %v4244_v34, %v2731_v51  ;;  %vm2738_vm3 = vweird.f32 %v4244_v34 }
0x4bbd   :  { %vm2739_vm5 = vmor %vm2737_vm4, %vm2738_vm3 }
0x4bbe   :  { %v2734_v52 = vsub.f32 1.0, %v2733_v61 }
0x4bc0   :  { %v2735_v35 = vmul.f32 %v4244_v34, %v2734_v52 }
0x4bc2   :  { %v2736_v42 = vadd.f32 %v4244_v34, %v2735_v35 }
0x4bc4   :  { %v2740_v57 = vsel %vm2739_vm5, %v4244_v34, %v2736_v42 }
0x4bc5   :  { %v2745_v44 = vsel %vm2742_vm6, %v2744_v22, %v2740_v57 }
0x4bc6   :  { %v2751_v31 = vmul.f32 %v2749_v46, %v2745_v44 }
0x4c23   :  { %v2754_v53 = vpop.permute.xlu1 %2753 }
0x4c24   :  { %v2756_v18 = vmul.f32 %v2754_v53, %v2745_v44 }
0x4c26   :  { %2758 = vrot.lane.b32.xlu2 %v2756_v18, %s4324_s3 }
0x4c80   :  { %v2759_v15 = vpop.permute.xlu2 %2758 }
0x4c81   :  { %v2761_v1 = vadd.f32 %v2759_v15, %v2751_v31 }
0x4c83   :  { %4245 = vtanh.f32 %v2761_v1  ;;  %v2818_v22 = vrot.slane %v2761_v1, 6 }
0x4c89   :  { %v4246_v20 = vpop.eup %4245 }
0x4c8a   :  { %2764 = vrot.lane.b32.xlu0 %v4246_v20, %s4324_s3 }
0x4cfc   :  { %v2765_v13 = vpop.permute.xlu0 %2764 }
0x4cfd   :  { %v5181_v39 = vmul.f32 %v2765_v13, %v2745_v44 }
0x4cff   :  { %2769 = vrot.lane.b32.xlu1 %v5181_v39, %s4325_s9 }
0x4d71   :  { %v5185_v3 = vpop.permute.xlu1 %2769 }
0x4d72   :  { %3855 = vmatmul.msk.f32.vlgmr.msra.gmra.mxu3 %vm141_vm7, %v5185_v3 }
0x4df5   :  { %v2790_v16 = vpop.f32.mrf.mxu3 }
0x4df6   :  { %v2794_v27 = vrot.slane %v2790_v16, 6 }
0x4df8   :  { %v2796_v7 = vadd.f32 %v2794_v27, %v5175_v56 }
0x4dfa   :  { %4247 = vtanh.f32 %v2796_v7  ;;  %v3856_v36 = vmul.f32 -1.442695, %v2796_v7 }
0x4dfc   :  { %4249 = vpow2.f32 %v3856_v36 }
0x4e00   :  { %v4248_v54 = vpop.eup %4247 }
0x4e01   :  { %2822 = vrot.lane.b32.xlu2 %v4248_v54, %s4324_s3 }
0x4e02   :  { %v4250_v37 = vpop.eup %4249 }
0x4e03   :  { %v2800_v50 = vadd.f32 1.0, %v4250_v37 }
0x4e05   :  { %4251 = vrcp.f32 %v2800_v50  ;;  %v2812_v61 = vand.u32 2147483648, %v2800_v50  ;;  %vm2806_vm10 = vweird.f32 %v2800_v50  ;;  %v2810_v52 = vand.u32 2147483647, %v2800_v50 }
0x4e07   :  { %v2813_v42 = vor.u32 1.1754944e-38, %v2812_v61  ;;  %vm2811_vm12 = vcmp.eq.f32.partialorder %v2810_v52, 8.507059e+37 }
0x4e0b   :  { %v4252_v55 = vpop.eup %4251 }
0x4e0c   :  { %v2802_v58 = vmul.f32 %v4252_v55, %v2800_v50  ;;  %vm2807_vm9 = vweird.f32 %v4252_v55 }
0x4e0d   :  { %vm2808_vm11 = vmor %vm2806_vm10, %vm2807_vm9  ;;  %vm3071_vm10 = vcmask 259076  }
0x4e0e   :  { %v2803_v19 = vsub.f32 1.0, %v2802_v58 }
0x4e10   :  { %v2804_v51 = vmul.f32 %v4252_v55, %v2803_v19 }
0x4e12   :  { %v2805_v34 = vadd.f32 %v4252_v55, %v2804_v51 }
0x4e14   :  { %v2809_v35 = vsel %vm2808_vm11, %v4252_v55, %v2805_v34  ;;  %vm3167_vm11 = vcmask 7168  }
0x4e15   :  { %v2814_v9 = vsel %vm2811_vm12, %v2813_v42, %v2809_v35  ;;  %vm3169_vm12 = vcmask 15360  }
0x4e16   :  { %v2820_v53 = vmul.f32 %v2818_v22, %v2814_v9 }
0x4e5b   :  { %v2823_v6 = vpop.permute.xlu2 %2822 }
0x4e5c   :  { %v2825_v57 = vmul.f32 %v2823_v6, %v2814_v9 }
0x4e5e   :  { %2827 = vrot.lane.b32.xlu0 %v2825_v57, %s4324_s3 }
0x4ed0   :  { %v2828_v44 = vpop.permute.xlu0 %2827 }
0x4ed1   :  { %v2830_v18 = vadd.f32 %v2828_v44, %v2820_v53 }
0x4ed3   :  { %4253 = vtanh.f32 %v2830_v18  ;;  %v2888_v57 = vrot.slane %v2830_v18, 6 }
0x4ed9   :  { %v4254_v46 = vpop.eup %4253 }
0x4eda   :  { %2833 = vrot.lane.b32.xlu1 %v4254_v46, %s4324_s3 }
0x4f4c   :  { %v2834_v31 = vpop.permute.xlu1 %2833 }
0x4f4d   :  { %v5193_v15 = vmul.f32 %v2834_v31, %v2814_v9 }
0x4f4f   :  { %v2838_v20 = vrot.slane %v5193_v15, 2 }
0x4f51   :  { %2839 = vrot.lane.b32.xlu2 %v2838_v20, %s4325_s9 }
0x4fab   :  { %v2840_v13 = vpop.permute.xlu2 %2839 }
0x4fac   :  { %3857 = vmatmul.msk.f32.vlgmr.msra.gmra.mxu0 %vm141_vm7, %v2840_v13 }
0x5029   :  { %v2860_v1 = vpop.f32.mrf.mxu0 }
0x502a   :  { %v2864_v16 = vrot.slane %v2860_v1, 4 }
0x502c   :  { %v2866_v27 = vadd.f32 %v2864_v16, %v5175_v56 }
0x502e   :  { %4255 = vtanh.f32 %v2866_v27  ;;  %v3858_v54 = vmul.f32 -1.442695, %v2866_v27 }
0x5030   :  { %4257 = vpow2.f32 %v3858_v54 }
0x5034   :  { %v4256_v7 = vpop.eup %4255 }
0x5035   :  { %2892 = vrot.lane.b32.xlu0 %v4256_v7, %s4324_s3 }
0x5036   :  { %v4258_v36 = vpop.eup %4257 }
0x5037   :  { %v2870_v37 = vadd.f32 1.0, %v4258_v36  ;;  %v2977_v36 = vsel %vm1513_vm2, %v4868_v24, %v4905_v63 }
0x5039   :  { %4259 = vrcp.f32 %v2870_v37  ;;  %v2882_v34 = vand.u32 2147483648, %v2870_v37  ;;  %vm2876_vm14 = vweird.f32 %v2870_v37  ;;  %v2880_v61 = vand.u32 2147483647, %v2870_v37 }
0x503b   :  { %v2883_v35 = vor.u32 1.1754944e-38, %v2882_v34  ;;  %vm2881_vm3 = vcmp.eq.f32.partialorder %v2880_v61, 8.507059e+37  ;;  %v2995_v61 = vld [vmem:[%s5448_s7 + $0x18] sm:$0xff] }
0x503c   :  { %3033 = vmatpush.msrb.mxu2 %v2995_v61 }
0x503f   :  { %v4260_v50 = vpop.eup %4259 }
0x5040   :  { %v2872_v55 = vmul.f32 %v4260_v50, %v2870_v37  ;;  %vm2877_vm13 = vweird.f32 %v4260_v50  ;;  %v2978_v37 = vsel %vm72_vm1, %v2977_v36, %v4928_v29  ;;  %v2980_v36 = vsel %vm1513_vm2, %v4964_v38, %v4980_v11 }
0x5041   :  { %vm2878_vm15 = vmor %vm2876_vm14, %vm2877_vm13  ;;  %vm3171_vm13 = vcmask 23552   ;;  %vm3173_vm14 = vcmask 31744  }
0x5042   :  { %v2873_v58 = vsub.f32 1.0, %v2872_v55 }
0x5044   :  { %v2874_v19 = vmul.f32 %v4260_v50, %v2873_v58 }
0x5046   :  { %v2875_v51 = vadd.f32 %v4260_v50, %v2874_v19 }
0x5048   :  { %v2879_v52 = vsel %vm2878_vm15, %v4260_v50, %v2875_v51  ;;  %v2979_v50 = vsel %vm1516_vm8, %v2978_v37, %v4946_v23  ;;  %vm3175_vm15 = vcmask 39936  }
0x5049   :  { %v2884_v6 = vsel %vm2881_vm3, %v2883_v35, %v2879_v52  ;;  %v2994_v52 = vld [vmem:[%s5448_s7 + $0x10] sm:$0xff]  ;;  %v2993_v35 = vld [vmem:[%s5448_s7 + $0x8] sm:$0xff]  ;;  %vm3177_vm3 = vcmask 48128  }
0x504a   :  { %v2890_v22 = vmul.f32 %v2888_v57, %v2884_v6  ;;  %3034 = vmatpush.msrb.mxu2 %v2994_v52  ;;  %v2983_v52 = vsel %vm1513_vm2, %v5031_v25, %v5067_v62 }
0x504c   :  { %3035 = vmatpush.msrb.mxu2 %v2993_v35  ;;  %v2984_v35 = vsel %vm72_vm1, %v2983_v52, %v5082_v43 }
0x50a7   :  { %v2893_v42 = vpop.permute.xlu0 %2892 }
0x50a8   :  { %v2895_v9 = vmul.f32 %v2893_v42, %v2884_v6  ;;  %v2992_v42 = vld [vmem:[%s5448_s7] sm:$0xff] }
0x50a9   :  { %3036 = vmatpush.msrb.mxu2 %v2992_v42 }
0x50aa   :  { %2897 = vrot.lane.b32.xlu1 %v2895_v9, %s4324_s3 }
0x511c   :  { %v2898_v53 = vpop.permute.xlu1 %2897 }
0x511d   :  { %v2900_v44 = vadd.f32 %v2898_v53, %v2890_v22 }
0x511f   :  { %4261 = vtanh.f32 %v2900_v44 }
0x5125   :  { %v4262_v46 = vpop.eup %4261 }
0x5126   :  { %2903 = vrot.lane.b32.xlu2 %v4262_v46, %s4324_s3 }
0x5180   :  { %v2904_v31 = vpop.permute.xlu2 %2903 }
0x5181   :  { %v5204_v13 = vmul.f32 %v2904_v31, %v2884_v6 }
0x5183   :  { %v2908_v1 = vrot.slane %v5204_v13, 4 }
0x5185   :  { %2909 = vrot.lane.b32.xlu0 %v2908_v1, %s4325_s9 }
0x51f7   :  { %v2910_v16 = vpop.permute.xlu0 %2909 }
0x51f8   :  { %3859 = vmatmul.msk.f32.vlgmr.msra.gmra.mxu1 %vm141_vm7, %v2910_v16 }
0x5275   :  { %v2930_v18 = vpop.f32.mrf.mxu1 }
0x5276   :  { %v2934_v27 = vrot.slane %v2930_v18, 2 }
0x5278   :  { %v2936_v7 = vadd.f32 %v2934_v27, %v5175_v56  ;;  %v2986_v56 = vsel %vm1513_vm2, %v5119_v10, %v5137_v59 }
0x5279   :  { %v2987_v55 = vsel %vm72_vm1, %v2986_v56, %v5156_v14 }
0x527a   :  { %4263 = vtanh.f32 %v2936_v7  ;;  %v2988_v58 = vsel %vm1516_vm8, %v2987_v55, %v5167_v60  ;;  %v3860_v19 = vmul.f32 -1.442695, %v2936_v7  ;;  %v2958_v55 = vrot.slane %v2900_v44, 6 }
0x527b   :  { %v2985_v44 = vsel %vm1516_vm8, %v2984_v35, %v5100_v28 }
0x527c   :  { %4265 = vpow2.f32 %v3860_v19 }
0x5280   :  { %v4264_v54 = vpop.eup %4263 }
0x5281   :  { %2962 = vrot.lane.b32.xlu1 %v4264_v54, %s4324_s3 }
0x5282   :  { %v4266_v51 = vpop.eup %4265 }
0x5283   :  { %v2940_v34 = vadd.f32 1.0, %v4266_v51 }
0x5285   :  { %4267 = vrcp.f32 %v2940_v34  ;;  %v2952_v46 = vand.u32 2147483648, %v2940_v34  ;;  %vm2946_vm5 = vweird.f32 %v2940_v34  ;;  %v2950_v31 = vand.u32 2147483647, %v2940_v34 }
0x5287   :  { %v2953_v18 = vor.u32 1.1754944e-38, %v2952_v46  ;;  %vm2951_vm9 = vcmp.eq.f32.partialorder %v2950_v31, 8.507059e+37  ;;  %v2989_v46 = vsel %vm1513_vm2, %v5181_v39, %v5193_v15  ;;  %vm3063_vm2 = vcmask 254976  }
0x5289   :  { %3001 = vrot.lane.b32.xlu1 %v2979_v50, %s4325_s9  ;;  %v2981_v50 = vsel %vm72_vm1, %v2980_v36, %v4995_v47 }
0x528a   :  { %v2982_v56 = vsel %vm1516_vm8, %v2981_v50, %v5013_v32 }
0x528b   :  { %v4268_v6 = vpop.eup %4267 }
0x528c   :  { %v2942_v9 = vmul.f32 %v4268_v6, %v2940_v34  ;;  %vm2947_vm4 = vweird.f32 %v4268_v6 }
0x528d   :  { %vm2948_vm6 = vmor %vm2946_vm5, %vm2947_vm4  ;;  %vm3179_vm4 = vcmask 56320   ;;  %vm3181_vm5 = vcmask 64512  }
0x528e   :  { %v2943_v57 = vsub.f32 1.0, %v2942_v9 }
0x5290   :  { %v2944_v22 = vmul.f32 %v4268_v6, %v2943_v57 }
0x5291   :  { %3007 = vrot.lane.b32.xlu1 %v2988_v58, %s4325_s9 }
0x5292   :  { %v2945_v53 = vadd.f32 %v4268_v6, %v2944_v22 }
0x5294   :  { %v2949_v16 = vsel %vm2948_vm6, %v4268_v6, %v2945_v53  ;;  %v3948_v6 = vld [vmem:[%s5449_s8] ss:$0 sm:$0xff]  ;;  %s4326_s8 = smov 16   ;;  %vm3183_vm6 = vcmask 72704  }
0x5295   :  { %v2954_v7 = vsel %vm2951_vm9, %v2953_v18, %v2949_v16  ;;  %v2990_v16 = vsel %vm72_vm1, %v2989_v46, %v5204_v13  ;;  %vm3067_vm1 = vcmask 257026   ;;  %vm3185_vm9 = vcmask 80896  }
0x5296   :  { %v2960_v58 = vmul.f32 %v2958_v55, %v2954_v7 }
0x52f3   :  { %v2963_v27 = vpop.permute.xlu1 %2962 }
0x52f4   :  { %v2965_v54 = vmul.f32 %v2963_v27, %v2954_v7 }
0x52f6   :  { %2967 = vrot.lane.b32.xlu2 %v2965_v54, %s4324_s3 }
0x52fb   :  { %v3002_v37 = vpop.permute.xlu1 %3001 }
0x52fc   :  { %3861 = vmatmul.msk.f32.vlgmr.msrb.gmra.mxu2 %vm141_vm7, %v3002_v37 }
0x52fe   :  { %3003 = vrot.lane.b32.xlu2 %v2982_v56, %s4325_s9 }
0x5303   :  { %v3008_v54 = vpop.permute.xlu1 %3007 }
0x5350   :  { %v2968_v19 = vpop.permute.xlu2 %2967 }
0x5351   :  { %v2970_v51 = vadd.f32 %v2968_v19, %v2960_v58 }
0x5353   :  { %4269 = vtanh.f32 %v2970_v51 }
0x5358   :  { %v3004_v34 = vpop.permute.xlu2 %3003 }
0x5359   :  { %v4270_v61 = vpop.eup %4269  ;;  %3862 = vmatmul.msk.f32.gmra.mxu2 %vm141_vm7, %v3004_v34 }
0x535a   :  { %2973 = vrot.lane.b32.xlu0 %v4270_v61, %s4324_s3 }
0x5362   :  { %3005 = vrot.lane.b32.xlu0 %v2985_v44, %s4325_s9 }
0x537f   :  { %v3038_v42 = vpop.f32.mrf.mxu2 }
0x5380   :  { %4271 = vtanh.f32 %v3038_v42 }
0x5386   :  { %v4272_v9 = vpop.eup %4271 }
0x5387   :  { %v3062_v57 = vmul.f32 %v4272_v9, %v3948_v6 }
0x5389   :  { %v3072_v22 = vsel %vm3071_vm10, %v3062_v57, 0.0  ;;  %v3068_v44 = vsel %vm3067_vm1, %v3062_v57, 0.0  ;;  %v3064_v46 = vsel %vm3063_vm2, %v3062_v57, 0.0 }
0x538a   :  { %3073 = vadd.xlane.f32.xlu1 %v3072_v22 }
0x53cc   :  { %v2974_v53 = vpop.permute.xlu0 %2973 }
0x53cd   :  { %v5268_v31 = vmul.f32 %v2974_v53, %v2954_v7 }
0x53cf   :  { %v2991_v18 = vsel %vm1516_vm8, %v2990_v16, %v5268_v31  ;;  %vm3075_vm8 = vcmask 261126  }
0x53d0   :  { %3009 = vrot.lane.b32.xlu2 %v2991_v18, %s4325_s9  ;;  %v3076_v22 = vsel %vm3075_vm8, %v3062_v57, 0.0 }
0x53d4   :  { %v3006_v27 = vpop.permute.xlu0 %3005 }
0x53d5   :  { %3863 = vmatmul.msk.f32.gmra.mxu2 %vm141_vm7, %v3006_v27 }
0x53dc   :  { %v3041_v37 = vpop.f32.mrf.mxu2 }
0x53dd   :  { %3864 = vmatmul.msk.f32.gmra.mxu2 %vm141_vm7, %v3008_v54 }
0x542a   :  { %v3010_v36 = vpop.permute.xlu2 %3009 }
0x542b   :  { %3865 = vmatmul.msk.f32.gmra.mxu2 %vm141_vm7, %v3010_v36 }
0x5458   :  { %v3044_v7 = vpop.f32.mrf.mxu2 }
0x5460   :  { %v3047_v50 = vpop.f32.mrf.mxu2 }
0x54ae   :  { %v3050_v56 = vpop.f32.mrf.mxu2 }
0x54af   :  { %4273 = vtanh.f32 %v3050_v56 }
0x54b0   :  { %4275 = vtanh.f32 %v3041_v37 }
0x54b1   :  { %4277 = vtanh.f32 %v3044_v7 }
0x54b2   :  { %4279 = vtanh.f32 %v3047_v50 }
0x54b5   :  { %v4274_v55 = vpop.eup %4273 }
0x54b6   :  { %v3118_v58 = vmul.f32 %v4274_v55, %v3948_v6  ;;  %v4276_v61 = vpop.eup %4275 }
0x54b7   :  { %v3079_v52 = vmul.f32 %v4276_v61, %v3948_v6  ;;  %v4278_v53 = vpop.eup %4277 }
0x54b8   :  { %v3125_v19 = vsel %vm3071_vm10, %v3118_v58, 0.0  ;;  %v3122_v51 = vsel %vm3067_vm1, %v3118_v58, 0.0  ;;  %v3119_v34 = vsel %vm3063_vm2, %v3118_v58, 0.0  ;;  %v3128_v42 = vsel %vm3075_vm8, %v3118_v58, 0.0  ;;  %v4280_v54 = vpop.eup %4279 }
0x54b9   :  { %3126 = vadd.xlane.f32.xlu1 %v3125_v19  ;;  %3123 = vadd.xlane.f32.xlu0 %v3122_v51  ;;  %v3083_v35 = vsel %vm3067_vm1, %v3079_v52, 0.0  ;;  %v3089_v9 = vsel %vm3075_vm8, %v3079_v52, 0.0  ;;  %v3092_v16 = vmul.f32 %v4278_v53, %v3948_v6  ;;  %v3086_v27 = vsel %vm3071_vm10, %v3079_v52, 0.0  ;;  %v3074_v19 = vpop.xlane.xlu1 %3073 }
0x54ba   :  { %3120 = vadd.xlane.f32.xlu2 %v3119_v34  ;;  %v3080_v36 = vsel %vm3063_vm2, %v3079_v52, 0.0  ;;  %v3105_v37 = vmul.f32 %v4280_v54, %v3948_v6 }
0x54bb   :  { %v3099_v18 = vsel %vm3071_vm10, %v3092_v16, 0.0  ;;  %v3093_v56 = vsel %vm3063_vm2, %v3092_v16, 0.0  ;;  %v3096_v57 = vsel %vm3067_vm1, %v3092_v16, 0.0  ;;  %v3102_v55 = vsel %vm3075_vm8, %v3092_v16, 0.0 }
0x54bc   :  { %v3106_v7 = vsel %vm3063_vm2, %v3105_v37, 0.0  ;;  %v3109_v50 = vsel %vm3067_vm1, %v3105_v37, 0.0  ;;  %v3115_v58 = vsel %vm3075_vm8, %v3105_v37, 0.0  ;;  %v3112_v6 = vsel %vm3071_vm10, %v3105_v37, 0.0 }
0x54bd   :  { %vm3187_vm10 = vcmask 89088   ;;  %vm3189_vm1 = vcmask 97280   ;;  %vm3191_vm2 = vcmask 105472   ;;  %vm3193_vm8 = vcmask 113664  }
0x54c1   :  { %3084 = vadd.xlane.f32.xlu1 %v3083_v35  ;;  %3069 = vadd.xlane.f32.xlu0 %v3068_v44 }
0x54c2   :  { %3129 = vadd.xlane.f32.xlu2 %v3128_v42 }
0x54c9   :  { %3090 = vadd.xlane.f32.xlu1 %v3089_v9  ;;  %3077 = vadd.xlane.f32.xlu0 %v3076_v22 }
0x54ca   :  { %3065 = vadd.xlane.f32.xlu2 %v3064_v46 }
0x54d1   :  { %3100 = vadd.xlane.f32.xlu1 %v3099_v18  ;;  %3087 = vadd.xlane.f32.xlu0 %v3086_v27  ;;  %v3135_v27 = vrot.slane %v3074_v19, 4 }
0x54d2   :  { %3081 = vadd.xlane.f32.xlu2 %v3080_v36 }
0x54d9   :  { %3107 = vadd.xlane.f32.xlu1 %v3106_v7  ;;  %3094 = vadd.xlane.f32.xlu0 %v3093_v56 }
0x54da   :  { %3097 = vadd.xlane.f32.xlu2 %v3096_v57 }
0x54e1   :  { %3110 = vadd.xlane.f32.xlu0 %v3109_v50 }
0x54e2   :  { %3103 = vadd.xlane.f32.xlu2 %v3102_v55 }
0x54e9   :  { %3116 = vadd.xlane.f32.xlu0 %v3115_v58 }
0x54ea   :  { %3113 = vadd.xlane.f32.xlu2 %v3112_v6 }
0x552c   :  { %v3124_v51 = vpop.xlane.xlu0 %3123  ;;  %v3127_v61 = vpop.xlane.xlu1 %3126 }
0x552d   :  { %v3121_v34 = vpop.xlane.xlu2 %3120  ;;  %v3198_v52 = vrot.slane %v3124_v51, 2  ;;  %v3201_v35 = vrot.slane %v3127_v61, 4 }
0x552f   :  { %v3206_v44 = vsel %vm3167_vm11, %v3121_v34, %v3198_v52 }
0x5530   :  { %v3207_v53 = vsel %vm3169_vm12, %v3206_v44, %v3201_v35 }
0x5534   :  { %v3070_v42 = vpop.xlane.xlu0 %3069  ;;  %v3085_v50 = vpop.xlane.xlu1 %3084 }
0x5535   :  { %v3130_v9 = vpop.xlane.xlu2 %3129  ;;  %v3132_v16 = vrot.slane %v3070_v42, 2  ;;  %v3141_v61 = vrot.slane %v3085_v50, 2 }
0x5536   :  { %v3204_v22 = vrot.slane %v3130_v9, 6 }
0x5538   :  { %v3208_v46 = vsel %vm3171_vm13, %v3207_v53, %v3204_v22 }
0x5539   :  { %3210 = vrot.lane.b32.xlu1 %v3208_v46, %s4326_s8 }
0x553c   :  { %v3078_v18 = vpop.xlane.xlu0 %3077  ;;  %v3091_v6 = vpop.xlane.xlu1 %3090 }
0x553d   :  { %v3138_v54 = vrot.slane %v3078_v18, 6  ;;  %v3066_v36 = vpop.xlane.xlu2 %3065  ;;  %v3147_v44 = vrot.slane %v3091_v6, 6 }
0x553e   :  { %v3168_v37 = vsel %vm3167_vm11, %v3066_v36, %v3132_v16  ;;  %vm3195_vm11 = vcmask 121856  }
0x553f   :  { %v3170_v7 = vsel %vm3169_vm12, %v3168_v37, %v3135_v27  ;;  %vm3214_vm12 = vcmask 156672  }
0x5540   :  { %v3172_v56 = vsel %vm3171_vm13, %v3170_v7, %v3138_v54 }
0x5544   :  { %v3088_v55 = vpop.xlane.xlu0 %3087  ;;  %v3101_v9 = vpop.xlane.xlu1 %3100 }
0x5545   :  { %v3082_v57 = vpop.xlane.xlu2 %3081  ;;  %v3144_v52 = vrot.slane %v3088_v55, 4  ;;  %v3153_v54 = vrot.slane %v3101_v9, 4 }
0x5546   :  { %v3174_v51 = vsel %vm3173_vm14, %v3172_v56, %v3082_v57 }
0x5547   :  { %v3176_v35 = vsel %vm3175_vm15, %v3174_v51, %v3141_v61 }
0x5548   :  { %v3178_v19 = vsel %vm3177_vm3, %v3176_v35, %v3144_v52  ;;  %vm3453_vm3 = vcmask 523264  }
0x5549   :  { %v3180_v22 = vsel %vm3179_vm4, %v3178_v19, %v3147_v44  ;;  %vm3455_vm4 = vcmask 785408  }
0x554c   :  { %v3095_v34 = vpop.xlane.xlu0 %3094  ;;  %v3108_v56 = vpop.xlane.xlu1 %3107 }
0x554d   :  { %v3098_v58 = vpop.xlane.xlu2 %3097  ;;  %v3182_v46 = vsel %vm3181_vm5, %v3180_v22, %v3095_v34 }
0x554e   :  { %v3150_v53 = vrot.slane %v3098_v58, 2 }
0x5550   :  { %v3184_v18 = vsel %vm3183_vm6, %v3182_v46, %v3150_v53  ;;  %v4327_v46 = vmov 2  }
0x5551   :  { %v3186_v36 = vsel %vm3185_vm9, %v3184_v18, %v3153_v54  ;;  %3896 = vset.pattern.permute.xlu0 %v4327_v46  ;;  %v4329_v18 = vmov 0   ;;  %v4341_v46 = vmov 11  }
0x5552   :  { %3897 = vset.pattern.permute.xlu1 %v4329_v18 }
0x5554   :  { %v3111_v16 = vpop.xlane.xlu0 %3110 }
0x5555   :  { %v3104_v42 = vpop.xlane.xlu2 %3103  ;;  %v3159_v6 = vrot.slane %v3111_v16, 2  ;;  %v4328_v16 = vmov 1  }
0x5556   :  { %v3156_v27 = vrot.slane %v3104_v42, 6  ;;  %3895 = vset.pattern.permute.xlu2 %v4328_v16  ;;  %v4342_v16 = vmov 13  }
0x5558   :  { %v3188_v37 = vsel %vm3187_vm10, %v3186_v36, %v3156_v27 }
0x5559   :  { %v3190_v57 = vsel %vm3189_vm1, %v3188_v37, %v3108_v56 }
0x555a   :  { %v3192_v51 = vsel %vm3191_vm2, %v3190_v57, %v3159_v6 }
0x555c   :  { %v3117_v50 = vpop.xlane.xlu0 %3116 }
0x555d   :  { %v3114_v7 = vpop.xlane.xlu2 %3113  ;;  %v3165_v58 = vrot.slane %v3117_v50, 6 }
0x555e   :  { %v3162_v55 = vrot.slane %v3114_v7, 4 }
0x5560   :  { %v3194_v34 = vsel %vm3193_vm8, %v3192_v51, %v3162_v55 }
0x5561   :  { %v3196_v52 = vsel %vm3195_vm11, %v3194_v34, %v3165_v58  ;;  %v4330_v34 = vmov 3  }
0x55ab   :  { %v3211_v61 = vpop.permute.xlu1 %3210 }
0x55ac   :  { %v3213_v35 = vsel %vm86_vm0, %v3196_v52, %v3211_v61  ;;  %v4331_v61 = vmov 8   ;;  %v4332_v52 = vmov 5  }
0x55ad   :  { %v3215_v19 = vsel %vm3214_vm12, %v3213_v35, -inf }
0x55ae   :  { %3216 = vmax.xlane.f32.xlu2 %v3215_v19  ;;  %v4334_v19 = vmov 14  }
0x5621   :  { %v3217_v44 = vpop.xlane.xlu2 %3216 }
0x5622   :  { %v3218_v42 = vsub.f32 %v3213_v35, %v3217_v44  ;;  %v4333_v35 = vmov 4   ;;  %v4335_v44 = vmov 6  }
0x5624   :  { %v3219_v9 = vmul.f32 1.442695, %v3218_v42  ;;  %v4336_v42 = vmov 7  }
0x5626   :  { %4281 = vpow2.f32 %v3219_v9  ;;  %v4337_v9 = vmov 19  }
0x562c   :  { %v4282_v22 = vpop.eup %4281 }
0x562d   :  { %v3221_v53 = vsel %vm3214_vm12, %v4282_v22, 0.0 }
0x562e   :  { %3222 = vadd.xlane.f32.xlu0 %v3221_v53  ;;  %v4339_v53 = vmov 10  }
0x56a1   :  { %v3223_v27 = vpop.xlane.xlu0 %3222 }
0x56a2   :  { %4283 = vrcp.f32 %v3223_v27  ;;  %v3235_v7 = vand.u32 2147483648, %v3223_v27  ;;  %v3233_v57 = vand.u32 2147483647, %v3223_v27  ;;  %vm3229_vm13 = vweird.f32 %v3223_v27 }
0x56a4   :  { %v3236_v55 = vor.u32 1.1754944e-38, %v3235_v7  ;;  %vm3234_vm15 = vcmp.eq.f32.partialorder %v3233_v57, 8.507059e+37  ;;  %v3919_v7 = vpack.i.bf16 %v2426_v4, %v1874_v30  ;;  %v3929_v57 = vpack.i.bf16 %v2150_v21, %v2702_v26 }
0x56a8   :  { %v4284_v54 = vpop.eup %4283 }
0x56a9   :  { %v3225_v36 = vmul.f32 %v4284_v54, %v3223_v27  ;;  %vm3230_vm0 = vweird.f32 %v4284_v54  ;;  %v4343_v27 = vmov 12  }
0x56aa   :  { %vm3231_vm14 = vmor %vm3229_vm13, %vm3230_vm0 }
0x56ab   :  { %v3226_v37 = vsub.f32 1.0, %v3225_v36  ;;  %v4345_v36 = vmov 17  }
0x56ad   :  { %v3227_v56 = vmul.f32 %v4284_v54, %v3226_v37  ;;  %v4346_v37 = vmov 16  }
0x56af   :  { %v3228_v50 = vadd.f32 %v4284_v54, %v3227_v56  ;;  %v3924_v56 = vpack.i.bf16 %v2010_v12, %v2562_v33 }
0x56b1   :  { %v3232_v6 = vsel %vm3231_vm14, %v4284_v54, %v3228_v50  ;;  %v4344_v54 = vmov 15  }
0x56b2   :  { %v3237_v58 = vsel %vm3234_vm15, %v3236_v55, %v3232_v6 }
0x56b3   :  { %v3238_v51 = vmul.f32 %v4282_v22, %v3237_v58  ;;  %v4338_v22 = vmov 9  }
0x56b5   :  { %3241 = vperm.xlu1 %3897, %v3238_v51   ;;  %3257 = vperm.xlu0 %3896, %v3238_v51  }
0x56b6   :  { %3247 = vperm.xlu2 %3895, %v3238_v51  }
0x56bd   :  { %3898 = vset.pattern.permute.xlu1 %v4330_v34  ;;  %3904 = vset.pattern.permute.xlu0 %v4331_v61 }
0x56be   :  { %3899 = vset.pattern.permute.xlu2 %v4332_v52  ;;  %3267 = vperm.xlu1 %3898, %v3238_v51  }
0x56bf   :  { %3313 = vperm.xlu0 %3904, %v3238_v51   ;;  %3283 = vperm.xlu2 %3899, %v3238_v51  }
0x56c6   :  { %3900 = vset.pattern.permute.xlu1 %v4333_v35 }
0x56c7   :  { %3909 = vset.pattern.permute.xlu0 %v4334_v19  ;;  %3901 = vset.pattern.permute.xlu2 %v4335_v44 }
0x56c8   :  { %3277 = vperm.xlu1 %3900, %v3238_v51   ;;  %3365 = vperm.xlu0 %3909, %v3238_v51  }
0x56c9   :  { %3293 = vperm.xlu2 %3901, %v3238_v51  }
0x56d0   :  { %3902 = vset.pattern.permute.xlu1 %v4336_v42  ;;  %3934 = vset.pattern.permute.xlu0 %v4337_v9 }
0x56d1   :  { %3903 = vset.pattern.permute.xlu2 %v4338_v22  ;;  %3303 = vperm.xlu1 %3902, %v3238_v51  }
0x56d2   :  { %3411 = vperm.xlu0 %3934, %v3238_v51   ;;  %3319 = vperm.xlu2 %3903, %v3238_v51  }
0x56d9   :  { %3905 = vset.pattern.permute.xlu1 %v4339_v53 }
0x56da   :  { %3467 = vrot.lane.b32.xlu0 %v2838_v20, %s4340_s20  ;;  %3906 = vset.pattern.permute.xlu2 %v4341_v46  ;;  %v4347_v20 = vmov 18  }
0x56db   :  { %3329 = vperm.xlu1 %3905, %v3238_v51   ;;  %3339 = vperm.xlu2 %3906, %v3238_v51  }
0x56dc   :  { %3945 = vset.pattern.permute.xlu0 %v4329_v18  ;;  %v3913_v18 = vpack.i.bf16 %v2286_v40, %v1734_v0  ;;  %v3472_v0 = vrot.slane %v5268_v31, 6 }
0x56e3   :  { %3907 = vset.pattern.permute.xlu1 %v4342_v16  ;;  %3908 = vset.pattern.permute.xlu2 %v4343_v27 }
0x56e4   :  { %3355 = vperm.xlu1 %3907, %v3238_v51   ;;  %3349 = vperm.xlu2 %3908, %v3238_v51  }
0x56ec   :  { %3910 = vset.pattern.permute.xlu1 %v4344_v54  ;;  %3911 = vset.pattern.permute.xlu2 %v4345_v36 }
0x56ed   :  { %3375 = vperm.xlu1 %3910, %v3238_v51   ;;  %3391 = vperm.xlu2 %3911, %v3238_v51  }
0x56f5   :  { %3912 = vset.pattern.permute.xlu1 %v4346_v37  ;;  %3918 = vset.pattern.permute.xlu2 %v4347_v20 }
0x56f6   :  { %3385 = vperm.xlu1 %3912, %v3238_v51   ;;  %3401 = vperm.xlu2 %3918, %v3238_v51  }
0x56fe   :  { %3914 = vrot.lane.b32.xlu1 %v3913_v18, %s4340_s20  ;;  %3920 = vrot.lane.b32.xlu2 %v3919_v7, %s4324_s3 }
0x5706   :  { %3925 = vrot.lane.b32.xlu1 %v3924_v56, %s4340_s20  ;;  %3930 = vrot.lane.b32.xlu2 %v3929_v57, %s4324_s3 }
0x570e   :  { %3473 = vrot.lane.b32.xlu1 %v3472_v0, %s4324_s3 }
0x5710   :  { %v3248_v30 = vpop.permute.xlu2 %3247 }
0x5711   :  { %v3249_v12 = vrot.slane %v3248_v30, 6 }
0x5713   :  { %v3251_v51 = vmul.f32 %v3249_v12, %v4905_v63 }
0x5715   :  { %v3253_v35 = vrot.slane %v3251_v51, 2 }
0x5719   :  { %v3284_v40 = vpop.permute.xlu2 %3283 }
0x571a   :  { %v3285_v44 = vrot.slane %v3284_v40, 6 }
0x571c   :  { %v3287_v46 = vmul.f32 %v3285_v44, %v4980_v11 }
0x571e   :  { %v3289_v20 = vrot.slane %v3287_v46, 2 }
0x5723   :  { %v3294_v50 = vpop.permute.xlu2 %3293 }
0x5724   :  { %v3295_v16 = vrot.slane %v3294_v50, 4 }
0x5727   :  { %v3242_v4 = vpop.permute.xlu1 %3241  ;;  %v3258_v6 = vpop.permute.xlu0 %3257 }
0x5728   :  { %v3259_v33 = vrot.slane %v3258_v6, 4  ;;  %v3244_v61 = vmul.f32 %v3242_v4, %v4868_v24  ;;  %v3297_v24 = vmul.f32 %v3295_v16, %v4995_v47 }
0x572a   :  { %v3261_v21 = vmul.f32 %v3259_v33, %v4928_v29  ;;  %v3255_v42 = vadd.f32 %v3253_v35, %v3244_v61  ;;  %v3299_v7 = vrot.slane %v3297_v24, 4 }
0x572c   :  { %v3320_v26 = vpop.permute.xlu2 %3319  ;;  %v3263_v19 = vrot.slane %v3261_v21, 4 }
0x572d   :  { %v3321_v57 = vrot.slane %v3320_v26, 6 }
0x572e   :  { %v3265_v22 = vadd.f32 %v3263_v19, %v3255_v42 }
0x572f   :  { %v3323_v50 = vmul.f32 %v3321_v57, %v5067_v62 }
0x5730   :  { %v3268_v55 = vpop.permute.xlu1 %3267 }
0x5731   :  { %v3269_v58 = vrot.slane %v3268_v55, 2 }
0x5733   :  { %v3271_v52 = vmul.f32 %v3269_v58, %v4946_v23  ;;  %v3325_v58 = vrot.slane %v3323_v50, 2 }
0x5735   :  { %v3273_v9 = vrot.slane %v3271_v52, 6  ;;  %v3340_v54 = vpop.permute.xlu2 %3339 }
0x5736   :  { %v3341_v12 = vrot.slane %v3340_v54, 2  ;;  %v3522_v54 = vld [vmem:[#allocation3 + $0x70] sm:$0xff] }
0x5737   :  { %v3275_v63 = vadd.f32 %v3273_v9, %v3265_v22 }
0x5738   :  { %v3343_v21 = vmul.f32 %v3341_v12, %v5100_v28 }
0x573a   :  { %v3278_v34 = vpop.permute.xlu1 %3277  ;;  %v3345_v19 = vrot.slane %v3343_v21, 6 }
0x573b   :  { %v3280_v53 = vmul.f32 %v3278_v34, %v4964_v38  ;;  %v3314_v38 = vpop.permute.xlu0 %3313 }
0x573c   :  { %v3316_v55 = vmul.f32 %v3314_v38, %v5031_v25 }
0x573d   :  { %v3281_v37 = vadd.f32 %v3280_v53, %v3275_v63 }
0x573e   :  { %v3350_v40 = vpop.permute.xlu2 %3349 }
0x573f   :  { %v3291_v18 = vadd.f32 %v3289_v20, %v3281_v37  ;;  %v3352_v25 = vmul.f32 %v3350_v40, %v5119_v10  ;;  %v3520_v10 = vld [vmem:[#allocation3 + $0x60] sm:$0xff] }
0x5741   :  { %v3301_v0 = vadd.f32 %v3299_v7, %v3291_v18 }
0x5743   :  { %v3304_v27 = vpop.permute.xlu1 %3303  ;;  %v3366_v35 = vpop.permute.xlu0 %3365 }
0x5744   :  { %v3305_v36 = vrot.slane %v3304_v27, 2  ;;  %v3367_v62 = vrot.slane %v3366_v35, 4  ;;  %v3523_v27 = vld [vmem:[#allocation3 + $0x78] sm:$0xff] }
0x5745   :  { %3598 = vmatpush.msrb.mxu3 %v3523_v27 }
0x5746   :  { %v3307_v23 = vmul.f32 %v3305_v36, %v5013_v32  ;;  %v3369_v46 = vmul.f32 %v3367_v62, %v5156_v14  ;;  %v3571_v14 = vld [vmem:[#allocation3 + $0x1f8] sm:$0xff] }
0x5747   :  { %v3392_v61 = vpop.permute.xlu2 %3391  ;;  %3599 = vmatpush.msrb.mxu3 %v3522_v54  ;;  %3658 = vmatpush.msra.mxu2 %v3571_v14  ;;  %v3556_v14 = vld [vmem:[#allocation3 + $0x180] sm:$0xff] }
0x5748   :  { %v3309_v56 = vrot.slane %v3307_v23, 6  ;;  %v3393_v36 = vrot.slane %v3392_v61, 6  ;;  %v3371_v24 = vrot.slane %v3369_v46, 4 }
0x574a   :  { %v3311_v4 = vadd.f32 %v3309_v56, %v3301_v0  ;;  %v3395_v56 = vmul.f32 %v3393_v36, %v5193_v15 }
0x574b   :  { %v3412_v20 = vpop.permute.xlu0 %3411 }
0x574c   :  { %v3317_v33 = vadd.f32 %v3316_v55, %v3311_v4  ;;  %v3413_v7 = vrot.slane %v3412_v20, 2  ;;  %v3397_v50 = vrot.slane %v3395_v56, 2  ;;  %v3537_v56 = vld [vmem:[#allocation3 + $0xe8] sm:$0xff] }
0x574d   :  { %v3330_v30 = vpop.permute.xlu1 %3329 }
0x574e   :  { %v3331_v11 = vrot.slane %v3330_v30, 4  ;;  %v3327_v26 = vadd.f32 %v3325_v58, %v3317_v33  ;;  %v3519_v30 = vld [vmem:[#allocation3 + $0x58] sm:$0xff]  ;;  %v3415_v4 = vmul.f32 %v3413_v7, %v5268_v31  ;;  %v3516_v58 = vld [vmem:[#allocation3 + $0x40] sm:$0xff]  ;;  %v3514_v31 = vld [vmem:[#allocation3 + $0x30] sm:$0xff] }
0x574f   :  { %v3554_v7 = vld [vmem:[#allocation3 + $0x170] sm:$0xff] }
0x5750   :  { %v3333_v6 = vmul.f32 %v3331_v11, %v5082_v43  ;;  %v3402_v63 = vpop.permute.xlu2 %3401  ;;  %v3518_v11 = vld [vmem:[#allocation3 + $0x50] sm:$0xff] }
0x5751   :  { %v3403_v23 = vrot.slane %v3402_v63, 4 }
0x5752   :  { %v3335_v32 = vrot.slane %v3333_v6, 4  ;;  %v3517_v6 = vld [vmem:[#allocation3 + $0x48] sm:$0xff] }
0x5754   :  { %v3337_v52 = vadd.f32 %v3335_v32, %v3327_v26  ;;  %v3417_v32 = vrot.slane %v3415_v4, 6  ;;  %v3515_v26 = vld [vmem:[#allocation3 + $0x38] sm:$0xff]  ;;  %v3536_v4 = vld [vmem:[#allocation3 + $0xe0] sm:$0xff] }
0x5756   :  { %v3356_v51 = vpop.permute.xlu1 %3355  ;;  %v3347_v42 = vadd.f32 %v3345_v19, %v3337_v52 }
0x5757   :  { %v3357_v34 = vrot.slane %v3356_v51, 6 }
0x5758   :  { %v3353_v16 = vadd.f32 %v3352_v25, %v3347_v42  ;;  %v3921_v15 = vpop.permute.xlu2 %3920  ;;  %v3513_v25 = vld [vmem:[#allocation3 + $0x28] sm:$0xff] }
0x5759   :  { %v3359_v44 = vmul.f32 %v3357_v34, %v5137_v59  ;;  %v3521_v59 = vld [vmem:[#allocation3 + $0x68] sm:$0xff]  ;;  %v3923_v52 = vunpack.i.h.bf16 %v3921_v15  ;;  %v3922_v35 = vunpack.i.l.bf16 %v3921_v15  ;;  %v3583_v15 = vld [vmem:[#allocation3 + $0x258] sm:$0xff] }
0x575a   :  { %3600 = vmatpush.msrb.mxu3 %v3521_v59  ;;  %v3510_v59 = vld [vmem:[#allocation3 + $0x10] sm:$0xff] }
0x575b   :  { %v3361_v9 = vrot.slane %v3359_v44, 2 }
0x575c   :  { %3601 = vmatpush.msrb.mxu3 %v3520_v10  ;;  %v3538_v10 = vld [vmem:[#allocation3 + $0xf0] sm:$0xff] }
0x575d   :  { %v3363_v37 = vadd.f32 %v3361_v9, %v3353_v16  ;;  %v3468_v16 = vpop.permute.xlu0 %3467 }
0x575e   :  { %3602 = vmatpush.msrb.mxu3 %v3519_v30  ;;  %v3476_v54 = vsel %vm141_vm7, %v5185_v3, %v3468_v16  ;;  %v3570_v3 = vld [vmem:[#allocation3 + $0x1f0] sm:$0xff]  ;;  %v3567_v30 = vld [vmem:[#allocation3 + $0x1d8] sm:$0xff] }
0x575f   :  { %v3376_v22 = vpop.permute.xlu1 %3375  ;;  %v3373_v57 = vadd.f32 %v3371_v24, %v3363_v37  ;;  %v3569_v24 = vld [vmem:[#allocation3 + $0x1e8] sm:$0xff]  ;;  %3659 = vmatpush.msra.mxu2 %v3570_v3  ;;  %v3559_v16 = vld [vmem:[#allocation3 + $0x198] sm:$0xff]  ;;  %v3540_v3 = vld [vmem:[#allocation3 + $0x100] sm:$0xff] }
0x5760   :  { %v3377_v53 = vrot.slane %v3376_v22, 2  ;;  %3603 = vmatpush.msrb.mxu3 %v3518_v11  ;;  %v3585_v11 = vld [vmem:[#allocation3 + $0x268] sm:$0xff] }
0x5761   :  { %3660 = vmatpush.msra.mxu2 %v3569_v24  ;;  %v3591_v24 = vld [vmem:[#allocation3 + $0x298] sm:$0xff] }
0x5762   :  { %v3379_v28 = vmul.f32 %v3377_v53, %v5167_v60  ;;  %v3405_v60 = vmul.f32 %v3403_v23, %v5204_v13  ;;  %3604 = vmatpush.msrb.mxu3 %v3517_v6  ;;  %v3509_v23 = vld [vmem:[#allocation3 + $0x8] sm:$0xff]  ;;  %v3539_v13 = vld [vmem:[#allocation3 + $0xf8] sm:$0xff]  ;;  %v3584_v6 = vld [vmem:[#allocation3 + $0x260] sm:$0xff] }
0x5763   :  { %3618 = vmatpush.msrb.mxu0 %v3539_v13  ;;  %v3589_v13 = vld [vmem:[#allocation3 + $0x288] sm:$0xff] }
0x5764   :  { %v3381_v18 = vrot.slane %v3379_v28, 6  ;;  %v3407_v12 = vrot.slane %v3405_v60, 4  ;;  %3605 = vmatpush.msrb.mxu3 %v3516_v58  ;;  %v3587_v60 = vld [vmem:[#allocation3 + $0x278] sm:$0xff]  ;;  %v3564_v58 = vld [vmem:[#allocation3 + $0x1c0] sm:$0xff] }
0x5765   :  { %3619 = vmatpush.msrb.mxu0 %v3538_v10  ;;  %v3733_v10 = vld [vmem:[%s5452_s11 + $0x70] sm:$0xff] }
0x5766   :  { %v3383_v38 = vadd.f32 %v3381_v18, %v3373_v57  ;;  %3606 = vmatpush.msrb.mxu3 %v3515_v26  ;;  %v3555_v18 = vld [vmem:[#allocation3 + $0x178] sm:$0xff]  ;;  %v3553_v57 = vld [vmem:[#allocation3 + $0x168] sm:$0xff] }
0x5767   :  { %3638 = vmatpush.msrb.mxu1 %v3555_v18  ;;  %3620 = vmatpush.msrb.mxu0 %v3537_v56  ;;  %v3563_v26 = vld [vmem:[#allocation3 + $0x1b8] sm:$0xff]  ;;  %v3588_v18 = vld [vmem:[#allocation3 + $0x280] sm:$0xff] }
0x5768   :  { %v3386_v0 = vpop.permute.xlu1 %3385  ;;  %3607 = vmatpush.msrb.mxu3 %v3514_v31  ;;  %v3562_v31 = vld [vmem:[#allocation3 + $0x1b0] sm:$0xff]  ;;  %v3731_v56 = vld [vmem:[%s5452_s11 + $0x60] sm:$0xff] }
0x5769   :  { %v3388_v40 = vmul.f32 %v3386_v0, %v5181_v39  ;;  %v3508_v0 = vld [vmem:[#allocation3] sm:$0xff]  ;;  %3639 = vmatpush.msrb.mxu1 %v3554_v7  ;;  %3621 = vmatpush.msrb.mxu0 %v3536_v4 }
0x576a   :  { %3608 = vmatpush.msrb.mxu3 %v3513_v25  ;;  %v3579_v25 = vld [vmem:[#allocation3 + $0x238] sm:$0xff]  ;;  %v3732_v7 = vld [vmem:[%s5452_s11 + $0x68] sm:$0xff] }
0x576b   :  { %v3389_v55 = vadd.f32 %v3388_v40, %v3383_v38  ;;  %3640 = vmatpush.msrb.mxu1 %v3553_v57  ;;  %v3566_v38 = vld [vmem:[#allocation3 + $0x1d0] sm:$0xff] }
0x576c   :  { %v3586_v40 = vld [vmem:[#allocation3 + $0x270] sm:$0xff] }
0x576d   :  { %v3399_v33 = vadd.f32 %v3397_v50, %v3389_v55  ;;  %v3552_v50 = vld [vmem:[#allocation3 + $0x160] sm:$0xff]  ;;  %v3565_v55 = vld [vmem:[#allocation3 + $0x1c8] sm:$0xff]  ;;  %v3730_v57 = vld [vmem:[%s5452_s11 + $0x58] sm:$0xff] }
0x576e   :  { %3641 = vmatpush.msrb.mxu1 %v3552_v50 }
0x576f   :  { %v3409_v51 = vadd.f32 %v3407_v12, %v3399_v33  ;;  %v3535_v12 = vld [vmem:[#allocation3 + $0xd8] sm:$0xff] }
0x5770   :  { %v3915_v21 = vpop.permute.xlu1 %3914  ;;  %v3551_v33 = vld [vmem:[#allocation3 + $0x158] sm:$0xff]  ;;  %3622 = vmatpush.msrb.mxu0 %v3535_v12 }
0x5771   :  { %v3917_v34 = vunpack.i.h.bf16 %v3915_v21  ;;  %v3916_v39 = vunpack.i.l.bf16 %v3915_v21  ;;  %v3419_v61 = vadd.f32 %v3417_v32, %v3409_v51  ;;  %v3534_v32 = vld [vmem:[#allocation3 + $0xd0] sm:$0xff]  ;;  %3642 = vmatpush.msrb.mxu1 %v3551_v33 }
0x5772   :  { %v3550_v51 = vld [vmem:[#allocation3 + $0x150] sm:$0xff]  ;;  %3623 = vmatpush.msrb.mxu0 %v3534_v32 }
0x5773   :  { %v3460_v19 = vsel %vm141_vm7, %v5035_v8, %v3917_v34  ;;  %v3452_v44 = vsel %vm141_vm7, %v4876_v45, %v3916_v39  ;;  %3480 = vrot.lane.b32.xlu2 %v3419_v61, %s4325_s9  ;;  %v3931_v45 = vpop.permute.xlu2 %3930  ;;  %v3582_v21 = vld [vmem:[#allocation3 + $0x250] sm:$0xff]  ;;  %v3533_v34 = vld [vmem:[#allocation3 + $0xc8] sm:$0xff]  ;;  %3643 = vmatpush.msrb.mxu1 %v3550_v51  ;;  %v3727_v51 = vld [vmem:[%s5452_s11 + $0x40] sm:$0xff] }
0x5774   :  { %v3461_v62 = vsel %vm3453_vm3, %v3460_v19, %v2356_v48  ;;  %v3454_v42 = vsel %vm3453_vm3, %v3452_v44, %v1804_v5  ;;  %v3933_v48 = vunpack.i.h.bf16 %v3931_v45  ;;  %v3932_v63 = vunpack.i.l.bf16 %v3931_v45  ;;  %v3549_v39 = vld [vmem:[#allocation3 + $0x148] sm:$0xff]  ;;  %3624 = vmatpush.msrb.mxu0 %v3533_v34  ;;  %v3580_v19 = vld [vmem:[#allocation3 + $0x240] sm:$0xff]  ;;  %v3578_v45 = vld [vmem:[#allocation3 + $0x230] sm:$0xff] }
0x5775   :  { %v3456_v9 = vsel %vm3455_vm4, %v3454_v42, %v3922_v35  ;;  %v3462_v22 = vsel %vm3455_vm4, %v3461_v62, %v3923_v52  ;;  %v3581_v61 = vld [vmem:[#allocation3 + $0x248] sm:$0xff]  ;;  %v3532_v52 = vld [vmem:[#allocation3 + $0xc0] sm:$0xff]  ;;  %3644 = vmatpush.msrb.mxu1 %v3549_v39  ;;  %v3531_v62 = vld [vmem:[#allocation3 + $0xb8] sm:$0xff] }
0x5776   :  { %v3935_v8 = vpack.i.bf16 %v3462_v22, %v3456_v9  ;;  %v3548_v35 = vld [vmem:[#allocation3 + $0x140] sm:$0xff]  ;;  %v3561_v44 = vld [vmem:[#allocation3 + $0x1a8] sm:$0xff]  ;;  %v3547_v42 = vld [vmem:[#allocation3 + $0x138] sm:$0xff]  ;;  %3625 = vmatpush.msrb.mxu0 %v3532_v52 }
0x5777   :  { %3645 = vmatpush.msrb.mxu1 %v3548_v35  ;;  %v3560_v9 = vld [vmem:[#allocation3 + $0x1a0] sm:$0xff]  ;;  %v3530_v22 = vld [vmem:[#allocation3 + $0xb0] sm:$0xff] }
0x5778   :  { %v3926_v53 = vpop.permute.xlu1 %3925  ;;  %3936 = vrot.lane.b32.xlu0 %v3935_v8, %s4324_s3  ;;  %v3546_v8 = vld [vmem:[#allocation3 + $0x130] sm:$0xff]  ;;  %3626 = vmatpush.msrb.mxu0 %v3531_v62  ;;  %v3724_v34 = vld [vmem:[%s5452_s11 + $0x28] sm:$0xff]  ;;  %v3723_v39 = vld [vmem:[%s5452_s11 + $0x20] sm:$0xff] }
0x5779   :  { %v3928_v46 = vunpack.i.h.bf16 %v3926_v53  ;;  %v3927_v43 = vunpack.i.l.bf16 %v3926_v53  ;;  %3646 = vmatpush.msrb.mxu1 %v3547_v42  ;;  %v3529_v53 = vld [vmem:[#allocation3 + $0xa8] sm:$0xff]  ;;  %v3719_v35 = vld [vmem:[%s5452_s11] sm:$0xff] }
0x577a   :  { %3627 = vmatpush.msrb.mxu0 %v3530_v22  ;;  %v3720_v52 = vld [vmem:[%s5452_s11 + $0x8] sm:$0xff] }
0x577b   :  { %v3457_v29 = vsel %vm141_vm7, %v4968_v17, %v3928_v46  ;;  %v3463_v5 = vsel %vm141_vm7, %v5123_v2, %v3927_v43  ;;  %v3477_v2 = vsel %vm3453_vm3, %v3476_v54, %v2908_v1  ;;  %v3568_v1 = vld [vmem:[#allocation3 + $0x1e0] sm:$0xff]  ;;  %3647 = vmatpush.msrb.mxu1 %v3546_v8  ;;  %v3545_v46 = vld [vmem:[#allocation3 + $0x128] sm:$0xff]  ;;  %v3575_v54 = vld [vmem:[#allocation3 + $0x218] sm:$0xff] }
0x577c   :  { %v3458_v28 = vsel %vm3453_vm3, %v3457_v29, %v2080_v49  ;;  %v3464_v27 = vsel %vm3453_vm3, %v3463_v5, %v2632_v41  ;;  %v3512_v49 = vld [vmem:[#allocation3 + $0x20] sm:$0xff]  ;;  %v3511_v41 = vld [vmem:[#allocation3 + $0x18] sm:$0xff]  ;;  %3661 = vmatpush.msra.mxu2 %v3568_v1  ;;  %v3577_v43 = vld [vmem:[#allocation3 + $0x228] sm:$0xff]  ;;  %3628 = vmatpush.msrb.mxu0 %v3529_v53 }
0x577d   :  { %v3459_v36 = vsel %vm3455_vm4, %v3458_v28, %v3933_v48  ;;  %v3465_v37 = vsel %vm3455_vm4, %v3464_v27, %v3932_v63  ;;  %3609 = vmatpush.msrb.mxu3 %v3512_v49  ;;  %3648 = vmatpush.msrb.mxu1 %v3545_v46  ;;  %v3528_v48 = vld [vmem:[#allocation3 + $0xa0] sm:$0xff]  ;;  %v3527_v5 = vld [vmem:[#allocation3 + $0x98] sm:$0xff]  ;;  %v3558_v27 = vld [vmem:[#allocation3 + $0x190] sm:$0xff] }
0x577e   :  { %v3940_v20 = vpack.i.bf16 %v3459_v36, %v3465_v37  ;;  %3662 = vmatpush.msra.mxu2 %v3567_v30  ;;  %v3544_v63 = vld [vmem:[#allocation3 + $0x120] sm:$0xff]  ;;  %3629 = vmatpush.msrb.mxu0 %v3528_v48  ;;  %v3543_v28 = vld [vmem:[#allocation3 + $0x118] sm:$0xff]  ;;  %v3526_v36 = vld [vmem:[#allocation3 + $0x90] sm:$0xff] }
0x577f   :  { %3610 = vmatpush.msrb.mxu3 %v3511_v41  ;;  %v3576_v29 = vld [vmem:[#allocation3 + $0x220] sm:$0xff]  ;;  %3649 = vmatpush.msrb.mxu1 %v3544_v63  ;;  %v3542_v37 = vld [vmem:[#allocation3 + $0x110] sm:$0xff]  ;;  %v3573_v49 = vld [vmem:[#allocation3 + $0x208] sm:$0xff] }
0x5780   :  { %v3474_v17 = vpop.permute.xlu1 %3473  ;;  %3941 = vrot.lane.b32.xlu1 %v3940_v20, %s4324_s3  ;;  %3663 = vmatpush.msra.mxu2 %v3566_v38  ;;  %v3557_v20 = vld [vmem:[#allocation3 + $0x188] sm:$0xff]  ;;  %v3524_v41 = vld [vmem:[#allocation3 + $0x80] sm:$0xff]  ;;  %v3734_v1 = vld [vmem:[%s5452_s11 + $0x78] sm:$0xff] }
0x5781   :  { %v3478_v47 = vsel %vm3455_vm4, %v3477_v2, %v3474_v17  ;;  %3611 = vmatpush.msrb.mxu3 %v3510_v59  ;;  %3630 = vmatpush.msrb.mxu0 %v3527_v5  ;;  %v3574_v17 = vld [vmem:[#allocation3 + $0x210] sm:$0xff]  ;;  %v3525_v2 = vld [vmem:[#allocation3 + $0x88] sm:$0xff]  ;;  %v3572_v59 = vld [vmem:[#allocation3 + $0x200] sm:$0xff] }
0x5782   :  { %3496 = vrot.lane.b32.xlu2 %v3478_v47, %s4324_s3  ;;  %3664 = vmatpush.msra.mxu2 %v3565_v55  ;;  %v3541_v47 = vld [vmem:[#allocation3 + $0x108] sm:$0xff]  ;;  %v3950_v63 = vld [vmem:[#allocation2] ss:$0 sm:$0xff] }
0x5783   :  { %3612 = vmatpush.msrb.mxu3 %v3509_v23  ;;  %3650 = vmatpush.msrb.mxu1 %v3543_v28  ;;  %v3590_v23 = vld [vmem:[#allocation3 + $0x290] sm:$0xff]  ;;  %v3728_v30 = vld [vmem:[%s5452_s11 + $0x48] sm:$0xff] }
0x5784   :  { %3665 = vmatpush.msra.mxu2 %v3564_v58  ;;  %3631 = vmatpush.msrb.mxu0 %v3526_v36 }
0x5785   :  { %3613 = vmatpush.msrb.mxu3 %v3508_v0  ;;  %3651 = vmatpush.msrb.mxu1 %v3542_v37  ;;  %v3729_v0 = vld [vmem:[%s5452_s11 + $0x50] sm:$0xff] }
0x5786   :  { %3666 = vmatpush.msra.mxu2 %v3563_v26  ;;  %3632 = vmatpush.msrb.mxu0 %v3525_v2  ;;  %v3725_v26 = vld [vmem:[%s5452_s11 + $0x30] sm:$0xff] }
0x5787   :  { %3678 = vmatpush.msra.mxu3 %v3587_v60  ;;  %3652 = vmatpush.msrb.mxu1 %v3541_v47 }
0x5788   :  { %3667 = vmatpush.msra.mxu2 %v3562_v31  ;;  %3633 = vmatpush.msrb.mxu0 %v3524_v41  ;;  %v3721_v31 = vld [vmem:[%s5452_s11 + $0x10] sm:$0xff] }
0x5789   :  { %3679 = vmatpush.msra.mxu3 %v3586_v40  ;;  %3653 = vmatpush.msrb.mxu1 %v3540_v3 }
0x578a   :  { %3668 = vmatpush.msra.mxu2 %v3561_v44  ;;  %3710 = vmatpush.msra.mxu0 %v3591_v24 }
0x578b   :  { %3680 = vmatpush.msra.mxu3 %v3585_v11  ;;  %3739 = vmatpush.msra.mxu1 %v3734_v1 }
0x578c   :  { %3669 = vmatpush.msra.mxu2 %v3560_v9  ;;  %3711 = vmatpush.msra.mxu0 %v3590_v23 }
0x578d   :  { %3681 = vmatpush.msra.mxu3 %v3584_v6  ;;  %3740 = vmatpush.msra.mxu1 %v3733_v10 }
0x578e   :  { %3670 = vmatpush.msra.mxu2 %v3559_v16  ;;  %3712 = vmatpush.msra.mxu0 %v3589_v13 }
0x578f   :  { %3682 = vmatpush.msra.mxu3 %v3583_v15  ;;  %3741 = vmatpush.msra.mxu1 %v3732_v7 }
0x5790   :  { %3671 = vmatpush.msra.mxu2 %v3558_v27  ;;  %3713 = vmatpush.msra.mxu0 %v3588_v18 }
0x5791   :  { %3683 = vmatpush.msra.mxu3 %v3582_v21  ;;  %3742 = vmatpush.msra.mxu1 %v3731_v56  ;;  %v3726_v21 = vld [vmem:[%s5452_s11 + $0x38] sm:$0xff] }
0x5792   :  { %3672 = vmatpush.msra.mxu2 %v3557_v20 }
0x5793   :  { %3684 = vmatpush.msra.mxu3 %v3581_v61  ;;  %3743 = vmatpush.msra.mxu1 %v3730_v57  ;;  %v3722_v61 = vld [vmem:[%s5452_s11 + $0x18] sm:$0xff] }
0x5794   :  { %3673 = vmatpush.msra.mxu2 %v3556_v14 }
0x5795   :  { %3685 = vmatpush.msra.mxu3 %v3580_v19  ;;  %3744 = vmatpush.msra.mxu1 %v3729_v0  ;;  %v3949_v19 = vld [vmem:[%s5451_s10] ss:$0 sm:$0xff] }
0x5797   :  { %3686 = vmatpush.msra.mxu3 %v3579_v25  ;;  %3745 = vmatpush.msra.mxu1 %v3728_v30 }
0x5799   :  { %3687 = vmatpush.msra.mxu3 %v3578_v45  ;;  %3746 = vmatpush.msra.mxu1 %v3727_v51 }
0x579b   :  { %3688 = vmatpush.msra.mxu3 %v3577_v43  ;;  %3747 = vmatpush.msra.mxu1 %v3726_v21 }
0x579d   :  { %3689 = vmatpush.msra.mxu3 %v3576_v29  ;;  %3748 = vmatpush.msra.mxu1 %v3725_v26 }
0x579f   :  { %3690 = vmatpush.msra.mxu3 %v3575_v54  ;;  %3749 = vmatpush.msra.mxu1 %v3724_v34 }
0x57a1   :  { %3691 = vmatpush.msra.mxu3 %v3574_v17  ;;  %3750 = vmatpush.msra.mxu1 %v3723_v39 }
0x57a3   :  { %3692 = vmatpush.msra.mxu3 %v3573_v49  ;;  %3751 = vmatpush.msra.mxu1 %v3722_v61 }
0x57a5   :  { %3693 = vmatpush.msra.mxu3 %v3572_v59  ;;  %3752 = vmatpush.msra.mxu1 %v3721_v31 }
0x57a7   :  { %3753 = vmatpush.msra.mxu1 %v3720_v52 }
0x57a9   :  { %3754 = vmatpush.msra.mxu1 %v3719_v35 }
0x57cd   :  { %v3481_v40 = vpop.permute.xlu2 %3480 }
0x57dc   :  { %v3497_v12 = vpop.permute.xlu2 %3496 }
0x57ea   :  { %v3937_v60 = vpop.permute.xlu0 %3936 }
0x57eb   :  { %v3938_v38 = vunpack.i.l.bf16 %v3937_v60  ;;  %v3939_v50 = vunpack.i.h.bf16 %v3937_v60 }
0x57ed   :  { %v3507_v11 = vsel %vm141_vm7, %v3481_v40, %v3938_v38 }
0x57ee   :  { %3614 = vmatmul.f32.vlgmr.msrb.gmra.mxu3 %v3507_v11 }
0x57f2   :  { %v3942_v4 = vpop.permute.xlu1 %3941 }
0x57f3   :  { %v3944_v55 = vunpack.i.h.bf16 %v3942_v4  ;;  %v3943_v6 = vunpack.i.l.bf16 %v3942_v4 }
0x57f5   :  { %v3498_v33 = vsel %vm141_vm7, %v3938_v38, %v3944_v55  ;;  %v3499_v15 = vsel %vm141_vm7, %v3944_v55, %v3939_v50  ;;  %v3500_v58 = vsel %vm141_vm7, %v3939_v50, %v3943_v6  ;;  %v3501_v32 = vsel %vm141_vm7, %v3943_v6, %v3497_v12 }
0x57f6   :  { %3634 = vmatmul.f32.vlgmr.msrb.gmra.mxu0 %v3498_v33  ;;  %3654 = vmatmul.f32.vlgmr.msrb.gmra.mxu1 %v3499_v15 }
0x57f7   :  { %3674 = vmatmul.f32.vlgmr.msra.gmra.mxu2 %v3500_v58  ;;  %3694 = vmatmul.f32.vlgmr.msra.gmra.mxu3 %v3501_v32 }
0x57fe   :  { %3866 = vmatmul.msk.f32.vlgmr.msra.gmra.mxu0 %vm141_vm7, %v3497_v12 }
0x5871   :  { %v3615_v44 = vpop.f32.mrf.mxu3 }
0x5872   :  { %v3616_v62 = vadd.f32 %v3949_v19, %v3615_v44 }
0x5873   :  { %v3635_v42 = vpop.f32.mrf.mxu0  ;;  %v3655_v9 = vpop.f32.mrf.mxu1 }
0x5874   :  { %v3636_v25 = vadd.f32 %v3635_v42, %v3616_v62 }
0x5876   :  { %v3656_v22 = vadd.f32 %v3655_v9, %v3636_v25 }
0x587a   :  { %v3675_v8 = vpop.f32.mrf.mxu2  ;;  %v3695_v53 = vpop.f32.mrf.mxu3 }
0x587b   :  { %v3676_v45 = vadd.f32 %v3675_v8, %v3656_v22  ;;  %v3715_v43 = vpop.f32.mrf.mxu0 }
0x587d   :  { %v3696_v46 = vadd.f32 %v3695_v53, %v3676_v45 }
0x587f   :  { %v3716_v16 = vadd.f32 %v3715_v43, %v3696_v46 }
0x5881   :  { %v3718_v48 = vmax.f32 %v3716_v16, 0.0 }
0x5883   :  { %3755 = vmatmul.f32.vlgmr.msra.gmra.mxu1 %v3718_v48 }
0x5900   :  { %v3756_v29 = vpop.f32.mrf.mxu1 }
0x5901   :  { %v3757_v5 = vadd.f32 %v3950_v63, %v3756_v29 }
0x5903   :  { %3761 = vperm.xlu0 %3945, %v3757_v5  }
0x5975   :  { %v3762_v28 = vpop.permute.xlu0 %3761 }
0x5976   :  { %3764 = vst [vmem:[%s5454_s13] sm:$0x3] %v3762_v28 }
0x5977   :  { %3769 = vsyncpa [#allocation4], 1 }

</bundles_post_ra>
